<compile_context>
chip_gen: v7x
topology: tpu7x:2x2x1
jax: 0.10.0
libtpu: 0.0.40
codegen_flags: <defaults>
</compile_context>

<pallas_src>
import numpy as np
import jax
import jax.numpy as jnp
from jax.experimental import pallas as pl
from jax.experimental.pallas import tpu as pltpu


def haar_matrix(n: int) -> np.ndarray:
    """Orthonormal full-level Haar DWT matrix H (n x n): coeffs = H @ signal."""
    if n == 1:
        return np.array([[1.0]], dtype=np.float64)
    h_half = haar_matrix(n // 2)
    avg = np.kron(np.eye(n // 2), np.array([1.0, 1.0]) / np.sqrt(2.0))
    dif = np.kron(np.eye(n // 2), np.array([1.0, -1.0]) / np.sqrt(2.0))
    return np.vstack([h_half @ avg, dif])


def simple_block1d_kernel(x_ref, fc0_w_ref, fc0_b_ref, haar_k_ref, ihaar_k_ref,
                          wave_w_ref, conv_w_ref, conv_b_ref,
                          fc1_w_ref, fc1_b_ref, fc2_w_ref, fc2_b_ref,
                          out_ref, mixed_ref):
    x = x_ref[0]                                   # (TB, L, 2)  batch tile, channels-last
    TB, L, _ = x.shape
    W = fc0_w_ref.shape[1]
    keep = haar_k_ref.shape[0]

    # Truncated Haar operators broadcast over the batch tile ONCE (hoisted out of the
    # per-block loop) so the DWT / IDWT run as batched MXU matmuls.
    haar_b = jnp.broadcast_to(haar_k_ref[...][None], (TB, keep, L))     # (TB, keep, L)
    ihaar_b = jnp.broadcast_to(ihaar_k_ref[...][None], (TB, L, keep))   # (TB, L, keep)

    def wave_block(h3, w_t):
        # h3: (TB, L, W); w_t: (keep, W_in, W_out)
        # DWT, kept coefficients only: H[:keep] @ h  -> (TB, keep, W)
        ck = jnp.einsum('bkl,blw->bkw', haar_b, h3,
                        preferred_element_type=jnp.float32)
        # Per-coefficient channel mixing on the MXU: `keep` unrolled (TB,W)@(W,W)
        # matmuls written into a VMEM scratch (replaces the old VPU broadcast-multiply
        # + XLU sublane reduction).
        for k in range(keep):
            mixed_ref[:, k, :] = jnp.dot(ck[:, k, :], w_t[k],
                                         preferred_element_type=jnp.float32)
        # IDWT of the kept coefficients (dropped coefficients are zero):
        # H[:keep].T @ mixed -> (TB, L, W)
        return jnp.einsum('blk,bkw->blw', ihaar_b, mixed_ref[...],
                          preferred_element_type=jnp.float32)

    # fc0 lift (2 -> W); the tiny K=2 contraction stays on the VPU as broadcast-mult-add.
    fc0_w = fc0_w_ref[...]                                               # (2, W)
    h3 = (x[:, :, 0:1] * fc0_w[0:1] + x[:, :, 1:2] * fc0_w[1:2]
          + fc0_b_ref[...])                                              # (TB, L, W)

    # Blocks 0..2: the PyTorch forward overwrites x1 + x2 with relu(x1), so the conv
    # branch is dead code there (weights w0..w2 unused) -- matched here.
    for i in range(3):
        h3 = jnp.maximum(wave_block(h3, wave_w_ref[i]), 0.0)

    # Block 3: x = x1 + x2 (wave + 1x1 conv), no relu afterwards.
    x1 = wave_block(h3, wave_w_ref[3])
    h2 = h3.reshape(TB * L, W)                                           # leading-dim merge only
    x2 = jnp.dot(h2, conv_w_ref[3], preferred_element_type=jnp.float32) + conv_b_ref[3]
    h2 = x1.reshape(TB * L, W) + x2                                      # (TB*L, W)

    # fc1 + relu: one large (TB*L, W) @ (W, 128) MXU matmul.
    h2 = jnp.maximum(
        jnp.dot(h2, fc1_w_ref[...], preferred_element_type=jnp.float32) + fc1_b_ref[...],
        0.0)                                                             # (TB*L, 128)

    # fc2 (128 -> 1): broadcast-multiply + lane reduction so the stored output block is
    # the lane-dense (TB, L) slab instead of a width-1 column (avoids masked vst.msk).
    y = jnp.sum(h2.reshape(TB, L, 128) * fc2_w_ref[...], axis=-1) + fc2_b_ref[...]
    out_ref[0] = y                                                       # (TB, L)


def simple_block1d(x, params, *, batch_tile=128):
    """Forward pass. x: (B, L, 2) float32 -> (B, L, 1) float32."""
    B, L, C_in = x.shape
    W = params[0].shape[1]
    keep = params[2].shape[0]

    tb = int(max(1, min(batch_tile, B)))
    pad = (-B) % tb
    if pad:
        x = jnp.concatenate([x, jnp.zeros((pad, L, C_in), x.dtype)], axis=0)
    Bp = B + pad
    G = Bp // tb
    x_t = x.reshape(G, tb, L, C_in)        # one (tb, L, 2) slab per grid step

    def const_spec(a):
        nd = a.ndim
        # NOTE: these grid-invariant weights could additionally be single-buffered
        # (pipeline_mode=pl.Buffered(1)) at large L/keep to halve their VMEM footprint.
        return pl.BlockSpec(a.shape, lambda t: (0,) * nd)

    in_specs = [pl.BlockSpec((1, tb, L, C_in), lambda t: (t, 0, 0, 0))]
    in_specs += [const_spec(a) for a in params]
    out_spec = pl.BlockSpec((1, tb, L), lambda t: (t, 0, 0))

    out = pl.pallas_call(
        simple_block1d_kernel,
        out_shape=jax.ShapeDtypeStruct((G, tb, L), jnp.float32),
        grid_spec=pltpu.PrefetchScalarGridSpec(
            num_scalar_prefetch=0,
            grid=(G,),
            in_specs=in_specs,
            out_specs=out_spec,
            scratch_shapes=[pltpu.VMEM((tb, keep, W), jnp.float32)],
        ),
        compiler_params=pltpu.CompilerParams(
            dimension_semantics=("parallel",),      # batch tiles are independent (megacore)
            vmem_limit_bytes=48 * 1024 * 1024,      # explicit budget; v7x has 64 MiB / TC
        ),
    )(x_t, *params)

    return out.reshape(Bp, L)[:B, :, None]          # (B, L, 1)


def init_params(key, width, input_len, keep):
    W = width
    ks = jax.random.split(key, 9)
    b2 = 1.0 / np.sqrt(2.0)
    bw = 1.0 / np.sqrt(W)
    b128 = 1.0 / np.sqrt(128.0)
    scale = 1.0 / W ** 2

    fc0_w = jax.random.uniform(ks[0], (2, W), jnp.float32, -b2, b2)
    fc0_b = jax.random.uniform(ks[1], (1, W), jnp.float32, -b2, b2)

    # WaveletBlock weights: torch layout (in, out, keep); kernel wants (keep, in, out)
    wave_w = scale * jax.random.uniform(ks[2], (4, W, W, keep), jnp.float32)
    wave_w_t = jnp.transpose(wave_w, (0, 3, 1, 2))                       # (blk, keep, in, out)

    # Conv1d(width, width, 1): torch weight (out, in, 1) -> pre-transposed to (in, out)
    conv_w = jax.random.uniform(ks[3], (4, W, W), jnp.float32, -bw, bw)  # (blk, out, in)
    conv_w_t = jnp.transpose(conv_w, (0, 2, 1))                          # (blk, in, out)
    conv_b = jax.random.uniform(ks[4], (4, 1, W), jnp.float32, -bw, bw)

    fc1_w = jax.random.uniform(ks[5], (W, 128), jnp.float32, -bw, bw)    # pre-transposed (in, out)
    fc1_b = jax.random.uniform(ks[6], (1, 128), jnp.float32, -bw, bw)
    fc2_w = jax.random.uniform(ks[7], (1, 128), jnp.float32, -b128, b128)  # torch layout (out=1, in)
    fc2_b = jax.random.uniform(ks[8], (1, 1), jnp.float32, -b128, b128)

    # Truncated Haar operators: only the kept rows are ever needed.
    H = np.asarray(haar_matrix(input_len), dtype=np.float64)
    haar_k = jnp.asarray(H[:keep, :], dtype=jnp.float32)                 # (keep, L)
    ihaar_k = jnp.asarray(H[:keep, :].T, dtype=jnp.float32)              # (L, keep)

    return (fc0_w, fc0_b, haar_k, ihaar_k, wave_w_t, conv_w_t, conv_b,
            fc1_w, fc1_b, fc2_w, fc2_b)


def reference_forward(x, params):
    """Plain-JAX reference with identical semantics (for verification)."""
    (fc0_w, fc0_b, haar_k, ihaar_k, wave_w_t, conv_w_t, conv_b,
     fc1_w, fc1_b, fc2_w, fc2_b) = params

    def wave(h, wt):                                   # h: (B, L, W); wt: (keep, in, out)
        ck = jnp.einsum('kl,blw->bkw', haar_k, h)
        mixed = jnp.einsum('bki,kio->bko', ck, wt)
        return jnp.einsum('lk,bko->blo', ihaar_k, mixed)

    h = x @ fc0_w + fc0_b
    for i in range(3):
        h = jnp.maximum(wave(h, wave_w_t[i]), 0.0)
    x1 = wave(h, wave_w_t[3])
    x2 = h @ conv_w_t[3] + conv_b[3]
    h = x1 + x2
    h = jnp.maximum(h @ fc1_w + fc1_b, 0.0)
    return h @ fc2_w.T + fc2_b


if __name__ == "__main__":
    # Small demo: batch=16 tiled 8 per grid step (2 grid steps), L=16, W=32, keep=8.
    batch, input_len, width, keep = 16, 16, 32, 8   # input_len must be a power of 2 (Haar)

    key = jax.random.PRNGKey(0)
    k_x, k_p = jax.random.split(key)
    x = jax.random.normal(k_x, (batch, input_len, 2), dtype=jnp.float32)
    params = init_params(k_p, width, input_len, keep)

    out = jax.block_until_ready(simple_block1d(x, params, batch_tile=8))
    assert out.shape == (batch, input_len, 1)

    ref = jax.block_until_ready(reference_forward(x, params))
    np.testing.assert_allclose(np.asarray(out), np.asarray(ref), rtol=1e-4, atol=1e-4)

    print("KERNEL_OK")
</pallas_src>

<mosaic_0001>
module attributes {stable_mosaic.version = 11 : i64} {
  func.func @simple_block1d_kernel(%arg0: i32, %arg1: memref<1x8x16x2xf32, #tpu.memory_space<vmem>>, %arg2: memref<2x32xf32, #tpu.memory_space<vmem>>, %arg3: memref<1x32xf32, #tpu.memory_space<vmem>>, %arg4: memref<8x16xf32, #tpu.memory_space<vmem>>, %arg5: memref<16x8xf32, #tpu.memory_space<vmem>>, %arg6: memref<4x8x32x32xf32, #tpu.memory_space<vmem>>, %arg7: memref<4x32x32xf32, #tpu.memory_space<vmem>>, %arg8: memref<4x1x32xf32, #tpu.memory_space<vmem>>, %arg9: memref<32x128xf32, #tpu.memory_space<vmem>>, %arg10: memref<1x128xf32, #tpu.memory_space<vmem>>, %arg11: memref<1x128xf32, #tpu.memory_space<vmem>>, %arg12: memref<1x1xf32, #tpu.memory_space<vmem>>, %arg13: memref<1x8x16xf32, #tpu.memory_space<vmem>>, %arg14: memref<8x8x32xf32, #tpu.memory_space<vmem>>) attributes {dimension_semantics = [#tpu.dimension_semantics<parallel>], iteration_bounds = array<i64: 2>, scalar_prefetch = 0 : i64, scratch_operands = 1 : i64, tpu.core_type = #tpu.core_type<tc>, window_params = [{transform_indices = @transform_0, window_bounds = array<i64: 1, 8, 16, 2>}, {pipeline_mode = #tpu.pipeline_mode<synchronous>, transform_indices = @transform_1, window_bounds = array<i64: 2, 32>}, {pipeline_mode = #tpu.pipeline_mode<synchronous>, transform_indices = @transform_2, window_bounds = array<i64: 1, 32>}, {pipeline_mode = #tpu.pipeline_mode<synchronous>, transform_indices = @transform_3, window_bounds = array<i64: 8, 16>}, {pipeline_mode = #tpu.pipeline_mode<synchronous>, transform_indices = @transform_4, window_bounds = array<i64: 16, 8>}, {pipeline_mode = #tpu.pipeline_mode<synchronous>, transform_indices = @transform_5, window_bounds = array<i64: 4, 8, 32, 32>}, {pipeline_mode = #tpu.pipeline_mode<synchronous>, transform_indices = @transform_6, window_bounds = array<i64: 4, 32, 32>}, {pipeline_mode = #tpu.pipeline_mode<synchronous>, transform_indices = @transform_7, window_bounds = array<i64: 4, 1, 32>}, {pipeline_mode = #tpu.pipeline_mode<synchronous>, transform_indices = @transform_8, window_bounds = array<i64: 32, 128>}, {pipeline_mode = #tpu.pipeline_mode<synchronous>, transform_indices = @transform_9, window_bounds = array<i64: 1, 128>}, {pipeline_mode = #tpu.pipeline_mode<synchronous>, transform_indices = @transform_10, window_bounds = array<i64: 1, 128>}, {pipeline_mode = #tpu.pipeline_mode<synchronous>, transform_indices = @transform_11, window_bounds = array<i64: 1, 1>}, {transform_indices = @transform_12, window_bounds = array<i64: 1, 8, 16>}]} {
    %c0 = arith.constant 0 : index
    %c0_0 = arith.constant 0 : index
    %c0_1 = arith.constant 0 : index
    %c0_2 = arith.constant 0 : index
    %0 = vector.load %arg1[%c0, %c0_0, %c0_1, %c0_2] : memref<1x8x16x2xf32, #tpu.memory_space<vmem>>, vector<1x8x16x2xf32>
    %1 = vector.shape_cast %0 : vector<1x8x16x2xf32> to vector<8x16x2xf32>
    %c0_3 = arith.constant 0 : index
    %c0_4 = arith.constant 0 : index
    %2 = vector.load %arg4[%c0_3, %c0_4] : memref<8x16xf32, #tpu.memory_space<vmem>>, vector<8x16xf32>
    %3 = vector.shape_cast %2 : vector<8x16xf32> to vector<1x8x16xf32>
    %4 = vector.shape_cast %3 : vector<1x8x16xf32> to vector<1x8x16xf32>
    %5 = vector.broadcast %4 : vector<1x8x16xf32> to vector<8x8x16xf32>
    %c0_5 = arith.constant 0 : index
    %c0_6 = arith.constant 0 : index
    %6 = vector.load %arg5[%c0_5, %c0_6] : memref<16x8xf32, #tpu.memory_space<vmem>>, vector<16x8xf32>
    %7 = vector.shape_cast %6 : vector<16x8xf32> to vector<1x16x8xf32>
    %8 = vector.shape_cast %7 : vector<1x16x8xf32> to vector<1x16x8xf32>
    %9 = vector.broadcast %8 : vector<1x16x8xf32> to vector<8x16x8xf32>
    %c0_7 = arith.constant 0 : index
    %c0_8 = arith.constant 0 : index
    %10 = vector.load %arg2[%c0_7, %c0_8] : memref<2x32xf32, #tpu.memory_space<vmem>>, vector<2x32xf32>
    %11 = vector.extract_strided_slice %1 {offsets = [0, 0, 0], sizes = [8, 16, 1], strides = [1, 1, 1]} : vector<8x16x2xf32> to vector<8x16x1xf32>
    %12 = vector.extract_strided_slice %10 {offsets = [0, 0], sizes = [1, 32], strides = [1, 1]} : vector<2x32xf32> to vector<1x32xf32>
    %13 = vector.shape_cast %12 : vector<1x32xf32> to vector<1x1x32xf32>
    %14 = vector.broadcast %11 : vector<8x16x1xf32> to vector<8x16x32xf32>
    %15 = vector.broadcast %13 : vector<1x1x32xf32> to vector<8x16x32xf32>
    %16 = arith.mulf %14, %15 : vector<8x16x32xf32>
    %17 = vector.extract_strided_slice %1 {offsets = [0, 0, 1], sizes = [8, 16, 1], strides = [1, 1, 1]} : vector<8x16x2xf32> to vector<8x16x1xf32>
    %18 = vector.extract_strided_slice %10 {offsets = [1, 0], sizes = [1, 32], strides = [1, 1]} : vector<2x32xf32> to vector<1x32xf32>
    %19 = vector.shape_cast %18 : vector<1x32xf32> to vector<1x1x32xf32>
    %20 = vector.broadcast %17 : vector<8x16x1xf32> to vector<8x16x32xf32>
    %21 = vector.broadcast %19 : vector<1x1x32xf32> to vector<8x16x32xf32>
    %22 = arith.mulf %20, %21 : vector<8x16x32xf32>
    %23 = arith.addf %16, %22 : vector<8x16x32xf32>
    %c0_9 = arith.constant 0 : index
    %c0_10 = arith.constant 0 : index
    %24 = vector.load %arg3[%c0_9, %c0_10] : memref<1x32xf32, #tpu.memory_space<vmem>>, vector<1x32xf32>
    %25 = vector.shape_cast %24 : vector<1x32xf32> to vector<1x1x32xf32>
    %26 = vector.broadcast %25 : vector<1x1x32xf32> to vector<8x16x32xf32>
    %27 = arith.addf %23, %26 : vector<8x16x32xf32>
    %c0_11 = arith.constant 0 : index
    %c0_12 = arith.constant 0 : index
    %c0_13 = arith.constant 0 : index
    %c0_14 = arith.constant 0 : index
    %28 = vector.load %arg6[%c0_11, %c0_12, %c0_13, %c0_14] : memref<4x8x32x32xf32, #tpu.memory_space<vmem>>, vector<1x8x32x32xf32>
    %29 = vector.shape_cast %28 : vector<1x8x32x32xf32> to vector<8x32x32xf32>
    "tpu.trace_start"() <{level = 10 : i32, message = "bkl,blw->bkw"}> : () -> ()
    %cst = arith.constant dense<0.000000e+00> : vector<8x8x32xf32>
    %30 = tpu.matmul %5, %27, %cst {dimension_numbers = #tpu.dot_dimension_numbers<[2], [1], [1], [2], [0, 0, 0, 1, 1, 2], [0], [0]>} : vector<8x8x16xf32>, vector<8x16x32xf32>, vector<8x8x32xf32> -> vector<8x8x32xf32>
    "tpu.trace_stop"() : () -> ()
    %31 = vector.extract_strided_slice %30 {offsets = [0, 0, 0], sizes = [8, 1, 32], strides = [1, 1, 1]} : vector<8x8x32xf32> to vector<8x1x32xf32>
    %32 = vector.shape_cast %31 : vector<8x1x32xf32> to vector<8x32xf32>
    %33 = vector.extract_strided_slice %29 {offsets = [0, 0, 0], sizes = [1, 32, 32], strides = [1, 1, 1]} : vector<8x32x32xf32> to vector<1x32x32xf32>
    %34 = vector.shape_cast %33 : vector<1x32x32xf32> to vector<32x32xf32>
    %cst_15 = arith.constant dense<0.000000e+00> : vector<8x32xf32>
    %35 = tpu.matmul %32, %34, %cst_15 {dimension_numbers = #tpu.dot_dimension_numbers<[1], [0], [0], [1], [0, 0, 1, 1], [], []>} : vector<8x32xf32>, vector<32x32xf32>, vector<8x32xf32> -> vector<8x32xf32>
    %c0_16 = arith.constant 0 : index
    %c0_17 = arith.constant 0 : index
    %c0_18 = arith.constant 0 : index
    %36 = vector.load %arg14[%c0_16, %c0_17, %c0_18] : memref<8x8x32xf32, #tpu.memory_space<vmem>>, vector<8x1x32xf32>
    %37 = vector.shape_cast %36 : vector<8x1x32xf32> to vector<8x32xf32>
    %38 = vector.shape_cast %35 : vector<8x32xf32> to vector<8x1x32xf32>
    tpu.vector_store %arg14[%c0_16, %c0_17, %c0_18], %38 {strides = array<i32>} : memref<8x8x32xf32, #tpu.memory_space<vmem>>, vector<8x1x32xf32>,
    %39 = vector.extract_strided_slice %30 {offsets = [0, 1, 0], sizes = [8, 1, 32], strides = [1, 1, 1]} : vector<8x8x32xf32> to vector<8x1x32xf32>
    %40 = vector.shape_cast %39 : vector<8x1x32xf32> to vector<8x32xf32>
    %41 = vector.extract_strided_slice %29 {offsets = [1, 0, 0], sizes = [1, 32, 32], strides = [1, 1, 1]} : vector<8x32x32xf32> to vector<1x32x32xf32>
    %42 = vector.shape_cast %41 : vector<1x32x32xf32> to vector<32x32xf32>
    %cst_19 = arith.constant dense<0.000000e+00> : vector<8x32xf32>
    %43 = tpu.matmul %40, %42, %cst_19 {dimension_numbers = #tpu.dot_dimension_numbers<[1], [0], [0], [1], [0, 0, 1, 1], [], []>} : vector<8x32xf32>, vector<32x32xf32>, vector<8x32xf32> -> vector<8x32xf32>
    %c0_20 = arith.constant 0 : index
    %c1 = arith.constant 1 : index
    %c0_21 = arith.constant 0 : index
    %44 = vector.load %arg14[%c0_20, %c1, %c0_21] : memref<8x8x32xf32, #tpu.memory_space<vmem>>, vector<8x1x32xf32>
    %45 = vector.shape_cast %44 : vector<8x1x32xf32> to vector<8x32xf32>
    %46 = vector.shape_cast %43 : vector<8x32xf32> to vector<8x1x32xf32>
    tpu.vector_store %arg14[%c0_20, %c1, %c0_21], %46 {strides = array<i32>} : memref<8x8x32xf32, #tpu.memory_space<vmem>>, vector<8x1x32xf32>,
    %47 = vector.extract_strided_slice %30 {offsets = [0, 2, 0], sizes = [8, 1, 32], strides = [1, 1, 1]} : vector<8x8x32xf32> to vector<8x1x32xf32>
    %48 = vector.shape_cast %47 : vector<8x1x32xf32> to vector<8x32xf32>
    %49 = vector.extract_strided_slice %29 {offsets = [2, 0, 0], sizes = [1, 32, 32], strides = [1, 1, 1]} : vector<8x32x32xf32> to vector<1x32x32xf32>
    %50 = vector.shape_cast %49 : vector<1x32x32xf32> to vector<32x32xf32>
    %cst_22 = arith.constant dense<0.000000e+00> : vector<8x32xf32>
    %51 = tpu.matmul %48, %50, %cst_22 {dimension_numbers = #tpu.dot_dimension_numbers<[1], [0], [0], [1], [0, 0, 1, 1], [], []>} : vector<8x32xf32>, vector<32x32xf32>, vector<8x32xf32> -> vector<8x32xf32>
    %c0_23 = arith.constant 0 : index
    %c2 = arith.constant 2 : index
    %c0_24 = arith.constant 0 : index
    %52 = vector.load %arg14[%c0_23, %c2, %c0_24] : memref<8x8x32xf32, #tpu.memory_space<vmem>>, vector<8x1x32xf32>
    %53 = vector.shape_cast %52 : vector<8x1x32xf32> to vector<8x32xf32>
    %54 = vector.shape_cast %51 : vector<8x32xf32> to vector<8x1x32xf32>
    tpu.vector_store %arg14[%c0_23, %c2, %c0_24], %54 {strides = array<i32>} : memref<8x8x32xf32, #tpu.memory_space<vmem>>, vector<8x1x32xf32>,
    %55 = vector.extract_strided_slice %30 {offsets = [0, 3, 0], sizes = [8, 1, 32], strides = [1, 1, 1]} : vector<8x8x32xf32> to vector<8x1x32xf32>
    %56 = vector.shape_cast %55 : vector<8x1x32xf32> to vector<8x32xf32>
    %57 = vector.extract_strided_slice %29 {offsets = [3, 0, 0], sizes = [1, 32, 32], strides = [1, 1, 1]} : vector<8x32x32xf32> to vector<1x32x32xf32>
    %58 = vector.shape_cast %57 : vector<1x32x32xf32> to vector<32x32xf32>
    %cst_25 = arith.constant dense<0.000000e+00> : vector<8x32xf32>
    %59 = tpu.matmul %56, %58, %cst_25 {dimension_numbers = #tpu.dot_dimension_numbers<[1], [0], [0], [1], [0, 0, 1, 1], [], []>} : vector<8x32xf32>, vector<32x32xf32>, vector<8x32xf32> -> vector<8x32xf32>
    %c0_26 = arith.constant 0 : index
    %c3 = arith.constant 3 : index
    %c0_27 = arith.constant 0 : index
    %60 = vector.load %arg14[%c0_26, %c3, %c0_27] : memref<8x8x32xf32, #tpu.memory_space<vmem>>, vector<8x1x32xf32>
    %61 = vector.shape_cast %60 : vector<8x1x32xf32> to vector<8x32xf32>
    %62 = vector.shape_cast %59 : vector<8x32xf32> to vector<8x1x32xf32>
    tpu.vector_store %arg14[%c0_26, %c3, %c0_27], %62 {strides = array<i32>} : memref<8x8x32xf32, #tpu.memory_space<vmem>>, vector<8x1x32xf32>,
    %63 = vector.extract_strided_slice %30 {offsets = [0, 4, 0], sizes = [8, 1, 32], strides = [1, 1, 1]} : vector<8x8x32xf32> to vector<8x1x32xf32>
    %64 = vector.shape_cast %63 : vector<8x1x32xf32> to vector<8x32xf32>
    %65 = vector.extract_strided_slice %29 {offsets = [4, 0, 0], sizes = [1, 32, 32], strides = [1, 1, 1]} : vector<8x32x32xf32> to vector<1x32x32xf32>
    %66 = vector.shape_cast %65 : vector<1x32x32xf32> to vector<32x32xf32>
    %cst_28 = arith.constant dense<0.000000e+00> : vector<8x32xf32>
    %67 = tpu.matmul %64, %66, %cst_28 {dimension_numbers = #tpu.dot_dimension_numbers<[1], [0], [0], [1], [0, 0, 1, 1], [], []>} : vector<8x32xf32>, vector<32x32xf32>, vector<8x32xf32> -> vector<8x32xf32>
    %c0_29 = arith.constant 0 : index
    %c4 = arith.constant 4 : index
    %c0_30 = arith.constant 0 : index
    %68 = vector.load %arg14[%c0_29, %c4, %c0_30] : memref<8x8x32xf32, #tpu.memory_space<vmem>>, vector<8x1x32xf32>
    %69 = vector.shape_cast %68 : vector<8x1x32xf32> to vector<8x32xf32>
    %70 = vector.shape_cast %67 : vector<8x32xf32> to vector<8x1x32xf32>
    tpu.vector_store %arg14[%c0_29, %c4, %c0_30], %70 {strides = array<i32>} : memref<8x8x32xf32, #tpu.memory_space<vmem>>, vector<8x1x32xf32>,
    %71 = vector.extract_strided_slice %30 {offsets = [0, 5, 0], sizes = [8, 1, 32], strides = [1, 1, 1]} : vector<8x8x32xf32> to vector<8x1x32xf32>
    %72 = vector.shape_cast %71 : vector<8x1x32xf32> to vector<8x32xf32>
    %73 = vector.extract_strided_slice %29 {offsets = [5, 0, 0], sizes = [1, 32, 32], strides = [1, 1, 1]} : vector<8x32x32xf32> to vector<1x32x32xf32>
    %74 = vector.shape_cast %73 : vector<1x32x32xf32> to vector<32x32xf32>
    %cst_31 = arith.constant dense<0.000000e+00> : vector<8x32xf32>
    %75 = tpu.matmul %72, %74, %cst_31 {dimension_numbers = #tpu.dot_dimension_numbers<[1], [0], [0], [1], [0, 0, 1, 1], [], []>} : vector<8x32xf32>, vector<32x32xf32>, vector<8x32xf32> -> vector<8x32xf32>
    %c0_32 = arith.constant 0 : index
    %c5 = arith.constant 5 : index
    %c0_33 = arith.constant 0 : index
    %76 = vector.load %arg14[%c0_32, %c5, %c0_33] : memref<8x8x32xf32, #tpu.memory_space<vmem>>, vector<8x1x32xf32>
    %77 = vector.shape_cast %76 : vector<8x1x32xf32> to vector<8x32xf32>
    %78 = vector.shape_cast %75 : vector<8x32xf32> to vector<8x1x32xf32>
    tpu.vector_store %arg14[%c0_32, %c5, %c0_33], %78 {strides = array<i32>} : memref<8x8x32xf32, #tpu.memory_space<vmem>>, vector<8x1x32xf32>,
    %79 = vector.extract_strided_slice %30 {offsets = [0, 6, 0], sizes = [8, 1, 32], strides = [1, 1, 1]} : vector<8x8x32xf32> to vector<8x1x32xf32>
    %80 = vector.shape_cast %79 : vector<8x1x32xf32> to vector<8x32xf32>
    %81 = vector.extract_strided_slice %29 {offsets = [6, 0, 0], sizes = [1, 32, 32], strides = [1, 1, 1]} : vector<8x32x32xf32> to vector<1x32x32xf32>
    %82 = vector.shape_cast %81 : vector<1x32x32xf32> to vector<32x32xf32>
    %cst_34 = arith.constant dense<0.000000e+00> : vector<8x32xf32>
    %83 = tpu.matmul %80, %82, %cst_34 {dimension_numbers = #tpu.dot_dimension_numbers<[1], [0], [0], [1], [0, 0, 1, 1], [], []>} : vector<8x32xf32>, vector<32x32xf32>, vector<8x32xf32> -> vector<8x32xf32>
    %c0_35 = arith.constant 0 : index
    %c6 = arith.constant 6 : index
    %c0_36 = arith.constant 0 : index
    %84 = vector.load %arg14[%c0_35, %c6, %c0_36] : memref<8x8x32xf32, #tpu.memory_space<vmem>>, vector<8x1x32xf32>
    %85 = vector.shape_cast %84 : vector<8x1x32xf32> to vector<8x32xf32>
    %86 = vector.shape_cast %83 : vector<8x32xf32> to vector<8x1x32xf32>
    tpu.vector_store %arg14[%c0_35, %c6, %c0_36], %86 {strides = array<i32>} : memref<8x8x32xf32, #tpu.memory_space<vmem>>, vector<8x1x32xf32>,
    %87 = vector.extract_strided_slice %30 {offsets = [0, 7, 0], sizes = [8, 1, 32], strides = [1, 1, 1]} : vector<8x8x32xf32> to vector<8x1x32xf32>
    %88 = vector.shape_cast %87 : vector<8x1x32xf32> to vector<8x32xf32>
    %89 = vector.extract_strided_slice %29 {offsets = [7, 0, 0], sizes = [1, 32, 32], strides = [1, 1, 1]} : vector<8x32x32xf32> to vector<1x32x32xf32>
    %90 = vector.shape_cast %89 : vector<1x32x32xf32> to vector<32x32xf32>
    %cst_37 = arith.constant dense<0.000000e+00> : vector<8x32xf32>
    %91 = tpu.matmul %88, %90, %cst_37 {dimension_numbers = #tpu.dot_dimension_numbers<[1], [0], [0], [1], [0, 0, 1, 1], [], []>} : vector<8x32xf32>, vector<32x32xf32>, vector<8x32xf32> -> vector<8x32xf32>
    %c0_38 = arith.constant 0 : index
    %c7 = arith.constant 7 : index
    %c0_39 = arith.constant 0 : index
    %92 = vector.load %arg14[%c0_38, %c7, %c0_39] : memref<8x8x32xf32, #tpu.memory_space<vmem>>, vector<8x1x32xf32>
    %93 = vector.shape_cast %92 : vector<8x1x32xf32> to vector<8x32xf32>
    %94 = vector.shape_cast %91 : vector<8x32xf32> to vector<8x1x32xf32>
    tpu.vector_store %arg14[%c0_38, %c7, %c0_39], %94 {strides = array<i32>} : memref<8x8x32xf32, #tpu.memory_space<vmem>>, vector<8x1x32xf32>,
    %c0_40 = arith.constant 0 : index
    %c0_41 = arith.constant 0 : index
    %c0_42 = arith.constant 0 : index
    %95 = vector.load %arg14[%c0_40, %c0_41, %c0_42] : memref<8x8x32xf32, #tpu.memory_space<vmem>>, vector<8x8x32xf32>
    "tpu.trace_start"() <{level = 10 : i32, message = "blk,bkw->blw"}> : () -> ()
    %cst_43 = arith.constant dense<0.000000e+00> : vector<8x16x32xf32>
    %96 = tpu.matmul %9, %95, %cst_43 {dimension_numbers = #tpu.dot_dimension_numbers<[2], [1], [1], [2], [0, 0, 0, 1, 1, 2], [0], [0]>} : vector<8x16x8xf32>, vector<8x8x32xf32>, vector<8x16x32xf32> -> vector<8x16x32xf32>
    "tpu.trace_stop"() : () -> ()
    %cst_44 = arith.constant 0.000000e+00 : f32
    %97 = vector.broadcast %cst_44 : f32 to vector<8x16x32xf32>
    %98 = arith.maximumf %96, %97 : vector<8x16x32xf32>
    %c1_45 = arith.constant 1 : index
    %c0_46 = arith.constant 0 : index
    %c0_47 = arith.constant 0 : index
    %c0_48 = arith.constant 0 : index
    %99 = vector.load %arg6[%c1_45, %c0_46, %c0_47, %c0_48] : memref<4x8x32x32xf32, #tpu.memory_space<vmem>>, vector<1x8x32x32xf32>
    %100 = vector.shape_cast %99 : vector<1x8x32x32xf32> to vector<8x32x32xf32>
    "tpu.trace_start"() <{level = 10 : i32, message = "bkl,blw->bkw"}> : () -> ()
    %cst_49 = arith.constant dense<0.000000e+00> : vector<8x8x32xf32>
    %101 = tpu.matmul %5, %98, %cst_49 {dimension_numbers = #tpu.dot_dimension_numbers<[2], [1], [1], [2], [0, 0, 0, 1, 1, 2], [0], [0]>} : vector<8x8x16xf32>, vector<8x16x32xf32>, vector<8x8x32xf32> -> vector<8x8x32xf32>
    "tpu.trace_stop"() : () -> ()
    %102 = vector.extract_strided_slice %101 {offsets = [0, 0, 0], sizes = [8, 1, 32], strides = [1, 1, 1]} : vector<8x8x32xf32> to vector<8x1x32xf32>
    %103 = vector.shape_cast %102 : vector<8x1x32xf32> to vector<8x32xf32>
    %104 = vector.extract_strided_slice %100 {offsets = [0, 0, 0], sizes = [1, 32, 32], strides = [1, 1, 1]} : vector<8x32x32xf32> to vector<1x32x32xf32>
    %105 = vector.shape_cast %104 : vector<1x32x32xf32> to vector<32x32xf32>
    %cst_50 = arith.constant dense<0.000000e+00> : vector<8x32xf32>
    %106 = tpu.matmul %103, %105, %cst_50 {dimension_numbers = #tpu.dot_dimension_numbers<[1], [0], [0], [1], [0, 0, 1, 1], [], []>} : vector<8x32xf32>, vector<32x32xf32>, vector<8x32xf32> -> vector<8x32xf32>
    %c0_51 = arith.constant 0 : index
    %c0_52 = arith.constant 0 : index
    %c0_53 = arith.constant 0 : index
    %107 = vector.load %arg14[%c0_51, %c0_52, %c0_53] : memref<8x8x32xf32, #tpu.memory_space<vmem>>, vector<8x1x32xf32>
    %108 = vector.shape_cast %107 : vector<8x1x32xf32> to vector<8x32xf32>
    %109 = vector.shape_cast %106 : vector<8x32xf32> to vector<8x1x32xf32>
    tpu.vector_store %arg14[%c0_51, %c0_52, %c0_53], %109 {strides = array<i32>} : memref<8x8x32xf32, #tpu.memory_space<vmem>>, vector<8x1x32xf32>,
    %110 = vector.extract_strided_slice %101 {offsets = [0, 1, 0], sizes = [8, 1, 32], strides = [1, 1, 1]} : vector<8x8x32xf32> to vector<8x1x32xf32>
    %111 = vector.shape_cast %110 : vector<8x1x32xf32> to vector<8x32xf32>
    %112 = vector.extract_strided_slice %100 {offsets = [1, 0, 0], sizes = [1, 32, 32], strides = [1, 1, 1]} : vector<8x32x32xf32> to vector<1x32x32xf32>
    %113 = vector.shape_cast %112 : vector<1x32x32xf32> to vector<32x32xf32>
    %cst_54 = arith.constant dense<0.000000e+00> : vector<8x32xf32>
    %114 = tpu.matmul %111, %113, %cst_54 {dimension_numbers = #tpu.dot_dimension_numbers<[1], [0], [0], [1], [0, 0, 1, 1], [], []>} : vector<8x32xf32>, vector<32x32xf32>, vector<8x32xf32> -> vector<8x32xf32>
    %c0_55 = arith.constant 0 : index
    %c1_56 = arith.constant 1 : index
    %c0_57 = arith.constant 0 : index
    %115 = vector.load %arg14[%c0_55, %c1_56, %c0_57] : memref<8x8x32xf32, #tpu.memory_space<vmem>>, vector<8x1x32xf32>
    %116 = vector.shape_cast %115 : vector<8x1x32xf32> to vector<8x32xf32>
    %117 = vector.shape_cast %114 : vector<8x32xf32> to vector<8x1x32xf32>
    tpu.vector_store %arg14[%c0_55, %c1_56, %c0_57], %117 {strides = array<i32>} : memref<8x8x32xf32, #tpu.memory_space<vmem>>, vector<8x1x32xf32>,
    %118 = vector.extract_strided_slice %101 {offsets = [0, 2, 0], sizes = [8, 1, 32], strides = [1, 1, 1]} : vector<8x8x32xf32> to vector<8x1x32xf32>
    %119 = vector.shape_cast %118 : vector<8x1x32xf32> to vector<8x32xf32>
    %120 = vector.extract_strided_slice %100 {offsets = [2, 0, 0], sizes = [1, 32, 32], strides = [1, 1, 1]} : vector<8x32x32xf32> to vector<1x32x32xf32>
    %121 = vector.shape_cast %120 : vector<1x32x32xf32> to vector<32x32xf32>
    %cst_58 = arith.constant dense<0.000000e+00> : vector<8x32xf32>
    %122 = tpu.matmul %119, %121, %cst_58 {dimension_numbers = #tpu.dot_dimension_numbers<[1], [0], [0], [1], [0, 0, 1, 1], [], []>} : vector<8x32xf32>, vector<32x32xf32>, vector<8x32xf32> -> vector<8x32xf32>
    %c0_59 = arith.constant 0 : index
    %c2_60 = arith.constant 2 : index
    %c0_61 = arith.constant 0 : index
    %123 = vector.load %arg14[%c0_59, %c2_60, %c0_61] : memref<8x8x32xf32, #tpu.memory_space<vmem>>, vector<8x1x32xf32>
    %124 = vector.shape_cast %123 : vector<8x1x32xf32> to vector<8x32xf32>
    %125 = vector.shape_cast %122 : vector<8x32xf32> to vector<8x1x32xf32>
    tpu.vector_store %arg14[%c0_59, %c2_60, %c0_61], %125 {strides = array<i32>} : memref<8x8x32xf32, #tpu.memory_space<vmem>>, vector<8x1x32xf32>,
    %126 = vector.extract_strided_slice %101 {offsets = [0, 3, 0], sizes = [8, 1, 32], strides = [1, 1, 1]} : vector<8x8x32xf32> to vector<8x1x32xf32>
    %127 = vector.shape_cast %126 : vector<8x1x32xf32> to vector<8x32xf32>
    %128 = vector.extract_strided_slice %100 {offsets = [3, 0, 0], sizes = [1, 32, 32], strides = [1, 1, 1]} : vector<8x32x32xf32> to vector<1x32x32xf32>
    %129 = vector.shape_cast %128 : vector<1x32x32xf32> to vector<32x32xf32>
    %cst_62 = arith.constant dense<0.000000e+00> : vector<8x32xf32>
    %130 = tpu.matmul %127, %129, %cst_62 {dimension_numbers = #tpu.dot_dimension_numbers<[1], [0], [0], [1], [0, 0, 1, 1], [], []>} : vector<8x32xf32>, vector<32x32xf32>, vector<8x32xf32> -> vector<8x32xf32>
    %c0_63 = arith.constant 0 : index
    %c3_64 = arith.constant 3 : index
    %c0_65 = arith.constant 0 : index
    %131 = vector.load %arg14[%c0_63, %c3_64, %c0_65] : memref<8x8x32xf32, #tpu.memory_space<vmem>>, vector<8x1x32xf32>
    %132 = vector.shape_cast %131 : vector<8x1x32xf32> to vector<8x32xf32>
    %133 = vector.shape_cast %130 : vector<8x32xf32> to vector<8x1x32xf32>
    tpu.vector_store %arg14[%c0_63, %c3_64, %c0_65], %133 {strides = array<i32>} : memref<8x8x32xf32, #tpu.memory_space<vmem>>, vector<8x1x32xf32>,
    %134 = vector.extract_strided_slice %101 {offsets = [0, 4, 0], sizes = [8, 1, 32], strides = [1, 1, 1]} : vector<8x8x32xf32> to vector<8x1x32xf32>
    %135 = vector.shape_cast %134 : vector<8x1x32xf32> to vector<8x32xf32>
    %136 = vector.extract_strided_slice %100 {offsets = [4, 0, 0], sizes = [1, 32, 32], strides = [1, 1, 1]} : vector<8x32x32xf32> to vector<1x32x32xf32>
    %137 = vector.shape_cast %136 : vector<1x32x32xf32> to vector<32x32xf32>
    %cst_66 = arith.constant dense<0.000000e+00> : vector<8x32xf32>
    %138 = tpu.matmul %135, %137, %cst_66 {dimension_numbers = #tpu.dot_dimension_numbers<[1], [0], [0], [1], [0, 0, 1, 1], [], []>} : vector<8x32xf32>, vector<32x32xf32>, vector<8x32xf32> -> vector<8x32xf32>
    %c0_67 = arith.constant 0 : index
    %c4_68 = arith.constant 4 : index
    %c0_69 = arith.constant 0 : index
    %139 = vector.load %arg14[%c0_67, %c4_68, %c0_69] : memref<8x8x32xf32, #tpu.memory_space<vmem>>, vector<8x1x32xf32>
    %140 = vector.shape_cast %139 : vector<8x1x32xf32> to vector<8x32xf32>
    %141 = vector.shape_cast %138 : vector<8x32xf32> to vector<8x1x32xf32>
    tpu.vector_store %arg14[%c0_67, %c4_68, %c0_69], %141 {strides = array<i32>} : memref<8x8x32xf32, #tpu.memory_space<vmem>>, vector<8x1x32xf32>,
    %142 = vector.extract_strided_slice %101 {offsets = [0, 5, 0], sizes = [8, 1, 32], strides = [1, 1, 1]} : vector<8x8x32xf32> to vector<8x1x32xf32>
    %143 = vector.shape_cast %142 : vector<8x1x32xf32> to vector<8x32xf32>
    %144 = vector.extract_strided_slice %100 {offsets = [5, 0, 0], sizes = [1, 32, 32], strides = [1, 1, 1]} : vector<8x32x32xf32> to vector<1x32x32xf32>
    %145 = vector.shape_cast %144 : vector<1x32x32xf32> to vector<32x32xf32>
    %cst_70 = arith.constant dense<0.000000e+00> : vector<8x32xf32>
    %146 = tpu.matmul %143, %145, %cst_70 {dimension_numbers = #tpu.dot_dimension_numbers<[1], [0], [0], [1], [0, 0, 1, 1], [], []>} : vector<8x32xf32>, vector<32x32xf32>, vector<8x32xf32> -> vector<8x32xf32>
    %c0_71 = arith.constant 0 : index
    %c5_72 = arith.constant 5 : index
    %c0_73 = arith.constant 0 : index
    %147 = vector.load %arg14[%c0_71, %c5_72, %c0_73] : memref<8x8x32xf32, #tpu.memory_space<vmem>>, vector<8x1x32xf32>
    %148 = vector.shape_cast %147 : vector<8x1x32xf32> to vector<8x32xf32>
    %149 = vector.shape_cast %146 : vector<8x32xf32> to vector<8x1x32xf32>
    tpu.vector_store %arg14[%c0_71, %c5_72, %c0_73], %149 {strides = array<i32>} : memref<8x8x32xf32, #tpu.memory_space<vmem>>, vector<8x1x32xf32>,
    %150 = vector.extract_strided_slice %101 {offsets = [0, 6, 0], sizes = [8, 1, 32], strides = [1, 1, 1]} : vector<8x8x32xf32> to vector<8x1x32xf32>
    %151 = vector.shape_cast %150 : vector<8x1x32xf32> to vector<8x32xf32>
    %152 = vector.extract_strided_slice %100 {offsets = [6, 0, 0], sizes = [1, 32, 32], strides = [1, 1, 1]} : vector<8x32x32xf32> to vector<1x32x32xf32>
    %153 = vector.shape_cast %152 : vector<1x32x32xf32> to vector<32x32xf32>
    %cst_74 = arith.constant dense<0.000000e+00> : vector<8x32xf32>
    %154 = tpu.matmul %151, %153, %cst_74 {dimension_numbers = #tpu.dot_dimension_numbers<[1], [0], [0], [1], [0, 0, 1, 1], [], []>} : vector<8x32xf32>, vector<32x32xf32>, vector<8x32xf32> -> vector<8x32xf32>
    %c0_75 = arith.constant 0 : index
    %c6_76 = arith.constant 6 : index
    %c0_77 = arith.constant 0 : index
    %155 = vector.load %arg14[%c0_75, %c6_76, %c0_77] : memref<8x8x32xf32, #tpu.memory_space<vmem>>, vector<8x1x32xf32>
    %156 = vector.shape_cast %155 : vector<8x1x32xf32> to vector<8x32xf32>
    %157 = vector.shape_cast %154 : vector<8x32xf32> to vector<8x1x32xf32>
    tpu.vector_store %arg14[%c0_75, %c6_76, %c0_77], %157 {strides = array<i32>} : memref<8x8x32xf32, #tpu.memory_space<vmem>>, vector<8x1x32xf32>,
    %158 = vector.extract_strided_slice %101 {offsets = [0, 7, 0], sizes = [8, 1, 32], strides = [1, 1, 1]} : vector<8x8x32xf32> to vector<8x1x32xf32>
    %159 = vector.shape_cast %158 : vector<8x1x32xf32> to vector<8x32xf32>
    %160 = vector.extract_strided_slice %100 {offsets = [7, 0, 0], sizes = [1, 32, 32], strides = [1, 1, 1]} : vector<8x32x32xf32> to vector<1x32x32xf32>
    %161 = vector.shape_cast %160 : vector<1x32x32xf32> to vector<32x32xf32>
    %cst_78 = arith.constant dense<0.000000e+00> : vector<8x32xf32>
    %162 = tpu.matmul %159, %161, %cst_78 {dimension_numbers = #tpu.dot_dimension_numbers<[1], [0], [0], [1], [0, 0, 1, 1], [], []>} : vector<8x32xf32>, vector<32x32xf32>, vector<8x32xf32> -> vector<8x32xf32>
    %c0_79 = arith.constant 0 : index
    %c7_80 = arith.constant 7 : index
    %c0_81 = arith.constant 0 : index
    %163 = vector.load %arg14[%c0_79, %c7_80, %c0_81] : memref<8x8x32xf32, #tpu.memory_space<vmem>>, vector<8x1x32xf32>
    %164 = vector.shape_cast %163 : vector<8x1x32xf32> to vector<8x32xf32>
    %165 = vector.shape_cast %162 : vector<8x32xf32> to vector<8x1x32xf32>
    tpu.vector_store %arg14[%c0_79, %c7_80, %c0_81], %165 {strides = array<i32>} : memref<8x8x32xf32, #tpu.memory_space<vmem>>, vector<8x1x32xf32>,
    %c0_82 = arith.constant 0 : index
    %c0_83 = arith.constant 0 : index
    %c0_84 = arith.constant 0 : index
    %166 = vector.load %arg14[%c0_82, %c0_83, %c0_84] : memref<8x8x32xf32, #tpu.memory_space<vmem>>, vector<8x8x32xf32>
    "tpu.trace_start"() <{level = 10 : i32, message = "blk,bkw->blw"}> : () -> ()
    %cst_85 = arith.constant dense<0.000000e+00> : vector<8x16x32xf32>
    %167 = tpu.matmul %9, %166, %cst_85 {dimension_numbers = #tpu.dot_dimension_numbers<[2], [1], [1], [2], [0, 0, 0, 1, 1, 2], [0], [0]>} : vector<8x16x8xf32>, vector<8x8x32xf32>, vector<8x16x32xf32> -> vector<8x16x32xf32>
    "tpu.trace_stop"() : () -> ()
    %cst_86 = arith.constant 0.000000e+00 : f32
    %168 = vector.broadcast %cst_86 : f32 to vector<8x16x32xf32>
    %169 = arith.maximumf %167, %168 : vector<8x16x32xf32>
    %c2_87 = arith.constant 2 : index
    %c0_88 = arith.constant 0 : index
    %c0_89 = arith.constant 0 : index
    %c0_90 = arith.constant 0 : index
    %170 = vector.load %arg6[%c2_87, %c0_88, %c0_89, %c0_90] : memref<4x8x32x32xf32, #tpu.memory_space<vmem>>, vector<1x8x32x32xf32>
    %171 = vector.shape_cast %170 : vector<1x8x32x32xf32> to vector<8x32x32xf32>
    "tpu.trace_start"() <{level = 10 : i32, message = "bkl,blw->bkw"}> : () -> ()
    %cst_91 = arith.constant dense<0.000000e+00> : vector<8x8x32xf32>
    %172 = tpu.matmul %5, %169, %cst_91 {dimension_numbers = #tpu.dot_dimension_numbers<[2], [1], [1], [2], [0, 0, 0, 1, 1, 2], [0], [0]>} : vector<8x8x16xf32>, vector<8x16x32xf32>, vector<8x8x32xf32> -> vector<8x8x32xf32>
    "tpu.trace_stop"() : () -> ()
    %173 = vector.extract_strided_slice %172 {offsets = [0, 0, 0], sizes = [8, 1, 32], strides = [1, 1, 1]} : vector<8x8x32xf32> to vector<8x1x32xf32>
    %174 = vector.shape_cast %173 : vector<8x1x32xf32> to vector<8x32xf32>
    %175 = vector.extract_strided_slice %171 {offsets = [0, 0, 0], sizes = [1, 32, 32], strides = [1, 1, 1]} : vector<8x32x32xf32> to vector<1x32x32xf32>
    %176 = vector.shape_cast %175 : vector<1x32x32xf32> to vector<32x32xf32>
    %cst_92 = arith.constant dense<0.000000e+00> : vector<8x32xf32>
    %177 = tpu.matmul %174, %176, %cst_92 {dimension_numbers = #tpu.dot_dimension_numbers<[1], [0], [0], [1], [0, 0, 1, 1], [], []>} : vector<8x32xf32>, vector<32x32xf32>, vector<8x32xf32> -> vector<8x32xf32>
    %c0_93 = arith.constant 0 : index
    %c0_94 = arith.constant 0 : index
    %c0_95 = arith.constant 0 : index
    %178 = vector.load %arg14[%c0_93, %c0_94, %c0_95] : memref<8x8x32xf32, #tpu.memory_space<vmem>>, vector<8x1x32xf32>
    %179 = vector.shape_cast %178 : vector<8x1x32xf32> to vector<8x32xf32>
    %180 = vector.shape_cast %177 : vector<8x32xf32> to vector<8x1x32xf32>
    tpu.vector_store %arg14[%c0_93, %c0_94, %c0_95], %180 {strides = array<i32>} : memref<8x8x32xf32, #tpu.memory_space<vmem>>, vector<8x1x32xf32>,
    %181 = vector.extract_strided_slice %172 {offsets = [0, 1, 0], sizes = [8, 1, 32], strides = [1, 1, 1]} : vector<8x8x32xf32> to vector<8x1x32xf32>
    %182 = vector.shape_cast %181 : vector<8x1x32xf32> to vector<8x32xf32>
    %183 = vector.extract_strided_slice %171 {offsets = [1, 0, 0], sizes = [1, 32, 32], strides = [1, 1, 1]} : vector<8x32x32xf32> to vector<1x32x32xf32>
    %184 = vector.shape_cast %183 : vector<1x32x32xf32> to vector<32x32xf32>
    %cst_96 = arith.constant dense<0.000000e+00> : vector<8x32xf32>
    %185 = tpu.matmul %182, %184, %cst_96 {dimension_numbers = #tpu.dot_dimension_numbers<[1], [0], [0], [1], [0, 0, 1, 1], [], []>} : vector<8x32xf32>, vector<32x32xf32>, vector<8x32xf32> -> vector<8x32xf32>
    %c0_97 = arith.constant 0 : index
    %c1_98 = arith.constant 1 : index
    %c0_99 = arith.constant 0 : index
    %186 = vector.load %arg14[%c0_97, %c1_98, %c0_99] : memref<8x8x32xf32, #tpu.memory_space<vmem>>, vector<8x1x32xf32>
    %187 = vector.shape_cast %186 : vector<8x1x32xf32> to vector<8x32xf32>
    %188 = vector.shape_cast %185 : vector<8x32xf32> to vector<8x1x32xf32>
    tpu.vector_store %arg14[%c0_97, %c1_98, %c0_99], %188 {strides = array<i32>} : memref<8x8x32xf32, #tpu.memory_space<vmem>>, vector<8x1x32xf32>,
    %189 = vector.extract_strided_slice %172 {offsets = [0, 2, 0], sizes = [8, 1, 32], strides = [1, 1, 1]} : vector<8x8x32xf32> to vector<8x1x32xf32>
    %190 = vector.shape_cast %189 : vector<8x1x32xf32> to vector<8x32xf32>
    %191 = vector.extract_strided_slice %171 {offsets = [2, 0, 0], sizes = [1, 32, 32], strides = [1, 1, 1]} : vector<8x32x32xf32> to vector<1x32x32xf32>
    %192 = vector.shape_cast %191 : vector<1x32x32xf32> to vector<32x32xf32>
    %cst_100 = arith.constant dense<0.000000e+00> : vector<8x32xf32>
    %193 = tpu.matmul %190, %192, %cst_100 {dimension_numbers = #tpu.dot_dimension_numbers<[1], [0], [0], [1], [0, 0, 1, 1], [], []>} : vector<8x32xf32>, vector<32x32xf32>, vector<8x32xf32> -> vector<8x32xf32>
    %c0_101 = arith.constant 0 : index
    %c2_102 = arith.constant 2 : index
    %c0_103 = arith.constant 0 : index
    %194 = vector.load %arg14[%c0_101, %c2_102, %c0_103] : memref<8x8x32xf32, #tpu.memory_space<vmem>>, vector<8x1x32xf32>
    %195 = vector.shape_cast %194 : vector<8x1x32xf32> to vector<8x32xf32>
    %196 = vector.shape_cast %193 : vector<8x32xf32> to vector<8x1x32xf32>
    tpu.vector_store %arg14[%c0_101, %c2_102, %c0_103], %196 {strides = array<i32>} : memref<8x8x32xf32, #tpu.memory_space<vmem>>, vector<8x1x32xf32>,
    %197 = vector.extract_strided_slice %172 {offsets = [0, 3, 0], sizes = [8, 1, 32], strides = [1, 1, 1]} : vector<8x8x32xf32> to vector<8x1x32xf32>
    %198 = vector.shape_cast %197 : vector<8x1x32xf32> to vector<8x32xf32>
    %199 = vector.extract_strided_slice %171 {offsets = [3, 0, 0], sizes = [1, 32, 32], strides = [1, 1, 1]} : vector<8x32x32xf32> to vector<1x32x32xf32>
    %200 = vector.shape_cast %199 : vector<1x32x32xf32> to vector<32x32xf32>
    %cst_104 = arith.constant dense<0.000000e+00> : vector<8x32xf32>
    %201 = tpu.matmul %198, %200, %cst_104 {dimension_numbers = #tpu.dot_dimension_numbers<[1], [0], [0], [1], [0, 0, 1, 1], [], []>} : vector<8x32xf32>, vector<32x32xf32>, vector<8x32xf32> -> vector<8x32xf32>
    %c0_105 = arith.constant 0 : index
    %c3_106 = arith.constant 3 : index
    %c0_107 = arith.constant 0 : index
    %202 = vector.load %arg14[%c0_105, %c3_106, %c0_107] : memref<8x8x32xf32, #tpu.memory_space<vmem>>, vector<8x1x32xf32>
    %203 = vector.shape_cast %202 : vector<8x1x32xf32> to vector<8x32xf32>
    %204 = vector.shape_cast %201 : vector<8x32xf32> to vector<8x1x32xf32>
    tpu.vector_store %arg14[%c0_105, %c3_106, %c0_107], %204 {strides = array<i32>} : memref<8x8x32xf32, #tpu.memory_space<vmem>>, vector<8x1x32xf32>,
    %205 = vector.extract_strided_slice %172 {offsets = [0, 4, 0], sizes = [8, 1, 32], strides = [1, 1, 1]} : vector<8x8x32xf32> to vector<8x1x32xf32>
    %206 = vector.shape_cast %205 : vector<8x1x32xf32> to vector<8x32xf32>
    %207 = vector.extract_strided_slice %171 {offsets = [4, 0, 0], sizes = [1, 32, 32], strides = [1, 1, 1]} : vector<8x32x32xf32> to vector<1x32x32xf32>
    %208 = vector.shape_cast %207 : vector<1x32x32xf32> to vector<32x32xf32>
    %cst_108 = arith.constant dense<0.000000e+00> : vector<8x32xf32>
    %209 = tpu.matmul %206, %208, %cst_108 {dimension_numbers = #tpu.dot_dimension_numbers<[1], [0], [0], [1], [0, 0, 1, 1], [], []>} : vector<8x32xf32>, vector<32x32xf32>, vector<8x32xf32> -> vector<8x32xf32>
    %c0_109 = arith.constant 0 : index
    %c4_110 = arith.constant 4 : index
    %c0_111 = arith.constant 0 : index
    %210 = vector.load %arg14[%c0_109, %c4_110, %c0_111] : memref<8x8x32xf32, #tpu.memory_space<vmem>>, vector<8x1x32xf32>
    %211 = vector.shape_cast %210 : vector<8x1x32xf32> to vector<8x32xf32>
    %212 = vector.shape_cast %209 : vector<8x32xf32> to vector<8x1x32xf32>
    tpu.vector_store %arg14[%c0_109, %c4_110, %c0_111], %212 {strides = array<i32>} : memref<8x8x32xf32, #tpu.memory_space<vmem>>, vector<8x1x32xf32>,
    %213 = vector.extract_strided_slice %172 {offsets = [0, 5, 0], sizes = [8, 1, 32], strides = [1, 1, 1]} : vector<8x8x32xf32> to vector<8x1x32xf32>
    %214 = vector.shape_cast %213 : vector<8x1x32xf32> to vector<8x32xf32>
    %215 = vector.extract_strided_slice %171 {offsets = [5, 0, 0], sizes = [1, 32, 32], strides = [1, 1, 1]} : vector<8x32x32xf32> to vector<1x32x32xf32>
    %216 = vector.shape_cast %215 : vector<1x32x32xf32> to vector<32x32xf32>
    %cst_112 = arith.constant dense<0.000000e+00> : vector<8x32xf32>
    %217 = tpu.matmul %214, %216, %cst_112 {dimension_numbers = #tpu.dot_dimension_numbers<[1], [0], [0], [1], [0, 0, 1, 1], [], []>} : vector<8x32xf32>, vector<32x32xf32>, vector<8x32xf32> -> vector<8x32xf32>
    %c0_113 = arith.constant 0 : index
    %c5_114 = arith.constant 5 : index
    %c0_115 = arith.constant 0 : index
    %218 = vector.load %arg14[%c0_113, %c5_114, %c0_115] : memref<8x8x32xf32, #tpu.memory_space<vmem>>, vector<8x1x32xf32>
    %219 = vector.shape_cast %218 : vector<8x1x32xf32> to vector<8x32xf32>
    %220 = vector.shape_cast %217 : vector<8x32xf32> to vector<8x1x32xf32>
    tpu.vector_store %arg14[%c0_113, %c5_114, %c0_115], %220 {strides = array<i32>} : memref<8x8x32xf32, #tpu.memory_space<vmem>>, vector<8x1x32xf32>,
    %221 = vector.extract_strided_slice %172 {offsets = [0, 6, 0], sizes = [8, 1, 32], strides = [1, 1, 1]} : vector<8x8x32xf32> to vector<8x1x32xf32>
    %222 = vector.shape_cast %221 : vector<8x1x32xf32> to vector<8x32xf32>
    %223 = vector.extract_strided_slice %171 {offsets = [6, 0, 0], sizes = [1, 32, 32], strides = [1, 1, 1]} : vector<8x32x32xf32> to vector<1x32x32xf32>
    %224 = vector.shape_cast %223 : vector<1x32x32xf32> to vector<32x32xf32>
    %cst_116 = arith.constant dense<0.000000e+00> : vector<8x32xf32>
    %225 = tpu.matmul %222, %224, %cst_116 {dimension_numbers = #tpu.dot_dimension_numbers<[1], [0], [0], [1], [0, 0, 1, 1], [], []>} : vector<8x32xf32>, vector<32x32xf32>, vector<8x32xf32> -> vector<8x32xf32>
    %c0_117 = arith.constant 0 : index
    %c6_118 = arith.constant 6 : index
    %c0_119 = arith.constant 0 : index
    %226 = vector.load %arg14[%c0_117, %c6_118, %c0_119] : memref<8x8x32xf32, #tpu.memory_space<vmem>>, vector<8x1x32xf32>
    %227 = vector.shape_cast %226 : vector<8x1x32xf32> to vector<8x32xf32>
    %228 = vector.shape_cast %225 : vector<8x32xf32> to vector<8x1x32xf32>
    tpu.vector_store %arg14[%c0_117, %c6_118, %c0_119], %228 {strides = array<i32>} : memref<8x8x32xf32, #tpu.memory_space<vmem>>, vector<8x1x32xf32>,
    %229 = vector.extract_strided_slice %172 {offsets = [0, 7, 0], sizes = [8, 1, 32], strides = [1, 1, 1]} : vector<8x8x32xf32> to vector<8x1x32xf32>
    %230 = vector.shape_cast %229 : vector<8x1x32xf32> to vector<8x32xf32>
    %231 = vector.extract_strided_slice %171 {offsets = [7, 0, 0], sizes = [1, 32, 32], strides = [1, 1, 1]} : vector<8x32x32xf32> to vector<1x32x32xf32>
    %232 = vector.shape_cast %231 : vector<1x32x32xf32> to vector<32x32xf32>
    %cst_120 = arith.constant dense<0.000000e+00> : vector<8x32xf32>
    %233 = tpu.matmul %230, %232, %cst_120 {dimension_numbers = #tpu.dot_dimension_numbers<[1], [0], [0], [1], [0, 0, 1, 1], [], []>} : vector<8x32xf32>, vector<32x32xf32>, vector<8x32xf32> -> vector<8x32xf32>
    %c0_121 = arith.constant 0 : index
    %c7_122 = arith.constant 7 : index
    %c0_123 = arith.constant 0 : index
    %234 = vector.load %arg14[%c0_121, %c7_122, %c0_123] : memref<8x8x32xf32, #tpu.memory_space<vmem>>, vector<8x1x32xf32>
    %235 = vector.shape_cast %234 : vector<8x1x32xf32> to vector<8x32xf32>
    %236 = vector.shape_cast %233 : vector<8x32xf32> to vector<8x1x32xf32>
    tpu.vector_store %arg14[%c0_121, %c7_122, %c0_123], %236 {strides = array<i32>} : memref<8x8x32xf32, #tpu.memory_space<vmem>>, vector<8x1x32xf32>,
    %c0_124 = arith.constant 0 : index
    %c0_125 = arith.constant 0 : index
    %c0_126 = arith.constant 0 : index
    %237 = vector.load %arg14[%c0_124, %c0_125, %c0_126] : memref<8x8x32xf32, #tpu.memory_space<vmem>>, vector<8x8x32xf32>
    "tpu.trace_start"() <{level = 10 : i32, message = "blk,bkw->blw"}> : () -> ()
    %cst_127 = arith.constant dense<0.000000e+00> : vector<8x16x32xf32>
    %238 = tpu.matmul %9, %237, %cst_127 {dimension_numbers = #tpu.dot_dimension_numbers<[2], [1], [1], [2], [0, 0, 0, 1, 1, 2], [0], [0]>} : vector<8x16x8xf32>, vector<8x8x32xf32>, vector<8x16x32xf32> -> vector<8x16x32xf32>
    "tpu.trace_stop"() : () -> ()
    %cst_128 = arith.constant 0.000000e+00 : f32
    %239 = vector.broadcast %cst_128 : f32 to vector<8x16x32xf32>
    %240 = arith.maximumf %238, %239 : vector<8x16x32xf32>
    %c3_129 = arith.constant 3 : index
    %c0_130 = arith.constant 0 : index
    %c0_131 = arith.constant 0 : index
    %c0_132 = arith.constant 0 : index
    %241 = vector.load %arg6[%c3_129, %c0_130, %c0_131, %c0_132] : memref<4x8x32x32xf32, #tpu.memory_space<vmem>>, vector<1x8x32x32xf32>
    %242 = vector.shape_cast %241 : vector<1x8x32x32xf32> to vector<8x32x32xf32>
    "tpu.trace_start"() <{level = 10 : i32, message = "bkl,blw->bkw"}> : () -> ()
    %cst_133 = arith.constant dense<0.000000e+00> : vector<8x8x32xf32>
    %243 = tpu.matmul %5, %240, %cst_133 {dimension_numbers = #tpu.dot_dimension_numbers<[2], [1], [1], [2], [0, 0, 0, 1, 1, 2], [0], [0]>} : vector<8x8x16xf32>, vector<8x16x32xf32>, vector<8x8x32xf32> -> vector<8x8x32xf32>
    "tpu.trace_stop"() : () -> ()
    %244 = vector.extract_strided_slice %243 {offsets = [0, 0, 0], sizes = [8, 1, 32], strides = [1, 1, 1]} : vector<8x8x32xf32> to vector<8x1x32xf32>
    %245 = vector.shape_cast %244 : vector<8x1x32xf32> to vector<8x32xf32>
    %246 = vector.extract_strided_slice %242 {offsets = [0, 0, 0], sizes = [1, 32, 32], strides = [1, 1, 1]} : vector<8x32x32xf32> to vector<1x32x32xf32>
    %247 = vector.shape_cast %246 : vector<1x32x32xf32> to vector<32x32xf32>
    %cst_134 = arith.constant dense<0.000000e+00> : vector<8x32xf32>
    %248 = tpu.matmul %245, %247, %cst_134 {dimension_numbers = #tpu.dot_dimension_numbers<[1], [0], [0], [1], [0, 0, 1, 1], [], []>} : vector<8x32xf32>, vector<32x32xf32>, vector<8x32xf32> -> vector<8x32xf32>
    %c0_135 = arith.constant 0 : index
    %c0_136 = arith.constant 0 : index
    %c0_137 = arith.constant 0 : index
    %249 = vector.load %arg14[%c0_135, %c0_136, %c0_137] : memref<8x8x32xf32, #tpu.memory_space<vmem>>, vector<8x1x32xf32>
    %250 = vector.shape_cast %249 : vector<8x1x32xf32> to vector<8x32xf32>
    %251 = vector.shape_cast %248 : vector<8x32xf32> to vector<8x1x32xf32>
    tpu.vector_store %arg14[%c0_135, %c0_136, %c0_137], %251 {strides = array<i32>} : memref<8x8x32xf32, #tpu.memory_space<vmem>>, vector<8x1x32xf32>,
    %252 = vector.extract_strided_slice %243 {offsets = [0, 1, 0], sizes = [8, 1, 32], strides = [1, 1, 1]} : vector<8x8x32xf32> to vector<8x1x32xf32>
    %253 = vector.shape_cast %252 : vector<8x1x32xf32> to vector<8x32xf32>
    %254 = vector.extract_strided_slice %242 {offsets = [1, 0, 0], sizes = [1, 32, 32], strides = [1, 1, 1]} : vector<8x32x32xf32> to vector<1x32x32xf32>
    %255 = vector.shape_cast %254 : vector<1x32x32xf32> to vector<32x32xf32>
    %cst_138 = arith.constant dense<0.000000e+00> : vector<8x32xf32>
    %256 = tpu.matmul %253, %255, %cst_138 {dimension_numbers = #tpu.dot_dimension_numbers<[1], [0], [0], [1], [0, 0, 1, 1], [], []>} : vector<8x32xf32>, vector<32x32xf32>, vector<8x32xf32> -> vector<8x32xf32>
    %c0_139 = arith.constant 0 : index
    %c1_140 = arith.constant 1 : index
    %c0_141 = arith.constant 0 : index
    %257 = vector.load %arg14[%c0_139, %c1_140, %c0_141] : memref<8x8x32xf32, #tpu.memory_space<vmem>>, vector<8x1x32xf32>
    %258 = vector.shape_cast %257 : vector<8x1x32xf32> to vector<8x32xf32>
    %259 = vector.shape_cast %256 : vector<8x32xf32> to vector<8x1x32xf32>
    tpu.vector_store %arg14[%c0_139, %c1_140, %c0_141], %259 {strides = array<i32>} : memref<8x8x32xf32, #tpu.memory_space<vmem>>, vector<8x1x32xf32>,
    %260 = vector.extract_strided_slice %243 {offsets = [0, 2, 0], sizes = [8, 1, 32], strides = [1, 1, 1]} : vector<8x8x32xf32> to vector<8x1x32xf32>
    %261 = vector.shape_cast %260 : vector<8x1x32xf32> to vector<8x32xf32>
    %262 = vector.extract_strided_slice %242 {offsets = [2, 0, 0], sizes = [1, 32, 32], strides = [1, 1, 1]} : vector<8x32x32xf32> to vector<1x32x32xf32>
    %263 = vector.shape_cast %262 : vector<1x32x32xf32> to vector<32x32xf32>
    %cst_142 = arith.constant dense<0.000000e+00> : vector<8x32xf32>
    %264 = tpu.matmul %261, %263, %cst_142 {dimension_numbers = #tpu.dot_dimension_numbers<[1], [0], [0], [1], [0, 0, 1, 1], [], []>} : vector<8x32xf32>, vector<32x32xf32>, vector<8x32xf32> -> vector<8x32xf32>
    %c0_143 = arith.constant 0 : index
    %c2_144 = arith.constant 2 : index
    %c0_145 = arith.constant 0 : index
    %265 = vector.load %arg14[%c0_143, %c2_144, %c0_145] : memref<8x8x32xf32, #tpu.memory_space<vmem>>, vector<8x1x32xf32>
    %266 = vector.shape_cast %265 : vector<8x1x32xf32> to vector<8x32xf32>
    %267 = vector.shape_cast %264 : vector<8x32xf32> to vector<8x1x32xf32>
    tpu.vector_store %arg14[%c0_143, %c2_144, %c0_145], %267 {strides = array<i32>} : memref<8x8x32xf32, #tpu.memory_space<vmem>>, vector<8x1x32xf32>,
    %268 = vector.extract_strided_slice %243 {offsets = [0, 3, 0], sizes = [8, 1, 32], strides = [1, 1, 1]} : vector<8x8x32xf32> to vector<8x1x32xf32>
    %269 = vector.shape_cast %268 : vector<8x1x32xf32> to vector<8x32xf32>
    %270 = vector.extract_strided_slice %242 {offsets = [3, 0, 0], sizes = [1, 32, 32], strides = [1, 1, 1]} : vector<8x32x32xf32> to vector<1x32x32xf32>
    %271 = vector.shape_cast %270 : vector<1x32x32xf32> to vector<32x32xf32>
    %cst_146 = arith.constant dense<0.000000e+00> : vector<8x32xf32>
    %272 = tpu.matmul %269, %271, %cst_146 {dimension_numbers = #tpu.dot_dimension_numbers<[1], [0], [0], [1], [0, 0, 1, 1], [], []>} : vector<8x32xf32>, vector<32x32xf32>, vector<8x32xf32> -> vector<8x32xf32>
    %c0_147 = arith.constant 0 : index
    %c3_148 = arith.constant 3 : index
    %c0_149 = arith.constant 0 : index
    %273 = vector.load %arg14[%c0_147, %c3_148, %c0_149] : memref<8x8x32xf32, #tpu.memory_space<vmem>>, vector<8x1x32xf32>
    %274 = vector.shape_cast %273 : vector<8x1x32xf32> to vector<8x32xf32>
    %275 = vector.shape_cast %272 : vector<8x32xf32> to vector<8x1x32xf32>
    tpu.vector_store %arg14[%c0_147, %c3_148, %c0_149], %275 {strides = array<i32>} : memref<8x8x32xf32, #tpu.memory_space<vmem>>, vector<8x1x32xf32>,
    %276 = vector.extract_strided_slice %243 {offsets = [0, 4, 0], sizes = [8, 1, 32], strides = [1, 1, 1]} : vector<8x8x32xf32> to vector<8x1x32xf32>
    %277 = vector.shape_cast %276 : vector<8x1x32xf32> to vector<8x32xf32>
    %278 = vector.extract_strided_slice %242 {offsets = [4, 0, 0], sizes = [1, 32, 32], strides = [1, 1, 1]} : vector<8x32x32xf32> to vector<1x32x32xf32>
    %279 = vector.shape_cast %278 : vector<1x32x32xf32> to vector<32x32xf32>
    %cst_150 = arith.constant dense<0.000000e+00> : vector<8x32xf32>
    %280 = tpu.matmul %277, %279, %cst_150 {dimension_numbers = #tpu.dot_dimension_numbers<[1], [0], [0], [1], [0, 0, 1, 1], [], []>} : vector<8x32xf32>, vector<32x32xf32>, vector<8x32xf32> -> vector<8x32xf32>
    %c0_151 = arith.constant 0 : index
    %c4_152 = arith.constant 4 : index
    %c0_153 = arith.constant 0 : index
    %281 = vector.load %arg14[%c0_151, %c4_152, %c0_153] : memref<8x8x32xf32, #tpu.memory_space<vmem>>, vector<8x1x32xf32>
    %282 = vector.shape_cast %281 : vector<8x1x32xf32> to vector<8x32xf32>
    %283 = vector.shape_cast %280 : vector<8x32xf32> to vector<8x1x32xf32>
    tpu.vector_store %arg14[%c0_151, %c4_152, %c0_153], %283 {strides = array<i32>} : memref<8x8x32xf32, #tpu.memory_space<vmem>>, vector<8x1x32xf32>,
    %284 = vector.extract_strided_slice %243 {offsets = [0, 5, 0], sizes = [8, 1, 32], strides = [1, 1, 1]} : vector<8x8x32xf32> to vector<8x1x32xf32>
    %285 = vector.shape_cast %284 : vector<8x1x32xf32> to vector<8x32xf32>
    %286 = vector.extract_strided_slice %242 {offsets = [5, 0, 0], sizes = [1, 32, 32], strides = [1, 1, 1]} : vector<8x32x32xf32> to vector<1x32x32xf32>
    %287 = vector.shape_cast %286 : vector<1x32x32xf32> to vector<32x32xf32>
    %cst_154 = arith.constant dense<0.000000e+00> : vector<8x32xf32>
    %288 = tpu.matmul %285, %287, %cst_154 {dimension_numbers = #tpu.dot_dimension_numbers<[1], [0], [0], [1], [0, 0, 1, 1], [], []>} : vector<8x32xf32>, vector<32x32xf32>, vector<8x32xf32> -> vector<8x32xf32>
    %c0_155 = arith.constant 0 : index
    %c5_156 = arith.constant 5 : index
    %c0_157 = arith.constant 0 : index
    %289 = vector.load %arg14[%c0_155, %c5_156, %c0_157] : memref<8x8x32xf32, #tpu.memory_space<vmem>>, vector<8x1x32xf32>
    %290 = vector.shape_cast %289 : vector<8x1x32xf32> to vector<8x32xf32>
    %291 = vector.shape_cast %288 : vector<8x32xf32> to vector<8x1x32xf32>
    tpu.vector_store %arg14[%c0_155, %c5_156, %c0_157], %291 {strides = array<i32>} : memref<8x8x32xf32, #tpu.memory_space<vmem>>, vector<8x1x32xf32>,
    %292 = vector.extract_strided_slice %243 {offsets = [0, 6, 0], sizes = [8, 1, 32], strides = [1, 1, 1]} : vector<8x8x32xf32> to vector<8x1x32xf32>
    %293 = vector.shape_cast %292 : vector<8x1x32xf32> to vector<8x32xf32>
    %294 = vector.extract_strided_slice %242 {offsets = [6, 0, 0], sizes = [1, 32, 32], strides = [1, 1, 1]} : vector<8x32x32xf32> to vector<1x32x32xf32>
    %295 = vector.shape_cast %294 : vector<1x32x32xf32> to vector<32x32xf32>
    %cst_158 = arith.constant dense<0.000000e+00> : vector<8x32xf32>
    %296 = tpu.matmul %293, %295, %cst_158 {dimension_numbers = #tpu.dot_dimension_numbers<[1], [0], [0], [1], [0, 0, 1, 1], [], []>} : vector<8x32xf32>, vector<32x32xf32>, vector<8x32xf32> -> vector<8x32xf32>
    %c0_159 = arith.constant 0 : index
    %c6_160 = arith.constant 6 : index
    %c0_161 = arith.constant 0 : index
    %297 = vector.load %arg14[%c0_159, %c6_160, %c0_161] : memref<8x8x32xf32, #tpu.memory_space<vmem>>, vector<8x1x32xf32>
    %298 = vector.shape_cast %297 : vector<8x1x32xf32> to vector<8x32xf32>
    %299 = vector.shape_cast %296 : vector<8x32xf32> to vector<8x1x32xf32>
    tpu.vector_store %arg14[%c0_159, %c6_160, %c0_161], %299 {strides = array<i32>} : memref<8x8x32xf32, #tpu.memory_space<vmem>>, vector<8x1x32xf32>,
    %300 = vector.extract_strided_slice %243 {offsets = [0, 7, 0], sizes = [8, 1, 32], strides = [1, 1, 1]} : vector<8x8x32xf32> to vector<8x1x32xf32>
    %301 = vector.shape_cast %300 : vector<8x1x32xf32> to vector<8x32xf32>
    %302 = vector.extract_strided_slice %242 {offsets = [7, 0, 0], sizes = [1, 32, 32], strides = [1, 1, 1]} : vector<8x32x32xf32> to vector<1x32x32xf32>
    %303 = vector.shape_cast %302 : vector<1x32x32xf32> to vector<32x32xf32>
    %cst_162 = arith.constant dense<0.000000e+00> : vector<8x32xf32>
    %304 = tpu.matmul %301, %303, %cst_162 {dimension_numbers = #tpu.dot_dimension_numbers<[1], [0], [0], [1], [0, 0, 1, 1], [], []>} : vector<8x32xf32>, vector<32x32xf32>, vector<8x32xf32> -> vector<8x32xf32>
    %c0_163 = arith.constant 0 : index
    %c7_164 = arith.constant 7 : index
    %c0_165 = arith.constant 0 : index
    %305 = vector.load %arg14[%c0_163, %c7_164, %c0_165] : memref<8x8x32xf32, #tpu.memory_space<vmem>>, vector<8x1x32xf32>
    %306 = vector.shape_cast %305 : vector<8x1x32xf32> to vector<8x32xf32>
    %307 = vector.shape_cast %304 : vector<8x32xf32> to vector<8x1x32xf32>
    tpu.vector_store %arg14[%c0_163, %c7_164, %c0_165], %307 {strides = array<i32>} : memref<8x8x32xf32, #tpu.memory_space<vmem>>, vector<8x1x32xf32>,
    %c0_166 = arith.constant 0 : index
    %c0_167 = arith.constant 0 : index
    %c0_168 = arith.constant 0 : index
    %308 = vector.load %arg14[%c0_166, %c0_167, %c0_168] : memref<8x8x32xf32, #tpu.memory_space<vmem>>, vector<8x8x32xf32>
    "tpu.trace_start"() <{level = 10 : i32, message = "blk,bkw->blw"}> : () -> ()
    %cst_169 = arith.constant dense<0.000000e+00> : vector<8x16x32xf32>
    %309 = tpu.matmul %9, %308, %cst_169 {dimension_numbers = #tpu.dot_dimension_numbers<[2], [1], [1], [2], [0, 0, 0, 1, 1, 2], [0], [0]>} : vector<8x16x8xf32>, vector<8x8x32xf32>, vector<8x16x32xf32> -> vector<8x16x32xf32>
    "tpu.trace_stop"() : () -> ()
    %310 = vector.shape_cast %240 : vector<8x16x32xf32> to vector<128x32xf32>
    %c3_170 = arith.constant 3 : index
    %c0_171 = arith.constant 0 : index
    %c0_172 = arith.constant 0 : index
    %311 = vector.load %arg7[%c3_170, %c0_171, %c0_172] : memref<4x32x32xf32, #tpu.memory_space<vmem>>, vector<1x32x32xf32>
    %312 = vector.shape_cast %311 : vector<1x32x32xf32> to vector<32x32xf32>
    %cst_173 = arith.constant dense<0.000000e+00> : vector<128x32xf32>
    %313 = tpu.matmul %310, %312, %cst_173 {dimension_numbers = #tpu.dot_dimension_numbers<[1], [0], [0], [1], [0, 0, 1, 1], [], []>} : vector<128x32xf32>, vector<32x32xf32>, vector<128x32xf32> -> vector<128x32xf32>
    %c3_174 = arith.constant 3 : index
    %c0_175 = arith.constant 0 : index
    %c0_176 = arith.constant 0 : index
    %314 = vector.load %arg8[%c3_174, %c0_175, %c0_176] : memref<4x1x32xf32, #tpu.memory_space<vmem>>, vector<1x1x32xf32>
    %315 = vector.shape_cast %314 : vector<1x1x32xf32> to vector<1x32xf32>
    %316 = vector.broadcast %315 : vector<1x32xf32> to vector<128x32xf32>
    %317 = arith.addf %313, %316 : vector<128x32xf32>
    %318 = vector.shape_cast %309 : vector<8x16x32xf32> to vector<128x32xf32>
    %319 = arith.addf %318, %317 : vector<128x32xf32>
    %c0_177 = arith.constant 0 : index
    %c0_178 = arith.constant 0 : index
    %320 = vector.load %arg9[%c0_177, %c0_178] : memref<32x128xf32, #tpu.memory_space<vmem>>, vector<32x128xf32>
    %cst_179 = arith.constant dense<0.000000e+00> : vector<128x128xf32>
    %321 = tpu.matmul %319, %320, %cst_179 {dimension_numbers = #tpu.dot_dimension_numbers<[1], [0], [0], [1], [0, 0, 1, 1], [], []>} : vector<128x32xf32>, vector<32x128xf32>, vector<128x128xf32> -> vector<128x128xf32>
    %c0_180 = arith.constant 0 : index
    %c0_181 = arith.constant 0 : index
    %322 = vector.load %arg10[%c0_180, %c0_181] : memref<1x128xf32, #tpu.memory_space<vmem>>, vector<1x128xf32>
    %323 = vector.broadcast %322 : vector<1x128xf32> to vector<128x128xf32>
    %324 = arith.addf %321, %323 : vector<128x128xf32>
    %cst_182 = arith.constant 0.000000e+00 : f32
    %325 = vector.broadcast %cst_182 : f32 to vector<128x128xf32>
    %326 = arith.maximumf %324, %325 : vector<128x128xf32>
    %327 = vector.shape_cast %326 : vector<128x128xf32> to vector<8x16x128xf32>
    %c0_183 = arith.constant 0 : index
    %c0_184 = arith.constant 0 : index
    %328 = vector.load %arg11[%c0_183, %c0_184] : memref<1x128xf32, #tpu.memory_space<vmem>>, vector<1x128xf32>
    %329 = vector.shape_cast %328 : vector<1x128xf32> to vector<1x1x128xf32>
    %330 = vector.broadcast %329 : vector<1x1x128xf32> to vector<8x16x128xf32>
    %331 = arith.mulf %327, %330 : vector<8x16x128xf32>
    %cst_185 = arith.constant dense<0.000000e+00> : vector<8x16xf32>
    %332 = vector.multi_reduction <add>, %331, %cst_185 [2] : vector<8x16x128xf32> to vector<8x16xf32>
    %c0_186 = arith.constant 0 : index
    %c0_187 = arith.constant 0 : index
    %333 = vector.load %arg12[%c0_186, %c0_187] : memref<1x1xf32, #tpu.memory_space<vmem>>, vector<1x1xf32>
    %334 = vector.broadcast %333 : vector<1x1xf32> to vector<8x16xf32>
    %335 = arith.addf %332, %334 : vector<8x16xf32>
    %c0_188 = arith.constant 0 : index
    %c0_189 = arith.constant 0 : index
    %c0_190 = arith.constant 0 : index
    %336 = vector.load %arg13[%c0_188, %c0_189, %c0_190] : memref<1x8x16xf32, #tpu.memory_space<vmem>>, vector<1x8x16xf32>
    %337 = vector.shape_cast %336 : vector<1x8x16xf32> to vector<8x16xf32>
    %338 = vector.shape_cast %335 : vector<8x16xf32> to vector<1x8x16xf32>
    tpu.vector_store %arg13[%c0_188, %c0_189, %c0_190], %338 {strides = array<i32>} : memref<1x8x16xf32, #tpu.memory_space<vmem>>, vector<1x8x16xf32>,
    return
  }
  func.func @transform_0(%arg0: i32) -> (i32, i32, i32, i32) {
    %c0_i32 = arith.constant 0 : i32
    %c0_i32_0 = arith.constant 0 : i32
    %c0_i32_1 = arith.constant 0 : i32
    %c0_i32_2 = arith.constant 0 : i32
    return %arg0, %c0_i32, %c0_i32_0, %c0_i32_1 : i32, i32, i32, i32
  }
  func.func @transform_1(%arg0: i32) -> (i32, i32) {
    %c0_i32 = arith.constant 0 : i32
    %c0_i32_0 = arith.constant 0 : i32
    %c0_i32_1 = arith.constant 0 : i32
    return %c0_i32, %c0_i32_0 : i32, i32
  }
  func.func @transform_2(%arg0: i32) -> (i32, i32) {
    %c0_i32 = arith.constant 0 : i32
    %c0_i32_0 = arith.constant 0 : i32
    %c0_i32_1 = arith.constant 0 : i32
    return %c0_i32, %c0_i32_0 : i32, i32
  }
  func.func @transform_3(%arg0: i32) -> (i32, i32) {
    %c0_i32 = arith.constant 0 : i32
    %c0_i32_0 = arith.constant 0 : i32
    %c0_i32_1 = arith.constant 0 : i32
    return %c0_i32, %c0_i32_0 : i32, i32
  }
  func.func @transform_4(%arg0: i32) -> (i32, i32) {
    %c0_i32 = arith.constant 0 : i32
    %c0_i32_0 = arith.constant 0 : i32
    %c0_i32_1 = arith.constant 0 : i32
    return %c0_i32, %c0_i32_0 : i32, i32
  }
  func.func @transform_5(%arg0: i32) -> (i32, i32, i32, i32) {
    %c0_i32 = arith.constant 0 : i32
    %c0_i32_0 = arith.constant 0 : i32
    %c0_i32_1 = arith.constant 0 : i32
    %c0_i32_2 = arith.constant 0 : i32
    %c0_i32_3 = arith.constant 0 : i32
    return %c0_i32, %c0_i32_0, %c0_i32_1, %c0_i32_2 : i32, i32, i32, i32
  }
  func.func @transform_6(%arg0: i32) -> (i32, i32, i32) {
    %c0_i32 = arith.constant 0 : i32
    %c0_i32_0 = arith.constant 0 : i32
    %c0_i32_1 = arith.constant 0 : i32
    %c0_i32_2 = arith.constant 0 : i32
    return %c0_i32, %c0_i32_0, %c0_i32_1 : i32, i32, i32
  }
  func.func @transform_7(%arg0: i32) -> (i32, i32, i32) {
    %c0_i32 = arith.constant 0 : i32
    %c0_i32_0 = arith.constant 0 : i32
    %c0_i32_1 = arith.constant 0 : i32
    %c0_i32_2 = arith.constant 0 : i32
    return %c0_i32, %c0_i32_0, %c0_i32_1 : i32, i32, i32
  }
  func.func @transform_8(%arg0: i32) -> (i32, i32) {
    %c0_i32 = arith.constant 0 : i32
    %c0_i32_0 = arith.constant 0 : i32
    %c0_i32_1 = arith.constant 0 : i32
    return %c0_i32, %c0_i32_0 : i32, i32
  }
  func.func @transform_9(%arg0: i32) -> (i32, i32) {
    %c0_i32 = arith.constant 0 : i32
    %c0_i32_0 = arith.constant 0 : i32
    %c0_i32_1 = arith.constant 0 : i32
    return %c0_i32, %c0_i32_0 : i32, i32
  }
  func.func @transform_10(%arg0: i32) -> (i32, i32) {
    %c0_i32 = arith.constant 0 : i32
    %c0_i32_0 = arith.constant 0 : i32
    %c0_i32_1 = arith.constant 0 : i32
    return %c0_i32, %c0_i32_0 : i32, i32
  }
  func.func @transform_11(%arg0: i32) -> (i32, i32) {
    %c0_i32 = arith.constant 0 : i32
    %c0_i32_0 = arith.constant 0 : i32
    %c0_i32_1 = arith.constant 0 : i32
    return %c0_i32, %c0_i32_0 : i32, i32
  }
  func.func @transform_12(%arg0: i32) -> (i32, i32, i32) {
    %c0_i32 = arith.constant 0 : i32
    %c0_i32_0 = arith.constant 0 : i32
    %c0_i32_1 = arith.constant 0 : i32
    return %arg0, %c0_i32, %c0_i32_0 : i32, i32, i32
  }
}

</mosaic_0001>

<bundles_post_ra>
// kernel: tpu_custom_call.1
= control target key start
LH: loop header
LB: loop body
LE: loop exit
PB: predicated region body
PF: predicated region fallthrough
CT: control target
= control target key end

     0   :  { %s15172_s0 = inlined_call_operand.vmem [shape: f32[2,8,16,2], index: 0, kind: input, shape index: {}]   ;;  %s15173_s1 = inlined_call_operand.vmem [shape: f32[2,32], index: 1, kind: input, shape index: {}]   ;;  %s15174_s2 = inlined_call_operand.vmem [shape: f32[1,32], index: 2, kind: input, shape index: {}]   ;;  %s15175_s3 = inlined_call_operand.vmem [shape: f32[8,16], index: 3, kind: input, shape index: {}]   ;;  %s15176_s4 = inlined_call_operand.vmem [shape: f32[16,8], index: 4, kind: input, shape index: {}]   ;;  %s15177_s5 = inlined_call_operand.hbm [shape: f32[4,8,32,32], index: 5, kind: input, shape index: {}]   ;;  %s15178_s6 = inlined_call_operand.vmem [shape: f32[4,32,32], index: 6, kind: input, shape index: {}]   ;;  %s15179_s7 = inlined_call_operand.vmem [shape: f32[4,1,32], index: 7, kind: input, shape index: {}]   ;;  %s15180_s8 = inlined_call_operand.vmem [shape: f32[32,128], index: 8, kind: input, shape index: {}]   ;;  %s15181_s9 = inlined_call_operand.vmem [shape: f32[1,128], index: 9, kind: input, shape index: {}]   ;;  %s15182_s10 = inlined_call_operand.vmem [shape: f32[1,128], index: 10, kind: input, shape index: {}]   ;;  %s15183_s11 = inlined_call_operand.<no memory space> [shape: f32[1,1], index: 11, kind: input, shape index: {}]   ;;  %s15184_s12 = inlined_call_operand.hbm [shape: f32[2,8,16], index: 12, kind: output, shape index: {}]  }
   0x1   :  { %v17_v0 = vstv %s15183_s11 }
   0x2   :  { %18 = vst [vmem:[#allocation3] sm:$0x1] %v17_v0 }
   0x3   :  { %19 = vsyncpa [#allocation5], 0 }
   0x4   :  { %20 = vsyncpa [#allocation6], 0 }
   0x5   :  { %22 = vsyncpa [#allocation6 + $0x1], 0  ;;  %s13119_s23 = smov 0   ;;  %s13121_s24 = smov 0  }
   0x6   :  { %s13123_s25 = smov 0   ;;  %s13125_s26 = smov 0  }
   0x7 LB: > { %s13140_s11 = sadd.s32 4294967295, %s13039_s26   ;;  %s11148_s27 = sadd.s32 4294967294, %s13039_s26   ;;  %s13039_s26 = sphi %s13125_s26, %s15250_s26   ;;  %s13035_s25 = sphi %s13123_s25, %s15249_s25   ;;  %s13031_s24 = sphi %s13121_s24, %s15248_s24   ;;  %s13027_s23 = sphi %s13119_s23, %s15247_s23  }
   0x8   : > { %s13144_s28 = sadd.s32 1, %s13039_s26   ;;  %s292_s29 = sadd.s32 1, %s13035_s25 }
   0x9   : > { %s289_s30 = ssub.s32 %s13039_s26, %s13144_s28  ;;  %p302_p0 = scmp.ne.s32.totalorder %s13035_s25, %s13031_s24 }
   0xa   : > { %p290_p1 = scmp.eq.s32.totalorder %s289_s30, 0  ;;  %p303_p2 = scmp.eq.s32.totalorder %s13140_s11, 1 }
   0xb   : > { %p308_p3 = scmp.ne.s32.totalorder %s13031_s24, %s13027_s23  ;;  %p309_p4 = scmp.eq.s32.totalorder %s11148_s27, 1 }
   0xc   : > { %s13155_s13 = scalar_select %p290_p1, %s13035_s25, %s292_s29  }
   0xd   : > { %p13157_p5 = por %p303_p2, %p302_p0  ;;  %p13161_p6 = por %p309_p4, %p308_p3 }
   0xe   : > { %15207 = sst [smem:[#allocation10_spill]] %s13155_s13  ;;  %p11149_p7 = scmp.ge.s32.totalorder %s13039_s26, 1 }
   0xf   : > { %s15208_s14 = scalar_select %p13157_p5, 1, 0 }
  0x10   : > { %s15209_s15 = scalar_select %p13161_p6, 1, 0 }
  0x11   : > { %p316_p8 = scmp.lt.s32.totalorder %s13039_s26, 3  ;;  %p15185_p9 = scmp.eq.s32.totalorder %s13140_s11, 0 }
  0x12   : > { %s13041_s17 = smov [#allocation4]   ;;  %s12945_s22 = scalar_lea.hbm %s15177_s5, 16384 }
  0x13   : > { %p13168_p10 = pnand %p11149_p7, %p316_p8  ;;  %s340_s18 = sshll.u32 %s13041_s17, 4  ;;  %s341_s18 = int_to_ptr.vmem [resolvable:$true] %s340_s18 }
  0x14   : > { %p12946_p13 = scmp.ne.s32.totalorder %s15177_s5, %s12945_s22  ;;  %p12952_p3 = scmp.lt.u32.totalorder %s12945_s22, %s15177_s5 }
  0x15   : > { %s15210_s16 = scalar_select %p13168_p10, 1, 0 }
  0x16   : > { %p12866_p11 = pneg %p13168_p10 }
  0x18   : > { %p13176_p12 = pnand %p15185_p9, %p12866_p11 }
  0x1a   : > { %p12947_p0 = pneg %p13176_p12 }
  0x1c   : > { %p12948_p1 = pnand %p12947_p0, %p12946_p13 }
  0x1e   : > { %p12949_p2 = pneg %p12948_p1 }
  0x20   : > { %p12954_p4 = pnand %p12952_p3, %p12949_p2 }
  0x22   : > { %12957 = shalt.err (!%p12954_p4)
}
  0x23   : > { %s12958_s13 = scalar_lea.vmem %s341_s18, 16384  ;;  %p12966_p9 = scmp.lt.s32.totalorder %s341_s18, %s341_s18 }
  0x24   : > { %p12959_p7 = scmp.ne.s32.totalorder %s341_s18, %s12958_s13  ;;  %p12967_p6 = scmp.lt.s32.totalorder %s12958_s13, %s12958_s13 }
  0x26   : > { %p12961_p8 = pnand %p12959_p7, %p12947_p0  ;;  %p12968_p5 = por %p12967_p6, %p12966_p9 }
  0x28   : > { %p12962_p11 = pneg %p12961_p8 }
  0x2a   : > { %p12969_p10 = pnand %p12968_p5, %p12962_p11 }
  0x2c   : > { %12972 = shalt.err (!%p12969_p10)
}
  0x2d   : > { %s13042_s20 = smov 128   ;;  %s13043_s21 = smov 8  }
  0x2e   : > { %12869 = dma.hbm_to_vmem [thread:$0]  (!%p13176_p12), %s15177_s5, 16384, %s341_s18, [#allocation5], %s13042_s20, %s13042_s20, %s13043_s21  }
  0x2f   : > { %p15212_p13 = scmp.ne.s32.totalorder %s15210_s16, 0 }
  0x30   : > { %p15213_p1 = scmp.eq.s32.totalorder (!%p15212_p13), %s13140_s11, 0 }
  0x31   : > { %382 = sbr.rel (%p15212_p13) target bundleno = 3536 (0xdd0), region = 68 }
  0x38   : > { %13018 = dma.done.wait (%p15213_p1), [#allocation5], 16384   ;;  %p15214_p0 = pmov %p15213_p1 }
  0x39   : > { %p424_p5 = scmp.lt.s32.totalorder %s13140_s11, 1  ;;  %v13044_v1 = vmov 1   ;;  %v13045_v2 = vmov 0   ;;  %v13046_v8 = vmov 0.0|0.0   ;;  %vm13047_vm0 = vmmov 0   ;;  %v13275_v45 = vld [vmem:[%s15175_s3] sm:$0xff] }
  0x3a   : > { %13020 = vsyncadd (%p15214_p0), [#allocation5], 4294950912  ;;  %12919 = vset.pattern.permute.xlu1 %v13044_v1  ;;  %12918 = vset.pattern.permute.xlu0 %v13045_v2  ;;  %v15205_v16 = vmov 0.0   ;;  %v15188_v21 = vlaneseq  ;;  %v448_v25 = vld [vmem:[%s15173_s1] sm:$0x3]  ;;  %vm704_vm1 = vcmask 130048  }
  0x3b   : > { %s425_s13 = scalar_select %p424_p5, %s13140_s11, 1  ;;  %12524 = vmatprep.subr.bf16.mxu0 %v13046_v8  ;;  %12527 = vmatprep.subr.bf16.mxu1 %v13046_v8  ;;  %v13268_v37 = vld [vmem:[%s15174_s2] ss:$0 sm:$0xff]  ;;  %vm1277_vm2 = vcmask 1041409   ;;  %vm1280_vm3 = vcmask 1042434   ;;  %vm1283_vm4 = vcmask 1043459  }
  0x3c   : > { %11728 = vmatprep.mubr.msk.f32.mxu0 %vm13047_vm0, %v15205_v16  ;;  %11735 = vmatprep.mubr.msk.f32.mxu1 %vm13047_vm0, %v15205_v16  ;;  %v13250_v22 = vshrl.u32 %v15188_v21, 7  ;;  %vm1286_vm5 = vcmask 1044484   ;;  %vm1289_vm6 = vcmask 1045509   ;;  %vm1292_vm7 = vcmask 1046534   ;;  %s11328_s19 = sshll.u32 %s13140_s11, 7  ;;  %p15244_p9 = scmp.ne.s32.totalorder %s15208_s14, 0 }
  0x3d   : > { %s11331_s18 = sshll.u32 %s425_s13, 7  ;;  %vm1295_vm8 = vcmask 1047559   ;;  %vm1297_vm9 = vcmask 261120   ;;  %vm2509_vm10 = vcmask 64512   ;;  %vm1428_vm11 = vcmask 253952   ;;  %s421_s13 = sand.u32 1, %s13031_s24  }
  0x3e   : > { %s13209_s22 = scalar_lea.vmem %s15172_s0, %s11331_s18  ;;  %v615_v23 = vsub.s32 1, %v13250_v22  ;;  %v531_v24 = vsub.s32 0, %v13250_v22  ;;  %vm10989_vm12 = vcmask 130112   ;;  %s15105_s18 = sshll.u32 %s421_s13, 3 }
  0x3f   : > { %v429_v3 = vld [vmem:[%s13209_s22] sm:$0xff]  ;;  %v430_v4 = vld [vmem:[%s13209_s22 + $0x8] sm:$0xff]  ;;  %v431_v5 = vld [vmem:[%s13209_s22 + $0x10] sm:$0xff]  ;;  %s423_s16 = scalar_lea.vmem [#allocation7], %s15105_s18  ;;  %s15126_s20 = scalar_lea.hbm %s15184_s12, %s11328_s19 }
  0x40   : > { %550 = vperm.xlu1 %12919, %v429_v3   ;;  %451 = vperm.xlu0 %12918, %v429_v3   ;;  %v432_v6 = vld [vmem:[%s13209_s22 + $0x18] sm:$0xff]  ;;  %v434_v7 = vld [vmem:[%s13209_s22 + $0x28] sm:$0xff]  ;;  %v435_v9 = vld [vmem:[%s13209_s22 + $0x30] sm:$0xff]  ;;  %v13257_v26 = vrot.slane %v448_v25, %v615_v23  ;;  %v13259_v27 = vrot.slane %v448_v25, %v531_v24  ;;  %s11064_s11 = scalar_lea.sflag [#allocation6], %s421_s13  ;;  %s13050_s27 = smov [#allocation7]  }
  0x41   : > { %v433_v10 = vld [vmem:[%s13209_s22 + $0x20] sm:$0xff]  ;;  %v438_v11 = vld [vmem:[%s13209_s22 + $0x48] sm:$0xff]  ;;  %v439_v12 = vld [vmem:[%s13209_s22 + $0x50] sm:$0xff]  ;;  %s12977_s29 = sshll.u32 %s13050_s27, 4  ;;  %s12978_s29 = int_to_ptr.vmem [resolvable:$false] %s12977_s29 }
  0x42   : > { %v442_v13 = vld [vmem:[%s13209_s22 + $0x68] sm:$0xff]  ;;  %v443_v14 = vld [vmem:[%s13209_s22 + $0x70] sm:$0xff]  ;;  %v436_v15 = vld [vmem:[%s13209_s22 + $0x38] sm:$0xff]  ;;  %s12979_s18 = scalar_lea.vmem %s12978_s29, 256 }
  0x43   : > { %v437_v17 = vld [vmem:[%s13209_s22 + $0x40] sm:$0xff]  ;;  %v440_v18 = vld [vmem:[%s13209_s22 + $0x58] sm:$0xff] }
  0x44   : > { %554 = vperm.xlu1 %12919, %v430_v4   ;;  %456 = vperm.xlu0 %12918, %v430_v4   ;;  %v441_v19 = vld [vmem:[%s13209_s22 + $0x60] sm:$0xff]  ;;  %v444_v20 = vld [vmem:[%s13209_s22 + $0x78] sm:$0xff]  ;;  %s11077_s22 = sshll.u32 %s423_s16, 4  ;;  %s15128_s22 = int_to_ptr.vmem [resolvable:$true] %s11077_s22 }
  0x45   : > { %s12973_s21 = scalar_lea.vmem %s15128_s22, 128  ;;  %p12980_p2 = scmp.lt.s32.totalorder %s15128_s22, %s12978_s29 }
  0x46   : > { %p12974_p6 = scmp.ne.s32.totalorder %s15128_s22, %s12973_s21  ;;  %p12981_p3 = scmp.lt.s32.totalorder %s12979_s18, %s12973_s21 }
  0x48   : > { %12920 = vset.pattern.permute.xlu1 %v13045_v2  ;;  %461 = vperm.xlu0 %12918, %v431_v5   ;;  %p12975_p10 = pnand %p12974_p6, %p15244_p9  ;;  %p12982_p4 = por %p12981_p3, %p12980_p2 }
  0x49   : > { %466 = vperm.xlu1 %12920, %v432_v6  }
  0x4a   : > { %p12976_p12 = pneg %p12975_p10 }
  0x4c   : > { %476 = vperm.xlu0 %12918, %v434_v7   ;;  %p12983_p7 = pnand %p12982_p4, %p12976_p12 }
  0x4d   : > { %12921 = vset.pattern.permute.xlu1 %v13044_v1 }
  0x4e   : > { %562 = vperm.xlu1 %12921, %v432_v6  }
  0x50   : > { %481 = vperm.xlu0 %12918, %v435_v9  }
  0x52   : > { %12922 = vset.pattern.permute.xlu1 %v13045_v2 }
  0x53   : > { %471 = vperm.xlu1 %12922, %v433_v10  }
  0x54   : > { %496 = vperm.xlu0 %12918, %v438_v11  }
  0x57   : > { %12923 = vset.pattern.permute.xlu1 %v13044_v1 }
  0x58   : > { %566 = vperm.xlu1 %12923, %v433_v10   ;;  %501 = vperm.xlu0 %12918, %v439_v12  }
  0x5c   : > { %570 = vperm.xlu1 %12923, %v434_v7   ;;  %516 = vperm.xlu0 %12918, %v442_v13  }
  0x60   : > { %12924 = vset.pattern.permute.xlu1 %v13045_v2  ;;  %521 = vperm.xlu0 %12918, %v443_v14  }
  0x61   : > { %486 = vperm.xlu1 %12924, %v436_v15  }
  0x64   : > { %12932 = vset.pattern.permute.xlu0 %v13044_v1 }
  0x65   : > { %12925 = vset.pattern.permute.xlu1 %v13044_v1  ;;  %558 = vperm.xlu0 %12932, %v431_v5  }
  0x66   : > { %578 = vperm.xlu1 %12925, %v436_v15  }
  0x69   : > { %574 = vperm.xlu0 %12932, %v435_v9  }
  0x6a   : > { %12926 = vset.pattern.permute.xlu1 %v13045_v2 }
  0x6b   : > { %491 = vperm.xlu1 %12926, %v437_v17  }
  0x6d   : > { %590 = vperm.xlu0 %12932, %v439_v12  }
  0x6f   : > { %12927 = vset.pattern.permute.xlu1 %v13044_v1 }
  0x70   : > { %582 = vperm.xlu1 %12927, %v437_v17  }
  0x71   : > { %606 = vperm.xlu0 %12932, %v443_v14  }
  0x74   : > { %586 = vperm.xlu1 %12927, %v438_v11  }
  0x75   : > { %12935 = vset.pattern.permute.xlu0 %v13045_v2 }
  0x78   : > { %12928 = vset.pattern.permute.xlu1 %v13045_v2 }
  0x79   : > { %506 = vperm.xlu1 %12928, %v440_v18  }
  0x7d   : > { %12929 = vset.pattern.permute.xlu1 %v13044_v1 }
  0x7e   : > { %594 = vperm.xlu1 %12929, %v440_v18  }
  0x82   : > { %12930 = vset.pattern.permute.xlu1 %v13045_v2 }
  0x83   : > { %511 = vperm.xlu1 %12930, %v441_v19  }
  0x87   : > { %12931 = vset.pattern.permute.xlu1 %v13044_v1 }
  0x88   : > { %598 = vperm.xlu1 %12931, %v441_v19  }
  0x8c   : > { %602 = vperm.xlu1 %12931, %v442_v13  }
  0x90   : > { %12933 = vset.pattern.permute.xlu1 %v13045_v2 }
  0x91   : > { %526 = vperm.xlu1 %12933, %v444_v20  }
  0x95   : > { %12934 = vset.pattern.permute.xlu1 %v13044_v1 }
  0x96   : > { %610 = vperm.xlu1 %12934, %v444_v20  }
  0xbf   : > { %v551_v28 = vpop.permute.xlu1 %550  ;;  %v452_v29 = vpop.permute.xlu0 %451 }
  0xc0   : > { %v617_v30 = vmul.f32 %v13257_v26, %v551_v28  ;;  %v533_v31 = vmul.f32 %v13259_v27, %v452_v29 }
  0xc2   : > { %v633_v34 = vadd.f32 %v617_v30, %v533_v31 }
  0xc3   : > { %v555_v32 = vpop.permute.xlu1 %554  ;;  %v457_v33 = vpop.permute.xlu0 %456 }
  0xc4   : > { %v618_v35 = vmul.f32 %v13257_v26, %v555_v32  ;;  %v534_v36 = vmul.f32 %v13259_v27, %v457_v33  ;;  %v656_v41 = vadd.f32 %v13268_v37, %v633_v34 }
  0xc6   : > { %v634_v38 = vadd.f32 %v618_v35, %v534_v36 }
  0xc7   : > { %v462_v39 = vpop.permute.xlu0 %461 }
  0xc8   : > { %v467_v40 = vpop.permute.xlu1 %466  ;;  %v657_v42 = vadd.f32 %v13268_v37, %v634_v38  ;;  %v535_v3 = vmul.f32 %v13259_v27, %v462_v39 }
  0xc9   : > { %v536_v2 = vmul.f32 %v13259_v27, %v467_v40 }
  0xca   : > { %v12525_v43 = vpack.c.bf16 %v657_v42, %v656_v41 }
  0xcb   : > { %v477_v44 = vpop.permute.xlu0 %476 }
  0xcc   : > { %12526 = vmatpush3.bf16.msra.mxu0 %v12525_v43  ;;  %v538_v53 = vmul.f32 %v13259_v27, %v477_v44 }
  0xcd   : > { %v563_v46 = vpop.permute.xlu1 %562  ;;  %12530 = vmatprep.subr.bf16.mxu0 %v13046_v8 }
  0xce   : > { %v620_v0 = vmul.f32 %v13257_v26, %v563_v46 }
  0xcf   : > { %v482_v47 = vpop.permute.xlu0 %481  ;;  %11729 = vmatmul.mubr.msk.f32.vlgmr.msra.gmra.mrb[0].mxu0 %vm704_vm1, %v13275_v45 }
  0xd0   : > { %11742 = vmatprep.mubr.msk.f32.mxu0 %vm13047_vm0, %v15205_v16  ;;  %v636_v5 = vadd.f32 %v620_v0, %v536_v2  ;;  %v539_v12 = vmul.f32 %v13259_v27, %v482_v47 }
  0xd2   : > { %v472_v48 = vpop.permute.xlu1 %471  ;;  %v659_v18 = vadd.f32 %v13268_v37, %v636_v5 }
  0xd3   : > { %v497_v49 = vpop.permute.xlu0 %496  ;;  %v537_v54 = vmul.f32 %v13259_v27, %v472_v48 }
  0xd4   : > { %v542_v33 = vmul.f32 %v13259_v27, %v497_v49 }
  0xd7   : > { %v567_v50 = vpop.permute.xlu1 %566  ;;  %v502_v51 = vpop.permute.xlu0 %501 }
  0xd8   : > { %v621_v52 = vmul.f32 %v13257_v26, %v567_v50  ;;  %v543_v44 = vmul.f32 %v13259_v27, %v502_v51 }
  0xda   : > { %v637_v57 = vadd.f32 %v621_v52, %v537_v54 }
  0xdb   : > { %v571_v55 = vpop.permute.xlu1 %570  ;;  %v13285_v56 = vpop.permute.xlu0 %516 }
  0xdc   : > { %v622_v58 = vmul.f32 %v13257_v26, %v571_v55  ;;  %v660_v61 = vadd.f32 %v13268_v37, %v637_v57 }
  0xde   : > { %v638_v59 = vadd.f32 %v622_v58, %v538_v53 }
  0xdf   : > { %v13288_v60 = vpop.permute.xlu0 %521 }
  0xe0   : > { %v661_v62 = vadd.f32 %v13268_v37, %v638_v59  ;;  %v487_v63 = vpop.permute.xlu1 %486 }
  0xe1   : > { %v540_v10 = vmul.f32 %v13259_v27, %v487_v63 }
  0xe2   : > { %v12531_v1 = vpack.c.bf16 %v661_v62, %v660_v61  ;;  %v546_v61 = vmul.f32 %v13259_v27, %v13285_v56 }
  0xe4   : > { %12532 = vmatpush3.bf16.msra.mxu0 %v12531_v1  ;;  %v559_v4 = vpop.permute.xlu0 %558 }
  0xe5   : > { %v619_v6 = vmul.f32 %v13257_v26, %v559_v4  ;;  %v579_v7 = vpop.permute.xlu1 %578  ;;  %12536 = vmatprep.subr.bf16.mxu0 %v13046_v8 }
  0xe6   : > { %v624_v9 = vmul.f32 %v13257_v26, %v579_v7  ;;  %v547_v7 = vmul.f32 %v13259_v27, %v13288_v60 }
  0xe7   : > { %v635_v11 = vadd.f32 %v619_v6, %v535_v3  ;;  %11743 = vmatmul.mubr.msk.f32.vlgmr.msra.gmra.mrb[2].mxu0 %vm704_vm1, %v13275_v45 }
  0xe8   : > { %v575_v13 = vpop.permute.xlu0 %574  ;;  %11756 = vmatprep.mubr.msk.f32.mxu0 %vm13047_vm0, %v15205_v16  ;;  %v640_v14 = vadd.f32 %v624_v9, %v540_v10 }
  0xe9   : > { %v623_v15 = vmul.f32 %v13257_v26, %v575_v13  ;;  %v658_v17 = vadd.f32 %v13268_v37, %v635_v11 }
  0xea   : > { %v492_v19 = vpop.permute.xlu1 %491  ;;  %v663_v24 = vadd.f32 %v13268_v37, %v640_v14 }
  0xeb   : > { %v639_v20 = vadd.f32 %v623_v15, %v539_v12  ;;  %v12528_v23 = vpack.c.bf16 %v659_v18, %v658_v17  ;;  %v541_v31 = vmul.f32 %v13259_v27, %v492_v19  ;;  %v676_v15 = vld [vmem:[#allocation4 + $0x20] sm:$0xff]  ;;  %v677_v18 = vld [vmem:[#allocation4 + $0x28] sm:$0xff] }
  0xec   : > { %v591_v38 = vpop.permute.xlu0 %590  ;;  %v12555_v19 = vpack.c.bf16 %v677_v18, %v676_v15 }
  0xed   : > { %v662_v25 = vadd.f32 %v13268_v37, %v639_v20  ;;  %12529 = vmatpush3.bf16.msra.mxu1 %v12528_v23  ;;  %v627_v42 = vmul.f32 %v13257_v26, %v591_v38  ;;  %v675_v20 = vld [vmem:[#allocation4 + $0x18] sm:$0xff]  ;;  %v678_v23 = vld [vmem:[#allocation4 + $0x30] sm:$0xff] }
  0xee   : > { %12533 = vmatprep.subr.bf16.mxu1 %v13046_v8 }
  0xef   : > { %v12534_v28 = vpack.c.bf16 %v663_v24, %v662_v25  ;;  %v583_v29 = vpop.permute.xlu1 %582  ;;  %v643_v47 = vadd.f32 %v627_v42, %v543_v44 }
  0xf0   : > { %v625_v30 = vmul.f32 %v13257_v26, %v583_v29  ;;  %11736 = vmatmul.mubr.msk.f32.vlgmr.msra.gmra.mrb[0].mxu1 %vm704_vm1, %v13275_v45  ;;  %v607_v1 = vpop.permute.xlu0 %606 }
  0xf1   : > { %12535 = vmatpush3.bf16.msra.mxu1 %v12534_v28  ;;  %11749 = vmatprep.mubr.msk.f32.mxu1 %vm13047_vm0, %v15205_v16  ;;  %v666_v52 = vadd.f32 %v13268_v37, %v643_v47  ;;  %v631_v5 = vmul.f32 %v13257_v26, %v607_v1 }
  0xf2   : > { %12539 = vmatprep.subr.bf16.mxu1 %v13046_v8  ;;  %v641_v34 = vadd.f32 %v625_v30, %v541_v31 }
  0xf3   : > { %v587_v32 = vpop.permute.xlu1 %586  ;;  %v647_v56 = vadd.f32 %v631_v5, %v547_v7 }
  0xf4   : > { %v626_v35 = vmul.f32 %v13257_v26, %v587_v32  ;;  %11750 = vmatmul.mubr.msk.f32.vlgmr.msra.gmra.mrb[2].mxu1 %vm704_vm1, %v13275_v45  ;;  %v664_v39 = vadd.f32 %v13268_v37, %v641_v34 }
  0xf5   : > { %11763 = vmatprep.mubr.msk.f32.mxu1 %vm13047_vm0, %v15205_v16  ;;  %v670_v13 = vadd.f32 %v13268_v37, %v647_v56 }
  0xf6   : > { %v642_v36 = vadd.f32 %v626_v35, %v542_v33 }
  0xf8   : > { %v665_v40 = vadd.f32 %v13268_v37, %v642_v36  ;;  %v507_v41 = vpop.permute.xlu1 %506 }
  0xf9   : > { %v544_v48 = vmul.f32 %v13259_v27, %v507_v41 }
  0xfa   : > { %v12537_v43 = vpack.c.bf16 %v665_v40, %v664_v39 }
  0xfc   : > { %12538 = vmatpush3.bf16.msra.mxu0 %v12537_v43 }
  0xfd   : > { %v595_v46 = vpop.permute.xlu1 %594  ;;  %12542 = vmatprep.subr.bf16.mxu0 %v13046_v8 }
  0xfe   : > { %v628_v49 = vmul.f32 %v13257_v26, %v595_v46 }
  0xff   : > { %11757 = vmatmul.mubr.msk.f32.vlgmr.msra.gmra.mrb[4].mxu0 %vm704_vm1, %v13275_v45 }
 0x100   : > { %v644_v50 = vadd.f32 %v628_v49, %v544_v48  ;;  %11770 = vmatprep.mubr.msk.f32.mxu0 %vm13047_vm0, %v15205_v16 }
 0x102   : > { %v667_v51 = vadd.f32 %v13268_v37, %v644_v50  ;;  %v512_v53 = vpop.permute.xlu1 %511 }
 0x103   : > { %v545_v58 = vmul.f32 %v13259_v27, %v512_v53 }
 0x104   : > { %v12540_v54 = vpack.c.bf16 %v667_v51, %v666_v52 }
 0x106   : > { %12541 = vmatpush3.bf16.msra.mxu1 %v12540_v54 }
 0x107   : > { %v599_v55 = vpop.permute.xlu1 %598  ;;  %12545 = vmatprep.subr.bf16.mxu1 %v13046_v8 }
 0x108   : > { %v629_v57 = vmul.f32 %v13257_v26, %v599_v55 }
 0x109   : > { %11764 = vmatmul.mubr.msk.f32.vlgmr.msra.gmra.mrb[4].mxu1 %vm704_vm1, %v13275_v45 }
 0x10a   : > { %11777 = vmatprep.mubr.msk.f32.mxu1 %vm13047_vm0, %v15205_v16  ;;  %v645_v62 = vadd.f32 %v629_v57, %v545_v58 }
 0x10b   : > { %v603_v59 = vpop.permute.xlu1 %602 }
 0x10c   : > { %v630_v63 = vmul.f32 %v13257_v26, %v603_v59  ;;  %v668_v2 = vadd.f32 %v13268_v37, %v645_v62 }
 0x10e   : > { %v646_v0 = vadd.f32 %v630_v63, %v546_v61 }
 0x110   : > { %v669_v3 = vadd.f32 %v13268_v37, %v646_v0  ;;  %v527_v4 = vpop.permute.xlu1 %526 }
 0x111   : > { %v548_v10 = vmul.f32 %v13259_v27, %v527_v4  ;;  %v673_v27 = vld [vmem:[#allocation4 + $0x8] sm:$0xff] }
 0x112   : > { %v12543_v6 = vpack.c.bf16 %v669_v3, %v668_v2 }
 0x114   : > { %12544 = vmatpush3.bf16.msra.mxu0 %v12543_v6 }
 0x115   : > { %v611_v9 = vpop.permute.xlu1 %610  ;;  %12548 = vmatprep.subr.bf16.mxu0 %v13046_v8 }
 0x116   : > { %v632_v11 = vmul.f32 %v13257_v26, %v611_v9  ;;  %v672_v26 = vld [vmem:[#allocation4] sm:$0xff] }
 0x117   : > { %11771 = vmatmul.mubr.msk.f32.vlgmr.msra.gmra.mrb[6].mxu0 %vm704_vm1, %v13275_v45  ;;  %v12549_v17 = vpack.c.bf16 %v673_v27, %v672_v26 }
 0x118   : > { %v648_v12 = vadd.f32 %v632_v11, %v548_v10  ;;  %11788 = vmatprep.mubr.msk.f32.mxu0 %vm13047_vm0, %v15205_v16 }
 0x119   : > { %12550 = vmatpush3.bf16.msra.mxu0 %v12549_v17 }
 0x11a   : > { %v671_v60 = vadd.f32 %v13268_v37, %v648_v12  ;;  %12551 = vmatprep.subr.bf16.mxu0 %v13046_v8  ;;  %v674_v37 = vld [vmem:[#allocation4 + $0x10] sm:$0xff] }
 0x11b   : > { %v12552_v24 = vpack.c.bf16 %v675_v20, %v674_v37 }
 0x11c   : > { %v12546_v14 = vpack.c.bf16 %v671_v60, %v670_v13 }
 0x11d   : > { %12553 = vmatpush3.bf16.msra.mxu0 %v12552_v24 }
 0x11e   : > { %12547 = vmatpush3.bf16.msra.mxu1 %v12546_v14  ;;  %12560 = vmatprep.subr.bf16.mxu0 %v13046_v8 }
 0x11f   : > { %12554 = vmatprep.subr.bf16.mxu1 %v13046_v8 }
 0x121   : > { %11778 = vmatmul.mubr.msk.f32.vlgmr.msra.gmra.mrb[6].mxu1 %vm704_vm1, %v13275_v45  ;;  %v679_v45 = vld [vmem:[#allocation4 + $0x38] sm:$0xff] }
 0x122   : > { %11799 = vmatprep.mubr.msk.f32.mxu1 %vm13047_vm0, %v15205_v16  ;;  %12556 = vmatpush3.bf16.msra.mxu1 %v12555_v19  ;;  %v12558_v25 = vpack.c.bf16 %v679_v45, %v678_v23 }
 0x123   : > { %12557 = vmatprep.subr.bf16.mxu1 %v13046_v8 }
 0x126   : > { %12559 = vmatpush3.bf16.msra.mxu1 %v12558_v25 }
 0x127   : > { %12566 = vmatprep.subr.bf16.mxu1 %v13046_v8 }
 0x1a2   : > { %v774_v28 = vpop.f32.mrb[0].mxu0 }
 0x1a3   : > { %v11730_v29 = vpop.f32.mrb[1].mxu0  ;;  %v1437_v32 = vrot.slane %v774_v28, 1  ;;  %v1589_v33 = vrot.slane %v774_v28, 2  ;;  %v1741_v34 = vrot.slane %v774_v28, 3  ;;  %v1893_v35 = vrot.slane %v774_v28, 4 }
 0x1a4   : > { %v2045_v36 = vrot.slane %v774_v28, 5  ;;  %v2197_v38 = vrot.slane %v774_v28, 6  ;;  %v2349_v39 = vrot.slane %v774_v28, 7 }
 0x1ba   : > { %v914_v30 = vpop.f32.mrb[2].mxu0 }
 0x1bb   : > { %v11744_v31 = vpop.f32.mrb[3].mxu0  ;;  %v1279_v40 = vrot.slane %v914_v30, 6  ;;  %v1439_v41 = vrot.slane %v914_v30, 7  ;;  %v1744_v42 = vrot.slane %v914_v30, 1  ;;  %v1896_v44 = vrot.slane %v914_v30, 2 }
 0x1bc   : > { %v2048_v46 = vrot.slane %v914_v30, 3  ;;  %v2200_v47 = vrot.slane %v914_v30, 4  ;;  %v2352_v48 = vrot.slane %v914_v30, 5 }
 0x1c3   : > { %v844_v43 = vpop.f32.mrb[0].mxu1 }
 0x1c4   : > { %v1276_v49 = vrot.slane %v844_v43, 7  ;;  %v1590_v50 = vrot.slane %v844_v43, 1  ;;  %v1742_v52 = vrot.slane %v844_v43, 2  ;;  %v1894_v51 = vrot.slane %v844_v43, 3  ;;  %v11737_v53 = vpop.f32.mrb[1].mxu1 }
 0x1c5   : > { %v2046_v54 = vrot.slane %v844_v43, 4  ;;  %v2198_v55 = vrot.slane %v844_v43, 5  ;;  %v2350_v57 = vrot.slane %v844_v43, 6  ;;  %v1438_v58 = vsel %vm1277_vm2, %v844_v43, %v1437_v32 }
 0x1c6   : > { %v1278_v59 = vsel %vm1277_vm2, %v1276_v49, %v774_v28  ;;  %v1440_v61 = vsel %vm1280_vm3, %v1439_v41, %v1438_v58  ;;  %v1591_v62 = vsel %vm1277_vm2, %v1590_v50, %v1589_v33  ;;  %v1743_v63 = vsel %vm1277_vm2, %v1742_v52, %v1741_v34 }
 0x1c7   : > { %v984_v0 = vpop.f32.mrb[2].mxu1  ;;  %v1281_v1 = vsel %vm1280_vm3, %v1279_v40, %v1278_v59  ;;  %v1592_v2 = vsel %vm1280_vm3, %v914_v30, %v1591_v62  ;;  %v1745_v3 = vsel %vm1280_vm3, %v1744_v42, %v1743_v63  ;;  %v1895_v4 = vsel %vm1277_vm2, %v1894_v51, %v1893_v35 }
 0x1c8   : > { %v11751_v5 = vpop.f32.mrb[3].mxu1  ;;  %v1282_v6 = vrot.slane %v984_v0, 5  ;;  %v1441_v7 = vrot.slane %v984_v0, 6  ;;  %v1593_v9 = vrot.slane %v984_v0, 7  ;;  %v1746_v56 = vsel %vm1283_vm4, %v984_v0, %v1745_v3 }
 0x1c9   : > { %v1897_v10 = vsel %vm1280_vm3, %v1896_v44, %v1895_v4  ;;  %v1898_v11 = vrot.slane %v984_v0, 1  ;;  %v2047_v12 = vsel %vm1277_vm2, %v2046_v54, %v2045_v36  ;;  %v2050_v13 = vrot.slane %v984_v0, 2 }
 0x1ca   : > { %v1284_v60 = vsel %vm1283_vm4, %v1282_v6, %v1281_v1  ;;  %v1442_v14 = vsel %vm1283_vm4, %v1441_v7, %v1440_v61  ;;  %v1594_v26 = vsel %vm1283_vm4, %v1593_v9, %v1592_v2  ;;  %v2049_v27 = vsel %vm1280_vm3, %v2048_v46, %v2047_v12 }
 0x1cb   : > { %v1899_v15 = vsel %vm1283_vm4, %v1898_v11, %v1897_v10  ;;  %v2051_v17 = vsel %vm1283_vm4, %v2050_v13, %v2049_v27  ;;  %v2199_v18 = vsel %vm1277_vm2, %v2198_v55, %v2197_v38  ;;  %v2202_v19 = vrot.slane %v984_v0, 3 }
 0x1cc   : > { %v2201_v37 = vsel %vm1280_vm3, %v2200_v47, %v2199_v18  ;;  %v2351_v20 = vsel %vm1277_vm2, %v2350_v57, %v2349_v39  ;;  %v2354_v23 = vrot.slane %v984_v0, 4  ;;  %v681_v18 = vld [vmem:[#allocation4 + $0x48] sm:$0xff] }
 0x1cd   : > { %v2203_v24 = vsel %vm1283_vm4, %v2202_v19, %v2201_v37  ;;  %v2353_v45 = vsel %vm1280_vm3, %v2352_v48, %v2351_v20  ;;  %v684_v19 = vld [vmem:[#allocation4 + $0x60] sm:$0xff]  ;;  %v685_v37 = vld [vmem:[#allocation4 + $0x68] sm:$0xff] }
 0x1ce   : > { %v2355_v25 = vsel %vm1283_vm4, %v2354_v23, %v2353_v45 }
 0x1d2   : > { %v1054_v28 = vpop.f32.mrb[4].mxu0 }
 0x1d3   : > { %v11758_v29 = vpop.f32.mrb[5].mxu0  ;;  %v1285_v30 = vrot.slane %v1054_v28, 4  ;;  %v1443_v31 = vrot.slane %v1054_v28, 5  ;;  %v1595_v32 = vrot.slane %v1054_v28, 6  ;;  %v1747_v33 = vrot.slane %v1054_v28, 7 }
 0x1d4   : > { %v1900_v34 = vsel %vm1286_vm5, %v1054_v28, %v1899_v15  ;;  %v2052_v35 = vrot.slane %v1054_v28, 1  ;;  %v2204_v36 = vrot.slane %v1054_v28, 2  ;;  %v2356_v38 = vrot.slane %v1054_v28, 3  ;;  %v682_v29 = vld [vmem:[#allocation4 + $0x50] sm:$0xff] }
 0x1d5   : > { %v1287_v39 = vsel %vm1286_vm5, %v1285_v30, %v1284_v60  ;;  %v1444_v40 = vsel %vm1286_vm5, %v1443_v31, %v1442_v14  ;;  %v1596_v41 = vsel %vm1286_vm5, %v1595_v32, %v1594_v26  ;;  %v1748_v42 = vsel %vm1286_vm5, %v1747_v33, %v1746_v56  ;;  %v683_v32 = vld [vmem:[#allocation4 + $0x58] sm:$0xff]  ;;  %v686_v33 = vld [vmem:[#allocation4 + $0x70] sm:$0xff] }
 0x1d6   : > { %v2053_v43 = vsel %vm1286_vm5, %v2052_v35, %v2051_v17  ;;  %v2205_v44 = vsel %vm1286_vm5, %v2204_v36, %v2203_v24  ;;  %v2357_v46 = vsel %vm1286_vm5, %v2356_v38, %v2355_v25  ;;  %v680_v17 = vld [vmem:[#allocation4 + $0x40] sm:$0xff]  ;;  %v12567_v24 = vpack.c.bf16 %v685_v37, %v684_v19 }
 0x1d7   : > { %v12561_v23 = vpack.c.bf16 %v681_v18, %v680_v17 }
 0x1dc   : > { %v1124_v47 = vpop.f32.mrb[4].mxu1 }
 0x1dd   : > { %v11765_v48 = vpop.f32.mrb[5].mxu1  ;;  %v1288_v49 = vrot.slane %v1124_v47, 3  ;;  %v1445_v50 = vrot.slane %v1124_v47, 4  ;;  %v1597_v52 = vrot.slane %v1124_v47, 5  ;;  %v1749_v51 = vrot.slane %v1124_v47, 6 }
 0x1de   : > { %v1901_v53 = vrot.slane %v1124_v47, 7  ;;  %v2054_v54 = vsel %vm1289_vm6, %v1124_v47, %v2053_v43  ;;  %v2206_v55 = vrot.slane %v1124_v47, 1  ;;  %v2358_v57 = vrot.slane %v1124_v47, 2 }
 0x1df   : > { %v1290_v58 = vsel %vm1289_vm6, %v1288_v49, %v1287_v39  ;;  %v1446_v59 = vsel %vm1289_vm6, %v1445_v50, %v1444_v40  ;;  %v1598_v61 = vsel %vm1289_vm6, %v1597_v52, %v1596_v41  ;;  %v1750_v62 = vsel %vm1289_vm6, %v1749_v51, %v1748_v42  ;;  %v688_v50 = vld [vmem:[#allocation4 + $0x80] sm:$0xff]  ;;  %v689_v52 = vld [vmem:[#allocation4 + $0x88] sm:$0xff] }
 0x1e0   : > { %v1902_v63 = vsel %vm1289_vm6, %v1901_v53, %v1900_v34  ;;  %v2207_v0 = vsel %vm1289_vm6, %v2206_v55, %v2205_v44  ;;  %v2359_v1 = vsel %vm1289_vm6, %v2358_v57, %v2357_v46  ;;  %v687_v34 = vld [vmem:[#allocation4 + $0x78] sm:$0xff]  ;;  %v12564_v48 = vpack.c.bf16 %v683_v32, %v682_v29  ;;  %v692_v51 = vld [vmem:[#allocation4 + $0xa0] sm:$0xff]  ;;  %v693_v53 = vld [vmem:[#allocation4 + $0xa8] sm:$0xff] }
 0x1e1   : > { %v12570_v49 = vpack.c.bf16 %v687_v34, %v686_v33  ;;  %v12579_v55 = vpack.c.bf16 %v693_v53, %v692_v51  ;;  %v690_v57 = vld [vmem:[#allocation4 + $0x90] sm:$0xff] }
 0x1ea   : > { %v1194_v2 = vpop.f32.mrb[6].mxu0 }
 0x1eb   : > { %v11772_v3 = vpop.f32.mrb[7].mxu0  ;;  %v1291_v4 = vrot.slane %v1194_v2, 2  ;;  %v1447_v5 = vrot.slane %v1194_v2, 3  ;;  %v1599_v6 = vrot.slane %v1194_v2, 4  ;;  %v1751_v7 = vrot.slane %v1194_v2, 5 }
 0x1ec   : > { %v1903_v9 = vrot.slane %v1194_v2, 6  ;;  %v2055_v56 = vrot.slane %v1194_v2, 7  ;;  %v2208_v10 = vsel %vm1292_vm7, %v1194_v2, %v2207_v0  ;;  %v2360_v11 = vrot.slane %v1194_v2, 1  ;;  %v696_v0 = vld [vmem:[#allocation4 + $0xc0] sm:$0xff]  ;;  %v701_v3 = vld [vmem:[#allocation4 + $0xe8] sm:$0xff] }
 0x1ed   : > { %v1293_v12 = vsel %vm1292_vm7, %v1291_v4, %v1290_v58  ;;  %v1448_v13 = vsel %vm1292_vm7, %v1447_v5, %v1446_v59  ;;  %v1600_v60 = vsel %vm1292_vm7, %v1599_v6, %v1598_v61  ;;  %v1752_v14 = vsel %vm1292_vm7, %v1751_v7, %v1750_v62  ;;  %v691_v58 = vld [vmem:[#allocation4 + $0x98] sm:$0xff]  ;;  %v694_v59 = vld [vmem:[#allocation4 + $0xb0] sm:$0xff]  ;;  %v700_v2 = vld [vmem:[#allocation4 + $0xe0] sm:$0xff] }
 0x1ee   : > { %v1904_v26 = vsel %vm1292_vm7, %v1903_v9, %v1902_v63  ;;  %v2056_v27 = vsel %vm1292_vm7, %v2055_v56, %v2054_v54  ;;  %v2361_v15 = vsel %vm1292_vm7, %v2360_v11, %v2359_v1  ;;  %v12573_v54 = vpack.c.bf16 %v689_v52, %v688_v50  ;;  %v695_v61 = vld [vmem:[#allocation4 + $0xb8] sm:$0xff]  ;;  %v697_v1 = vld [vmem:[#allocation4 + $0xc8] sm:$0xff]  ;;  %v698_v6 = vld [vmem:[#allocation4 + $0xd0] sm:$0xff] }
 0x1ef   : > { %v12576_v62 = vpack.c.bf16 %v691_v58, %v690_v57  ;;  %v12582_v63 = vpack.c.bf16 %v695_v61, %v694_v59  ;;  %v12585_v4 = vpack.c.bf16 %v697_v1, %v696_v0  ;;  %v12591_v5 = vpack.c.bf16 %v701_v3, %v700_v2  ;;  %v699_v7 = vld [vmem:[#allocation4 + $0xd8] sm:$0xff]  ;;  %v702_v9 = vld [vmem:[#allocation4 + $0xf0] sm:$0xff] }
 0x1f0   : > { %v703_v56 = vld [vmem:[#allocation4 + $0xf8] sm:$0xff] }
 0x1f1   : > { %v12594_v11 = vpack.c.bf16 %v703_v56, %v702_v9 }
 0x1f4   : > { %v1264_v20 = vpop.f32.mrb[6].mxu1 }
 0x1f5   : > { %v11779_v45 = vpop.f32.mrb[7].mxu1  ;;  %v1294_v25 = vrot.slane %v1264_v20, 1  ;;  %v1449_v28 = vrot.slane %v1264_v20, 2  ;;  %v1601_v30 = vrot.slane %v1264_v20, 3  ;;  %v1753_v31 = vrot.slane %v1264_v20, 4 }
 0x1f6   : > { %v1905_v35 = vrot.slane %v1264_v20, 5  ;;  %v2057_v36 = vrot.slane %v1264_v20, 6  ;;  %v2209_v38 = vrot.slane %v1264_v20, 7  ;;  %v13418_v39 = vsel %vm1295_vm8, %v1264_v20, %v2361_v15 }
 0x1f7   : > { %v1296_v40 = vsel %vm1295_vm8, %v1294_v25, %v1293_v12  ;;  %v1450_v41 = vsel %vm1295_vm8, %v1449_v28, %v1448_v13  ;;  %v1602_v42 = vsel %vm1295_vm8, %v1601_v30, %v1600_v60  ;;  %v1754_v43 = vsel %vm1295_vm8, %v1753_v31, %v1752_v14  ;;  %v13461_v12 = vld [vmem:[%s15176_s4] sm:$0xff] }
 0x1f8   : > { %11789 = vmatmul.mubr.msk.f32.vlgmr.msra.gmra.mrb[8].mxu0 %vm1297_vm9, %v1296_v40  ;;  %11800 = vmatmul.mubr.msk.f32.vlgmr.msra.gmra.mrb[8].mxu1 %vm1297_vm9, %v1450_v41  ;;  %v1906_v44 = vsel %vm1295_vm8, %v1905_v35, %v1904_v26  ;;  %v2058_v46 = vsel %vm1295_vm8, %v2057_v36, %v2056_v27  ;;  %v2210_v47 = vsel %vm1295_vm8, %v2209_v38, %v2208_v10  ;;  %v13049_v13 = vmov 1966171168  }
 0x1f9   : > { %12562 = vmatpush3.bf16.msra.mxu0 %v12561_v23  ;;  %12568 = vmatpush3.bf16.msra.mxu1 %v12567_v24  ;;  %v12588_v10 = vpack.c.bf16 %v699_v7, %v698_v6  ;;  %v1373_v60 = vunpack.c.l.s4 %v13049_v13 }
 0x1fa   : > { %12563 = vmatprep.subr.bf16.mxu0 %v13046_v8  ;;  %12569 = vmatprep.subr.bf16.mxu1 %v13046_v8 }
 0x1fb   : > { %11810 = vmatprep.mubr.msk.f32.mxu0 %vm13047_vm0, %v15205_v16  ;;  %11821 = vmatprep.mubr.msk.f32.mxu1 %vm13047_vm0, %v15205_v16  ;;  %v1374_v14 = vunpack.c.0.s8 %v1373_v60 }
 0x1fd   : > { %12565 = vmatpush3.bf16.msra.mxu0 %v12564_v48  ;;  %12571 = vmatpush3.bf16.msra.mxu1 %v12570_v49  ;;  %v13468_v26 = vsub.s32 %v1374_v14, %v13250_v22 }
 0x1fe   : > { %12572 = vmatprep.subr.bf16.mxu0 %v13046_v8  ;;  %12578 = vmatprep.subr.bf16.mxu1 %v13046_v8 }
 0x200   : > { %11811 = vmatmul.mubr.msk.f32.vlgmr.msra.gmra.mrb[10].mxu0 %vm1297_vm9, %v1602_v42  ;;  %11822 = vmatmul.mubr.msk.f32.vlgmr.msra.gmra.mrb[10].mxu1 %vm1297_vm9, %v1754_v43 }
 0x201   : > { %12574 = vmatpush3.bf16.msra.mxu0 %v12573_v54  ;;  %12580 = vmatpush3.bf16.msra.mxu1 %v12579_v55 }
 0x202   : > { %12575 = vmatprep.subr.bf16.mxu0 %v13046_v8  ;;  %12581 = vmatprep.subr.bf16.mxu1 %v13046_v8 }
 0x203   : > { %11832 = vmatprep.mubr.msk.f32.mxu0 %vm13047_vm0, %v15205_v16  ;;  %11843 = vmatprep.mubr.msk.f32.mxu1 %vm13047_vm0, %v15205_v16 }
 0x205   : > { %12577 = vmatpush3.bf16.msra.mxu0 %v12576_v62  ;;  %12583 = vmatpush3.bf16.msra.mxu1 %v12582_v63 }
 0x206   : > { %12584 = vmatprep.subr.bf16.mxu0 %v13046_v8  ;;  %12590 = vmatprep.subr.bf16.mxu1 %v13046_v8 }
 0x208   : > { %11833 = vmatmul.mubr.msk.f32.vlgmr.msra.gmra.mrb[12].mxu0 %vm1297_vm9, %v1906_v44  ;;  %11844 = vmatmul.mubr.msk.f32.vlgmr.msra.gmra.mrb[12].mxu1 %vm1297_vm9, %v2058_v46 }
 0x209   : > { %12586 = vmatpush3.bf16.msra.mxu0 %v12585_v4  ;;  %12592 = vmatpush3.bf16.msra.mxu1 %v12591_v5 }
 0x20a   : > { %12587 = vmatprep.subr.bf16.mxu0 %v13046_v8  ;;  %12593 = vmatprep.subr.bf16.mxu1 %v13046_v8 }
 0x20b   : > { %11854 = vmatprep.mubr.msk.f32.mxu0 %vm13047_vm0, %v15205_v16  ;;  %11865 = vmatprep.mubr.msk.f32.mxu1 %vm13047_vm0, %v15205_v16 }
 0x20d   : > { %12589 = vmatpush3.bf16.msra.mxu0 %v12588_v10  ;;  %12595 = vmatpush3.bf16.msra.mxu1 %v12594_v11 }
 0x210   : > { %11855 = vmatmul.mubr.msk.f32.vlgmr.msra.gmra.mrb[14].mxu0 %vm1297_vm9, %v2210_v47  ;;  %11866 = vmatmul.mubr.msk.f32.vlgmr.msra.gmra.mrb[14].mxu1 %vm1297_vm9, %v13418_v39 }
 0x211   : > { %11870 = vmatprep.mubr.msk.f32.mxu0 %vm2509_vm10, %v13461_v12  ;;  %11875 = vmatprep.mubr.msk.f32.mxu1 %vm2509_vm10, %v13461_v12 }
 0x2cb   : > { %v1366_v27 = vpop.f32.mrb[8].mxu0  ;;  %v1519_v15 = vpop.f32.mrb[8].mxu1 }
 0x2cc   : > { %v1371_v17 = vcombine.high %v1366_v27, %v1366_v27  ;;  %v1378_v18 = vrot.slane %v1366_v27, %v13468_v26  ;;  %v1524_v19 = vcombine.high %v1519_v15, %v1519_v15  ;;  %v1531_v37 = vrot.slane %v1519_v15, %v13468_v26  ;;  %v11790_v20 = vpop.f32.mrb[9].mxu0  ;;  %v11801_v23 = vpop.f32.mrb[9].mxu1 }
 0x2ce   : > { %v1385_v24 = vrot.slane %v1371_v17, %v13468_v26  ;;  %v1386_v45 = vcombine.high %v1378_v18, %v1378_v18  ;;  %v1394_v25 = vrot.slane %v1378_v18, %v13468_v26  ;;  %v1538_v28 = vrot.slane %v1524_v19, %v13468_v26 }
 0x2cf   : > { %v1539_v29 = vcombine.high %v1531_v37, %v1531_v37  ;;  %v1547_v30 = vrot.slane %v1531_v37, %v13468_v26 }
 0x2d0   : > { %v1387_v31 = vcombine.high %v1385_v24, %v1385_v24  ;;  %v1401_v32 = vrot.slane %v1385_v24, %v13468_v26  ;;  %v1408_v33 = vrot.slane %v1386_v45, %v13468_v26  ;;  %v1416_v34 = vcombine.high %v1394_v25, %v1394_v25  ;;  %1429 = vst.msk [vmem:[#allocation2] sm:$0x1] %vm1428_vm11, %v1394_v25 }
 0x2d1   : > { %v1540_v35 = vcombine.high %v1538_v28, %v1538_v28  ;;  %v1554_v36 = vrot.slane %v1538_v28, %v13468_v26  ;;  %v1561_v38 = vrot.slane %v1539_v29, %v13468_v26  ;;  %v1569_v39 = vcombine.high %v1547_v30, %v1547_v30  ;;  %1581 = vst.msk [vmem:[#allocation2 + $0x1] sm:$0x1] %vm1428_vm11, %v1547_v30 }
 0x2d2   : > { %v1415_v40 = vrot.slane %v1387_v31, %v13468_v26  ;;  %v1417_v41 = vcombine.high %v1401_v32, %v1401_v32  ;;  %v1418_v42 = vcombine.high %v1408_v33, %v1408_v33  ;;  %1430 = vst.msk [vmem:[#allocation2 + $0x8] sm:$0x1] %vm1428_vm11, %v1408_v33  ;;  %1431 = vst.msk [vmem:[#allocation2 + $0x10] sm:$0x1] %vm1428_vm11, %v1416_v34 }
 0x2d3   : > { %1433 = vst.msk [vmem:[#allocation2 + $0x20] sm:$0x1] %vm1428_vm11, %v1401_v32  ;;  %v1568_v43 = vrot.slane %v1540_v35, %v13468_v26  ;;  %v1570_v44 = vcombine.high %v1554_v36, %v1554_v36  ;;  %v1571_v46 = vcombine.high %v1561_v38, %v1561_v38  ;;  %1582 = vst.msk [vmem:[#allocation2 + $0x9] sm:$0x1] %vm1428_vm11, %v1561_v38  ;;  %v1671_v47 = vpop.f32.mrb[10].mxu0  ;;  %v1823_v48 = vpop.f32.mrb[10].mxu1 }
 0x2d4   : > { %1583 = vst.msk [vmem:[#allocation2 + $0x11] sm:$0x1] %vm1428_vm11, %v1569_v39  ;;  %1585 = vst.msk [vmem:[#allocation2 + $0x21] sm:$0x1] %vm1428_vm11, %v1554_v36  ;;  %v1419_v49 = vcombine.high %v1415_v40, %v1415_v40  ;;  %v1676_v50 = vcombine.high %v1671_v47, %v1671_v47  ;;  %v1683_v52 = vrot.slane %v1671_v47, %v13468_v26  ;;  %v11812_v53 = vpop.f32.mrb[11].mxu0  ;;  %v11823_v54 = vpop.f32.mrb[11].mxu1 }
 0x2d5   : > { %1432 = vst.msk [vmem:[#allocation2 + $0x18] sm:$0x1] %vm1428_vm11, %v1418_v42  ;;  %1434 = vst.msk [vmem:[#allocation2 + $0x28] sm:$0x1] %vm1428_vm11, %v1415_v40  ;;  %v1828_v51 = vcombine.high %v1823_v48, %v1823_v48  ;;  %v1572_v55 = vcombine.high %v1568_v43, %v1568_v43  ;;  %v1835_v57 = vrot.slane %v1823_v48, %v13468_v26 }
 0x2d6   : > { %1435 = vst.msk [vmem:[#allocation2 + $0x30] sm:$0x1] %vm1428_vm11, %v1417_v41  ;;  %1584 = vst.msk [vmem:[#allocation2 + $0x19] sm:$0x1] %vm1428_vm11, %v1571_v46  ;;  %v1690_v58 = vrot.slane %v1676_v50, %v13468_v26  ;;  %v1691_v59 = vcombine.high %v1683_v52, %v1683_v52  ;;  %v1699_v61 = vrot.slane %v1683_v52, %v13468_v26 }
 0x2d7   : > { %1586 = vst.msk [vmem:[#allocation2 + $0x29] sm:$0x1] %vm1428_vm11, %v1568_v43  ;;  %1587 = vst.msk [vmem:[#allocation2 + $0x31] sm:$0x1] %vm1428_vm11, %v1570_v44  ;;  %v1842_v62 = vrot.slane %v1828_v51, %v13468_v26  ;;  %v1843_v63 = vcombine.high %v1835_v57, %v1835_v57  ;;  %v1851_v0 = vrot.slane %v1835_v57, %v13468_v26 }
 0x2d8   : > { %1436 = vst.msk [vmem:[#allocation2 + $0x38] sm:$0x1] %vm1428_vm11, %v1419_v49  ;;  %1588 = vst.msk [vmem:[#allocation2 + $0x39] sm:$0x1] %vm1428_vm11, %v1572_v55  ;;  %v1692_v1 = vcombine.high %v1690_v58, %v1690_v58  ;;  %v1706_v2 = vrot.slane %v1690_v58, %v13468_v26  ;;  %v1713_v3 = vrot.slane %v1691_v59, %v13468_v26 }
 0x2d9   : > { %v1721_v4 = vcombine.high %v1699_v61, %v1699_v61  ;;  %1733 = vst.msk [vmem:[#allocation2 + $0x2] sm:$0x1] %vm1428_vm11, %v1699_v61  ;;  %v1844_v5 = vcombine.high %v1842_v62, %v1842_v62  ;;  %v1858_v6 = vrot.slane %v1842_v62, %v13468_v26  ;;  %v1865_v7 = vrot.slane %v1843_v63, %v13468_v26 }
 0x2da   : > { %v1873_v9 = vcombine.high %v1851_v0, %v1851_v0  ;;  %1885 = vst.msk [vmem:[#allocation2 + $0x3] sm:$0x1] %vm1428_vm11, %v1851_v0  ;;  %v1720_v56 = vrot.slane %v1692_v1, %v13468_v26  ;;  %v1722_v10 = vcombine.high %v1706_v2, %v1706_v2  ;;  %v1723_v11 = vcombine.high %v1713_v3, %v1713_v3 }
 0x2db   : > { %1734 = vst.msk [vmem:[#allocation2 + $0xa] sm:$0x1] %vm1428_vm11, %v1713_v3  ;;  %1735 = vst.msk [vmem:[#allocation2 + $0x12] sm:$0x1] %vm1428_vm11, %v1721_v4  ;;  %v1872_v13 = vrot.slane %v1844_v5, %v13468_v26  ;;  %v1874_v60 = vcombine.high %v1858_v6, %v1858_v6  ;;  %v1875_v14 = vcombine.high %v1865_v7, %v1865_v7  ;;  %v1975_v27 = vpop.f32.mrb[12].mxu0  ;;  %v2127_v15 = vpop.f32.mrb[12].mxu1 }
 0x2dc   : > { %1737 = vst.msk [vmem:[#allocation2 + $0x22] sm:$0x1] %vm1428_vm11, %v1706_v2  ;;  %1886 = vst.msk [vmem:[#allocation2 + $0xb] sm:$0x1] %vm1428_vm11, %v1865_v7  ;;  %v1724_v17 = vcombine.high %v1720_v56, %v1720_v56  ;;  %v1980_v18 = vcombine.high %v1975_v27, %v1975_v27  ;;  %v1987_v19 = vrot.slane %v1975_v27, %v13468_v26  ;;  %v11834_v20 = vpop.f32.mrb[13].mxu0  ;;  %v11845_v23 = vpop.f32.mrb[13].mxu1 }
 0x2dd   : > { %1887 = vst.msk [vmem:[#allocation2 + $0x13] sm:$0x1] %vm1428_vm11, %v1873_v9  ;;  %1889 = vst.msk [vmem:[#allocation2 + $0x23] sm:$0x1] %vm1428_vm11, %v1858_v6  ;;  %v2132_v37 = vcombine.high %v2127_v15, %v2127_v15  ;;  %v1876_v24 = vcombine.high %v1872_v13, %v1872_v13  ;;  %v2139_v45 = vrot.slane %v2127_v15, %v13468_v26 }
 0x2de   : > { %1736 = vst.msk [vmem:[#allocation2 + $0x1a] sm:$0x1] %vm1428_vm11, %v1723_v11  ;;  %1738 = vst.msk [vmem:[#allocation2 + $0x2a] sm:$0x1] %vm1428_vm11, %v1720_v56  ;;  %v1994_v25 = vrot.slane %v1980_v18, %v13468_v26  ;;  %v1995_v28 = vcombine.high %v1987_v19, %v1987_v19  ;;  %v2003_v29 = vrot.slane %v1987_v19, %v13468_v26 }
 0x2df   : > { %1739 = vst.msk [vmem:[#allocation2 + $0x32] sm:$0x1] %vm1428_vm11, %v1722_v10  ;;  %1888 = vst.msk [vmem:[#allocation2 + $0x1b] sm:$0x1] %vm1428_vm11, %v1875_v14  ;;  %v2146_v30 = vrot.slane %v2132_v37, %v13468_v26  ;;  %v2147_v31 = vcombine.high %v2139_v45, %v2139_v45  ;;  %v2155_v32 = vrot.slane %v2139_v45, %v13468_v26  ;;  %v447_v37 = vld [vmem:[%s15176_s4 + $0x8] sm:$0xff] }
 0x2e0   : > { %1890 = vst.msk [vmem:[#allocation2 + $0x2b] sm:$0x1] %vm1428_vm11, %v1872_v13  ;;  %1891 = vst.msk [vmem:[#allocation2 + $0x33] sm:$0x1] %vm1428_vm11, %v1874_v60  ;;  %v1996_v33 = vcombine.high %v1994_v25, %v1994_v25  ;;  %v2010_v34 = vrot.slane %v1994_v25, %v13468_v26  ;;  %v2017_v35 = vrot.slane %v1995_v28, %v13468_v26 }
 0x2e1   : > { %1740 = vst.msk [vmem:[#allocation2 + $0x3a] sm:$0x1] %vm1428_vm11, %v1724_v17  ;;  %1892 = vst.msk [vmem:[#allocation2 + $0x3b] sm:$0x1] %vm1428_vm11, %v1876_v24  ;;  %v2025_v36 = vcombine.high %v2003_v29, %v2003_v29  ;;  %v2148_v38 = vcombine.high %v2146_v30, %v2146_v30  ;;  %v2162_v39 = vrot.slane %v2146_v30, %v13468_v26 }
 0x2e2   : > { %2037 = vst.msk [vmem:[#allocation2 + $0x4] sm:$0x1] %vm1428_vm11, %v2003_v29  ;;  %v2169_v40 = vrot.slane %v2147_v31, %v13468_v26  ;;  %v2177_v41 = vcombine.high %v2155_v32, %v2155_v32  ;;  %2189 = vst.msk [vmem:[#allocation2 + $0x5] sm:$0x1] %vm1428_vm11, %v2155_v32  ;;  %v2024_v42 = vrot.slane %v1996_v33, %v13468_v26 }
 0x2e3   : > { %v2026_v43 = vcombine.high %v2010_v34, %v2010_v34  ;;  %v2027_v44 = vcombine.high %v2017_v35, %v2017_v35  ;;  %2038 = vst.msk [vmem:[#allocation2 + $0xc] sm:$0x1] %vm1428_vm11, %v2017_v35  ;;  %2039 = vst.msk [vmem:[#allocation2 + $0x14] sm:$0x1] %vm1428_vm11, %v2025_v36  ;;  %v2176_v46 = vrot.slane %v2148_v38, %v13468_v26  ;;  %v2279_v49 = vpop.f32.mrb[14].mxu0  ;;  %v2431_v50 = vpop.f32.mrb[14].mxu1 }
 0x2e4   : > { %2041 = vst.msk [vmem:[#allocation2 + $0x24] sm:$0x1] %vm1428_vm11, %v2010_v34  ;;  %v2178_v47 = vcombine.high %v2162_v39, %v2162_v39  ;;  %v2179_v48 = vcombine.high %v2169_v40, %v2169_v40  ;;  %2190 = vst.msk [vmem:[#allocation2 + $0xd] sm:$0x1] %vm1428_vm11, %v2169_v40  ;;  %v2028_v52 = vcombine.high %v2024_v42, %v2024_v42  ;;  %v11856_v55 = vpop.f32.mrb[15].mxu0  ;;  %v11867_v57 = vpop.f32.mrb[15].mxu1 }
 0x2e5   : > { %2191 = vst.msk [vmem:[#allocation2 + $0x15] sm:$0x1] %vm1428_vm11, %v2177_v41  ;;  %2193 = vst.msk [vmem:[#allocation2 + $0x25] sm:$0x1] %vm1428_vm11, %v2162_v39  ;;  %v2284_v51 = vcombine.high %v2279_v49, %v2279_v49  ;;  %v2291_v53 = vrot.slane %v2279_v49, %v13468_v26  ;;  %v2436_v54 = vcombine.high %v2431_v50, %v2431_v50 }
 0x2e6   : > { %2040 = vst.msk [vmem:[#allocation2 + $0x1c] sm:$0x1] %vm1428_vm11, %v2027_v44  ;;  %2042 = vst.msk [vmem:[#allocation2 + $0x2c] sm:$0x1] %vm1428_vm11, %v2024_v42  ;;  %v2180_v58 = vcombine.high %v2176_v46, %v2176_v46  ;;  %v2443_v59 = vrot.slane %v2431_v50, %v13468_v26 }
 0x2e7   : > { %2043 = vst.msk [vmem:[#allocation2 + $0x34] sm:$0x1] %vm1428_vm11, %v2026_v43  ;;  %2192 = vst.msk [vmem:[#allocation2 + $0x1d] sm:$0x1] %vm1428_vm11, %v2179_v48  ;;  %v2298_v61 = vrot.slane %v2284_v51, %v13468_v26  ;;  %v2299_v62 = vcombine.high %v2291_v53, %v2291_v53  ;;  %v2307_v63 = vrot.slane %v2291_v53, %v13468_v26 }
 0x2e8   : > { %2194 = vst.msk [vmem:[#allocation2 + $0x2d] sm:$0x1] %vm1428_vm11, %v2176_v46  ;;  %2195 = vst.msk [vmem:[#allocation2 + $0x35] sm:$0x1] %vm1428_vm11, %v2178_v47  ;;  %v2450_v0 = vrot.slane %v2436_v54, %v13468_v26  ;;  %v2451_v1 = vcombine.high %v2443_v59, %v2443_v59  ;;  %v2459_v2 = vrot.slane %v2443_v59, %v13468_v26 }
 0x2e9   : > { %2044 = vst.msk [vmem:[#allocation2 + $0x3c] sm:$0x1] %vm1428_vm11, %v2028_v52  ;;  %2196 = vst.msk [vmem:[#allocation2 + $0x3d] sm:$0x1] %vm1428_vm11, %v2180_v58  ;;  %v2300_v3 = vcombine.high %v2298_v61, %v2298_v61  ;;  %v2314_v4 = vrot.slane %v2298_v61, %v13468_v26  ;;  %v2321_v5 = vrot.slane %v2299_v62, %v13468_v26  ;;  %v12936_v52 = vld [vmem:[%s15175_s3] sm:$0xff] }
 0x2ea   : > { %v2329_v6 = vcombine.high %v2307_v63, %v2307_v63  ;;  %2341 = vst.msk [vmem:[#allocation2 + $0x6] sm:$0x1] %vm1428_vm11, %v2307_v63  ;;  %v2452_v7 = vcombine.high %v2450_v0, %v2450_v0  ;;  %v2466_v9 = vrot.slane %v2450_v0, %v13468_v26  ;;  %v2473_v56 = vrot.slane %v2451_v1, %v13468_v26 }
 0x2eb   : > { %v2481_v10 = vcombine.high %v2459_v2, %v2459_v2  ;;  %2493 = vst.msk [vmem:[#allocation2 + $0x7] sm:$0x1] %vm1428_vm11, %v2459_v2  ;;  %v2328_v11 = vrot.slane %v2300_v3, %v13468_v26  ;;  %v2330_v13 = vcombine.high %v2314_v4, %v2314_v4  ;;  %v2331_v60 = vcombine.high %v2321_v5, %v2321_v5 }
 0x2ec   : > { %2342 = vst.msk [vmem:[#allocation2 + $0xe] sm:$0x1] %vm1428_vm11, %v2321_v5  ;;  %2343 = vst.msk [vmem:[#allocation2 + $0x16] sm:$0x1] %vm1428_vm11, %v2329_v6  ;;  %v2480_v14 = vrot.slane %v2452_v7, %v13468_v26  ;;  %v2482_v27 = vcombine.high %v2466_v9, %v2466_v9  ;;  %v2483_v15 = vcombine.high %v2473_v56, %v2473_v56 }
 0x2ed   : > { %2345 = vst.msk [vmem:[#allocation2 + $0x26] sm:$0x1] %vm1428_vm11, %v2314_v4  ;;  %2494 = vst.msk [vmem:[#allocation2 + $0xf] sm:$0x1] %vm1428_vm11, %v2473_v56  ;;  %v2332_v17 = vcombine.high %v2328_v11, %v2328_v11 }
 0x2ee   : > { %2495 = vst.msk [vmem:[#allocation2 + $0x17] sm:$0x1] %vm1428_vm11, %v2481_v10  ;;  %2497 = vst.msk [vmem:[#allocation2 + $0x27] sm:$0x1] %vm1428_vm11, %v2466_v9  ;;  %v2484_v18 = vcombine.high %v2480_v14, %v2480_v14  ;;  %v3133_v10 = vld [vmem:[#allocation4 + $0x100] sm:$0xff] }
 0x2ef   : > { %2344 = vst.msk [vmem:[#allocation2 + $0x1e] sm:$0x1] %vm1428_vm11, %v2331_v60  ;;  %2346 = vst.msk [vmem:[#allocation2 + $0x2e] sm:$0x1] %vm1428_vm11, %v2328_v11  ;;  %v3134_v11 = vld [vmem:[#allocation4 + $0x108] sm:$0xff] }
 0x2f0   : > { %2347 = vst.msk [vmem:[#allocation2 + $0x36] sm:$0x1] %vm1428_vm11, %v2330_v13  ;;  %2496 = vst.msk [vmem:[#allocation2 + $0x1f] sm:$0x1] %vm1428_vm11, %v2483_v15  ;;  %v3137_v13 = vld [vmem:[#allocation4 + $0x120] sm:$0xff]  ;;  %v12621_v60 = vpack.c.bf16 %v3134_v11, %v3133_v10  ;;  %v3135_v15 = vld [vmem:[#allocation4 + $0x110] sm:$0xff] }
 0x2f1   : > { %2498 = vst.msk [vmem:[#allocation2 + $0x2f] sm:$0x1] %vm1428_vm11, %v2480_v14  ;;  %2499 = vst.msk [vmem:[#allocation2 + $0x37] sm:$0x1] %vm1428_vm11, %v2482_v27  ;;  %v3138_v14 = vld [vmem:[#allocation4 + $0x128] sm:$0xff] }
 0x2f2   : > { %2348 = vst.msk [vmem:[#allocation2 + $0x3e] sm:$0x1] %vm1428_vm11, %v2332_v17  ;;  %2500 = vst.msk [vmem:[#allocation2 + $0x3f] sm:$0x1] %vm1428_vm11, %v2484_v18  ;;  %v2501_v19 = vld [vmem:[#allocation2] sm:$0xff]  ;;  %v12627_v27 = vpack.c.bf16 %v3138_v14, %v3137_v13  ;;  %v3139_v18 = vld [vmem:[#allocation4 + $0x130] sm:$0xff] }
 0x2f3   : > { %11868 = vmatprep.subr.mxu0 %v2501_v19  ;;  %v3136_v17 = vld [vmem:[#allocation4 + $0x118] sm:$0xff] }
 0x2f4   : > { %v2502_v20 = vld [vmem:[#allocation2 + $0x8] sm:$0xff]  ;;  %11869 = vmatpush3.msra.mxu0 %v2501_v19  ;;  %v12624_v19 = vpack.c.bf16 %v3136_v17, %v3135_v15 }
 0x2f5   : > { %v2503_v23 = vld [vmem:[#allocation2 + $0x10] sm:$0xff]  ;;  %11871 = vmatmul.mubr.msk.f32.vlgmr.msra.gmra.mrb[16].mxu0 %vm2509_vm10, %v447_v37  ;;  %11873 = vmatprep.subr.mxu1 %v2502_v20  ;;  %v2505_v45 = vld [vmem:[#allocation2 + $0x20] sm:$0xff] }
 0x2f6   : > { %11878 = vmatprep.subr.mxu0 %v2503_v23  ;;  %11874 = vmatpush3.msra.mxu1 %v2502_v20 }
 0x2f7   : > { %v2504_v24 = vld [vmem:[#allocation2 + $0x18] sm:$0xff]  ;;  %11879 = vmatpush3.msra.mxu0 %v2503_v23  ;;  %11876 = vmatmul.mubr.msk.f32.vlgmr.msra.gmra.mrb[16].mxu1 %vm2509_vm10, %v447_v37  ;;  %v13650_v23 = vld [vmem:[#allocation4 + $0x140] sm:$0xff] }
 0x2f8   : > { %11883 = vmatprep.subr.mxu1 %v2504_v24  ;;  %11888 = vmatprep.subr.mxu0 %v2505_v45  ;;  %v2506_v25 = vld [vmem:[#allocation2 + $0x28] sm:$0xff]  ;;  %v2507_v28 = vld [vmem:[#allocation2 + $0x30] sm:$0xff] }
 0x2f9   : > { %11880 = vmatprep.mubr.msk.f32.mxu0 %vm2509_vm10, %v13461_v12  ;;  %11884 = vmatpush3.msra.mxu1 %v2504_v24  ;;  %v2508_v29 = vld [vmem:[#allocation2 + $0x38] sm:$0xff]  ;;  %v13652_v24 = vld [vmem:[#allocation4 + $0x148] sm:$0xff] }
 0x2fa   : > { %11881 = vmatmul.mubr.msk.f32.vlgmr.msra.gmra.mrb[18].mxu0 %vm2509_vm10, %v447_v37  ;;  %11893 = vmatprep.subr.mxu1 %v2506_v25 }
 0x2fb   : > { %11889 = vmatpush3.msra.mxu0 %v2505_v45  ;;  %11885 = vmatprep.mubr.msk.f32.mxu1 %vm2509_vm10, %v13461_v12  ;;  %v13654_v45 = vld [vmem:[#allocation4 + $0x160] sm:$0xff] }
 0x2fc   : > { %11898 = vmatprep.subr.mxu0 %v2507_v28  ;;  %11886 = vmatmul.mubr.msk.f32.vlgmr.msra.gmra.mrb[18].mxu1 %vm2509_vm10, %v447_v37 }
 0x2fd   : > { %11894 = vmatpush3.msra.mxu1 %v2506_v25  ;;  %11890 = vmatprep.mubr.msk.f32.mxu0 %vm2509_vm10, %v13461_v12  ;;  %v13656_v25 = vld [vmem:[#allocation4 + $0x168] sm:$0xff] }
 0x2fe   : > { %11903 = vmatprep.subr.mxu1 %v2508_v29  ;;  %11891 = vmatmul.mubr.msk.f32.vlgmr.msra.gmra.mrb[20].mxu0 %vm2509_vm10, %v447_v37 }
 0x2ff   : > { %11899 = vmatpush3.msra.mxu0 %v2507_v28  ;;  %11895 = vmatprep.mubr.msk.f32.mxu1 %vm2509_vm10, %v13461_v12  ;;  %v13658_v28 = vld [vmem:[#allocation4 + $0x150] sm:$0xff] }
 0x300   : > { %11896 = vmatmul.mubr.msk.f32.vlgmr.msra.gmra.mrb[20].mxu1 %vm2509_vm10, %v447_v37  ;;  %11900 = vmatprep.mubr.msk.f32.mxu0 %vm2509_vm10, %v13461_v12 }
 0x301   : > { %11904 = vmatpush3.msra.mxu1 %v2508_v29  ;;  %11905 = vmatprep.mubr.msk.f32.mxu1 %vm2509_vm10, %v13461_v12  ;;  %v13660_v29 = vld [vmem:[#allocation4 + $0x158] sm:$0xff] }
 0x302   : > { %11901 = vmatmul.mubr.msk.f32.vlgmr.msra.gmra.mrb[22].mxu0 %vm2509_vm10, %v447_v37  ;;  %12596 = vmatprep.subr.bf16.mxu0 %v13046_v8 }
 0x303   : > { %12599 = vmatprep.subr.bf16.mxu1 %v13046_v8  ;;  %11912 = vmatprep.mubr.msk.f32.mxu0 %vm13047_vm0, %v15205_v16 }
 0x304   : > { %11906 = vmatmul.mubr.msk.f32.vlgmr.msra.gmra.mrb[22].mxu1 %vm2509_vm10, %v447_v37  ;;  %v3140_v37 = vld [vmem:[#allocation4 + $0x138] sm:$0xff] }
 0x305   : > { %11919 = vmatprep.mubr.msk.f32.mxu1 %vm13047_vm0, %v15205_v16  ;;  %v12630_v20 = vpack.c.bf16 %v3140_v37, %v3139_v18 }
 0x3c8   : > { %v11872_v30 = vpop.f32.mrb[16].mxu0 }
 0x3c9   : > { %v3117_v31 = vmax.f32 %v11872_v30, 0.0  ;;  %v2582_v32 = vpop.f32.mrb[17].mxu0  ;;  %v13662_v30 = vld [vmem:[#allocation4 + $0x170] sm:$0xff] }
 0x3ca   : > { %v3116_v33 = vmax.f32 %v2582_v32, 0.0  ;;  %v11877_v34 = vpop.f32.mrb[16].mxu1  ;;  %v13666_v32 = vld [vmem:[#allocation4 + $0x180] sm:$0xff] }
 0x3cb   : > { %v3119_v12 = vmax.f32 %v11877_v34, 0.0  ;;  %v2657_v35 = vpop.f32.mrb[17].mxu1  ;;  %v12633_v34 = vpack.c.bf16 %v13652_v24, %v13650_v23 }
 0x3cc   : > { %v12597_v36 = vpack.c.bf16 %v3117_v31, %v3116_v33  ;;  %v3118_v38 = vmax.f32 %v2657_v35, 0.0  ;;  %v13664_v31 = vld [vmem:[#allocation4 + $0x178] sm:$0xff]  ;;  %v13668_v33 = vld [vmem:[#allocation4 + $0x188] sm:$0xff] }
 0x3cd   : > { %v11882_v39 = vpop.f32.mrb[18].mxu0  ;;  %v13674_v35 = vld [vmem:[#allocation4 + $0x1a8] sm:$0xff] }
 0x3ce   : > { %v12600_v40 = vpack.c.bf16 %v3119_v12, %v3118_v38  ;;  %v3121_v41 = vmax.f32 %v11882_v39, 0.0  ;;  %v2732_v42 = vpop.f32.mrb[19].mxu0  ;;  %12598 = vmatpush3.bf16.msra.mxu0 %v12597_v36  ;;  %v13672_v12 = vld [vmem:[#allocation4 + $0x1a0] sm:$0xff]  ;;  %v12639_v38 = vpack.c.bf16 %v13656_v25, %v13654_v45  ;;  %v12636_v39 = vpack.c.bf16 %v13660_v29, %v13658_v28  ;;  %v3155_v29 = vld [vmem:[#allocation4 + $0x1b0] sm:$0xff] }
 0x3cf   : > { %v3120_v43 = vmax.f32 %v2732_v42, 0.0  ;;  %v11887_v44 = vpop.f32.mrb[18].mxu1  ;;  %12602 = vmatprep.subr.bf16.mxu0 %v13046_v8 }
 0x3d0   : > { %v3123_v46 = vmax.f32 %v11887_v44, 0.0  ;;  %v2807_v47 = vpop.f32.mrb[19].mxu1  ;;  %12601 = vmatpush3.bf16.msra.mxu1 %v12600_v40  ;;  %v12642_v40 = vpack.c.bf16 %v13664_v31, %v13662_v30  ;;  %v3156_v30 = vld [vmem:[#allocation4 + $0x1b8] sm:$0xff] }
 0x3d1   : > { %v12603_v48 = vpack.c.bf16 %v3121_v41, %v3120_v43  ;;  %v3122_v49 = vmax.f32 %v2807_v47, 0.0  ;;  %v11892_v50 = vpop.f32.mrb[20].mxu0  ;;  %11913 = vmatmul.mubr.msk.f32.vlgmr.msra.gmra.mrb[24].mxu0 %vm704_vm1, %v12936_v52  ;;  %12605 = vmatprep.subr.bf16.mxu1 %v13046_v8  ;;  %v12645_v41 = vpack.c.bf16 %v13668_v33, %v13666_v32 }
 0x3d2   : > { %v3125_v51 = vmax.f32 %v11892_v50, 0.0  ;;  %v2882_v53 = vpop.f32.mrb[21].mxu0  ;;  %11926 = vmatprep.mubr.msk.f32.mxu0 %vm13047_vm0, %v15205_v16 }
 0x3d3   : > { %v12606_v54 = vpack.c.bf16 %v3123_v46, %v3122_v49  ;;  %v3124_v55 = vmax.f32 %v2882_v53, 0.0  ;;  %v11897_v57 = vpop.f32.mrb[20].mxu1  ;;  %12604 = vmatpush3.bf16.msra.mxu0 %v12603_v48  ;;  %11920 = vmatmul.mubr.msk.f32.vlgmr.msra.gmra.mrb[24].mxu1 %vm704_vm1, %v12936_v52 }
 0x3d4   : > { %v3127_v58 = vmax.f32 %v11897_v57, 0.0  ;;  %v2957_v59 = vpop.f32.mrb[21].mxu1  ;;  %12608 = vmatprep.subr.bf16.mxu0 %v13046_v8  ;;  %11933 = vmatprep.mubr.msk.f32.mxu1 %vm13047_vm0, %v15205_v16 }
 0x3d5   : > { %v12609_v61 = vpack.c.bf16 %v3125_v51, %v3124_v55  ;;  %v3126_v62 = vmax.f32 %v2957_v59, 0.0  ;;  %v11902_v63 = vpop.f32.mrb[22].mxu0  ;;  %12607 = vmatpush3.bf16.msra.mxu1 %v12606_v54  ;;  %v12651_v51 = vpack.c.bf16 %v13674_v35, %v13672_v12 }
 0x3d6   : > { %v3129_v0 = vmax.f32 %v11902_v63, 0.0  ;;  %v3032_v1 = vpop.f32.mrb[23].mxu0  ;;  %11927 = vmatmul.mubr.msk.f32.vlgmr.msra.gmra.mrb[26].mxu0 %vm704_vm1, %v12936_v52  ;;  %12611 = vmatprep.subr.bf16.mxu1 %v13046_v8 }
 0x3d7   : > { %v12612_v2 = vpack.c.bf16 %v3127_v58, %v3126_v62  ;;  %v3128_v3 = vmax.f32 %v3032_v1, 0.0  ;;  %v11907_v4 = vpop.f32.mrb[22].mxu1  ;;  %12610 = vmatpush3.bf16.msra.mxu0 %v12609_v61  ;;  %11940 = vmatprep.mubr.msk.f32.mxu0 %vm13047_vm0, %v15205_v16 }
 0x3d8   : > { %v3131_v5 = vmax.f32 %v11907_v4, 0.0  ;;  %v3107_v6 = vpop.f32.mrb[23].mxu1  ;;  %11934 = vmatmul.mubr.msk.f32.vlgmr.msra.gmra.mrb[26].mxu1 %vm704_vm1, %v12936_v52  ;;  %12614 = vmatprep.subr.bf16.mxu0 %v13046_v8 }
 0x3d9   : > { %v12615_v7 = vpack.c.bf16 %v3129_v0, %v3128_v3  ;;  %v3130_v9 = vmax.f32 %v3107_v6, 0.0  ;;  %12613 = vmatpush3.bf16.msra.mxu1 %v12612_v2  ;;  %11947 = vmatprep.mubr.msk.f32.mxu1 %vm13047_vm0, %v15205_v16 }
 0x3da   : > { %11941 = vmatmul.mubr.msk.f32.vlgmr.msra.gmra.mrb[28].mxu0 %vm704_vm1, %v12936_v52  ;;  %12617 = vmatprep.subr.bf16.mxu1 %v13046_v8 }
 0x3db   : > { %v12618_v56 = vpack.c.bf16 %v3131_v5, %v3130_v9  ;;  %12616 = vmatpush3.bf16.msra.mxu0 %v12615_v7  ;;  %11954 = vmatprep.mubr.msk.f32.mxu0 %vm13047_vm0, %v15205_v16 }
 0x3dc   : > { %11948 = vmatmul.mubr.msk.f32.vlgmr.msra.gmra.mrb[28].mxu1 %vm704_vm1, %v12936_v52  ;;  %12620 = vmatprep.subr.bf16.mxu0 %v13046_v8 }
 0x3dd   : > { %12619 = vmatpush3.bf16.msra.mxu1 %v12618_v56  ;;  %11961 = vmatprep.mubr.msk.f32.mxu1 %vm13047_vm0, %v15205_v16 }
 0x3de   : > { %11955 = vmatmul.mubr.msk.f32.vlgmr.msra.gmra.mrb[30].mxu0 %vm704_vm1, %v12936_v52  ;;  %12626 = vmatprep.subr.bf16.mxu1 %v13046_v8 }
 0x3df   : > { %11972 = vmatprep.mubr.msk.f32.mxu0 %vm13047_vm0, %v15205_v16  ;;  %12622 = vmatpush3.bf16.msra.mxu0 %v12621_v60 }
 0x3e0   : > { %11962 = vmatmul.mubr.msk.f32.vlgmr.msra.gmra.mrb[30].mxu1 %vm704_vm1, %v12936_v52  ;;  %12623 = vmatprep.subr.bf16.mxu0 %v13046_v8 }
 0x3e1   : > { %11983 = vmatprep.mubr.msk.f32.mxu1 %vm13047_vm0, %v15205_v16  ;;  %12628 = vmatpush3.bf16.msra.mxu1 %v12627_v27 }
 0x3e2   : > { %12629 = vmatprep.subr.bf16.mxu1 %v13046_v8 }
 0x3e3   : > { %12625 = vmatpush3.bf16.msra.mxu0 %v12624_v19 }
 0x3e4   : > { %12632 = vmatprep.subr.bf16.mxu0 %v13046_v8 }
 0x3e5   : > { %12631 = vmatpush3.bf16.msra.mxu1 %v12630_v20 }
 0x3e6   : > { %12638 = vmatprep.subr.bf16.mxu1 %v13046_v8 }
 0x4a4   : > { %v13676_v36 = vpop.f32.mrb[24].mxu0 }
 0x4a5   : > { %v3885_v42 = vrot.slane %v13676_v36, 1  ;;  %v4037_v43 = vrot.slane %v13676_v36, 2  ;;  %v4189_v44 = vrot.slane %v13676_v36, 3  ;;  %v4341_v46 = vrot.slane %v13676_v36, 4  ;;  %v11914_v47 = vpop.f32.mrb[25].mxu0 }
 0x4a6   : > { %v4493_v48 = vrot.slane %v13676_v36, 5  ;;  %v4645_v49 = vrot.slane %v13676_v36, 6  ;;  %v4797_v50 = vrot.slane %v13676_v36, 7  ;;  %v13693_v52 = vpop.f32.mrb[24].mxu1 }
 0x4a7   : > { %v3733_v53 = vrot.slane %v13693_v52, 7  ;;  %v4038_v54 = vrot.slane %v13693_v52, 1  ;;  %v4190_v55 = vrot.slane %v13693_v52, 2  ;;  %v4342_v57 = vrot.slane %v13693_v52, 3  ;;  %v11921_v58 = vpop.f32.mrb[25].mxu1 }
 0x4a8   : > { %v4494_v59 = vrot.slane %v13693_v52, 4  ;;  %v4646_v61 = vrot.slane %v13693_v52, 5  ;;  %v4798_v62 = vrot.slane %v13693_v52, 6  ;;  %v3886_v63 = vsel %vm1277_vm2, %v13693_v52, %v3885_v42 }
 0x4a9   : > { %v13706_v0 = vpop.f32.mrb[26].mxu0  ;;  %v3734_v1 = vsel %vm1277_vm2, %v3733_v53, %v13676_v36  ;;  %v4039_v2 = vsel %vm1277_vm2, %v4038_v54, %v4037_v43  ;;  %v4191_v3 = vsel %vm1277_vm2, %v4190_v55, %v4189_v44  ;;  %v4343_v4 = vsel %vm1277_vm2, %v4342_v57, %v4341_v46 }
 0x4aa   : > { %v3735_v5 = vrot.slane %v13706_v0, 6  ;;  %v3887_v6 = vrot.slane %v13706_v0, 7  ;;  %v4192_v7 = vrot.slane %v13706_v0, 1  ;;  %v4344_v9 = vrot.slane %v13706_v0, 2  ;;  %v11928_v56 = vpop.f32.mrb[27].mxu0 }
 0x4ab   : > { %v4496_v10 = vrot.slane %v13706_v0, 3  ;;  %v4648_v11 = vrot.slane %v13706_v0, 4  ;;  %v4800_v13 = vrot.slane %v13706_v0, 5  ;;  %v13720_v60 = vpop.f32.mrb[26].mxu1  ;;  %v4040_v14 = vsel %vm1280_vm3, %v13706_v0, %v4039_v2 }
 0x4ac   : > { %v11935_v27 = vpop.f32.mrb[27].mxu1  ;;  %v3736_v15 = vsel %vm1280_vm3, %v3735_v5, %v3734_v1  ;;  %v3737_v17 = vrot.slane %v13720_v60, 5  ;;  %v3888_v18 = vsel %vm1280_vm3, %v3887_v6, %v3886_v63  ;;  %v3889_v19 = vrot.slane %v13720_v60, 6 }
 0x4ad   : > { %v13728_v37 = vpop.f32.mrb[28].mxu0  ;;  %v4041_v20 = vrot.slane %v13720_v60, 7  ;;  %v4193_v42 = vsel %vm1280_vm3, %v4192_v7, %v4191_v3  ;;  %v4345_v43 = vsel %vm1280_vm3, %v4344_v9, %v4343_v4  ;;  %v4346_v44 = vrot.slane %v13720_v60, 1 }
 0x4ae   : > { %v11942_v46 = vpop.f32.mrb[29].mxu0  ;;  %v3738_v47 = vsel %vm1283_vm4, %v3737_v17, %v3736_v15  ;;  %v3739_v53 = vrot.slane %v13728_v37, 4  ;;  %v3890_v54 = vsel %vm1283_vm4, %v3889_v19, %v3888_v18  ;;  %v3891_v55 = vrot.slane %v13728_v37, 5 }
 0x4af   : > { %v13738_v57 = vpop.f32.mrb[28].mxu1  ;;  %v4042_v58 = vsel %vm1283_vm4, %v4041_v20, %v4040_v14  ;;  %v4043_v63 = vrot.slane %v13728_v37, 6  ;;  %v4194_v1 = vsel %vm1283_vm4, %v13720_v60, %v4193_v42  ;;  %v4195_v2 = vrot.slane %v13728_v37, 7 }
 0x4b0   : > { %v11949_v3 = vpop.f32.mrb[29].mxu1  ;;  %v3740_v4 = vsel %vm1286_vm5, %v3739_v53, %v3738_v47  ;;  %v3741_v5 = vrot.slane %v13738_v57, 3  ;;  %v3892_v6 = vsel %vm1286_vm5, %v3891_v55, %v3890_v54  ;;  %v3893_v7 = vrot.slane %v13738_v57, 4 }
 0x4b1   : > { %v13749_v9 = vpop.f32.mrb[30].mxu0  ;;  %v4044_v56 = vsel %vm1286_vm5, %v4043_v63, %v4042_v58  ;;  %v4045_v14 = vrot.slane %v13738_v57, 5  ;;  %v4196_v27 = vsel %vm1286_vm5, %v4195_v2, %v4194_v1  ;;  %v4197_v15 = vrot.slane %v13738_v57, 6 }
 0x4b2   : > { %v11956_v17 = vpop.f32.mrb[31].mxu0  ;;  %v3742_v18 = vsel %vm1289_vm6, %v3741_v5, %v3740_v4  ;;  %v3743_v19 = vrot.slane %v13749_v9, 2  ;;  %v3894_v20 = vsel %vm1289_vm6, %v3893_v7, %v3892_v6  ;;  %v3895_v42 = vrot.slane %v13749_v9, 3 }
 0x4b3   : > { %v13759_v46 = vpop.f32.mrb[30].mxu1  ;;  %v4046_v47 = vsel %vm1289_vm6, %v4045_v14, %v4044_v56  ;;  %v4047_v53 = vrot.slane %v13749_v9, 4  ;;  %v4198_v54 = vsel %vm1289_vm6, %v4197_v15, %v4196_v27  ;;  %v4199_v55 = vrot.slane %v13749_v9, 5 }
 0x4b4   : > { %v11963_v58 = vpop.f32.mrb[31].mxu1  ;;  %v3744_v63 = vsel %vm1292_vm7, %v3743_v19, %v3742_v18  ;;  %v3745_v1 = vrot.slane %v13759_v46, 1  ;;  %v3896_v2 = vsel %vm1292_vm7, %v3895_v42, %v3894_v20  ;;  %v3897_v3 = vrot.slane %v13759_v46, 2 }
 0x4b5   : > { %v4048_v4 = vsel %vm1292_vm7, %v4047_v53, %v4046_v47  ;;  %v4049_v5 = vrot.slane %v13759_v46, 3  ;;  %v4200_v6 = vsel %vm1292_vm7, %v4199_v55, %v4198_v54  ;;  %v4201_v7 = vrot.slane %v13759_v46, 4  ;;  %v3151_v58 = vld [vmem:[#allocation4 + $0x190] sm:$0xff] }
 0x4b6   : > { %v3746_v56 = vsel %vm1295_vm8, %v3745_v1, %v3744_v63  ;;  %v3898_v14 = vsel %vm1295_vm8, %v3897_v3, %v3896_v2  ;;  %v4347_v27 = vsel %vm1283_vm4, %v4346_v44, %v4345_v43  ;;  %v4349_v15 = vrot.slane %v13738_v57, 7 }
 0x4b7   : > { %11973 = vmatmul.mubr.msk.f32.vlgmr.msra.gmra.mrb[32].mxu0 %vm1297_vm9, %v3746_v56  ;;  %11984 = vmatmul.mubr.msk.f32.vlgmr.msra.gmra.mrb[32].mxu1 %vm1297_vm9, %v3898_v14  ;;  %v4050_v17 = vsel %vm1295_vm8, %v4049_v5, %v4048_v4  ;;  %v4202_v18 = vsel %vm1295_vm8, %v4201_v7, %v4200_v6  ;;  %v4348_v19 = vsel %vm1286_vm5, %v13728_v37, %v4347_v27  ;;  %v4351_v20 = vrot.slane %v13749_v9, 6  ;;  %v3158_v5 = vld [vmem:[#allocation4 + $0x1c8] sm:$0xff]  ;;  %v3161_v6 = vld [vmem:[#allocation4 + $0x1e0] sm:$0xff]  ;;  %v3160_v56 = vld [vmem:[#allocation4 + $0x1d8] sm:$0xff] }
 0x4b8   : > { %12634 = vmatpush3.bf16.msra.mxu0 %v12633_v34  ;;  %12640 = vmatpush3.bf16.msra.mxu1 %v12639_v38  ;;  %v4350_v43 = vsel %vm1289_vm6, %v4349_v15, %v4348_v19  ;;  %v4353_v44 = vrot.slane %v13759_v46, 5  ;;  %v4495_v42 = vsel %vm1277_vm2, %v4494_v59, %v4493_v48  ;;  %v4498_v47 = vrot.slane %v13720_v60, 2  ;;  %v3162_v7 = vld [vmem:[#allocation4 + $0x1e8] sm:$0xff]  ;;  %v3163_v14 = vld [vmem:[#allocation4 + $0x1f0] sm:$0xff]  ;;  %v3164_v27 = vld [vmem:[#allocation4 + $0x1f8] sm:$0xff] }
 0x4b9   : > { %12635 = vmatprep.subr.bf16.mxu0 %v13046_v8  ;;  %12641 = vmatprep.subr.bf16.mxu1 %v13046_v8  ;;  %v4352_v23 = vsel %vm1292_vm7, %v4351_v20, %v4350_v43  ;;  %v4497_v24 = vsel %vm1280_vm3, %v4496_v10, %v4495_v42  ;;  %v4500_v45 = vrot.slane %v13728_v37, 1  ;;  %v4503_v25 = vrot.slane %v13749_v9, 7 }
 0x4ba   : > { %11994 = vmatprep.mubr.msk.f32.mxu0 %vm13047_vm0, %v15205_v16  ;;  %12005 = vmatprep.mubr.msk.f32.mxu1 %vm13047_vm0, %v15205_v16  ;;  %v4354_v34 = vsel %vm1295_vm8, %v4353_v44, %v4352_v23  ;;  %v4499_v38 = vsel %vm1283_vm4, %v4498_v47, %v4497_v24  ;;  %v4505_v48 = vrot.slane %v13759_v46, 6  ;;  %v4647_v59 = vsel %vm1277_vm2, %v4646_v61, %v4645_v49  ;;  %v3152_v49 = vld [vmem:[#allocation4 + $0x198] sm:$0xff] }
 0x4bb   : > { %v4501_v10 = vsel %vm1286_vm5, %v4500_v45, %v4499_v38  ;;  %v4649_v53 = vsel %vm1280_vm3, %v4648_v11, %v4647_v59  ;;  %v4650_v54 = vrot.slane %v13720_v60, 3  ;;  %v4652_v55 = vrot.slane %v13728_v37, 2 }
 0x4bc   : > { %12637 = vmatpush3.bf16.msra.mxu0 %v12636_v39  ;;  %12643 = vmatpush3.bf16.msra.mxu1 %v12642_v40  ;;  %v4502_v61 = vsel %vm1289_vm6, %v13738_v57, %v4501_v10  ;;  %v4654_v63 = vrot.slane %v13738_v57, 1  ;;  %v4657_v11 = vrot.slane %v13759_v46, 7  ;;  %v4799_v28 = vsel %vm1277_vm2, %v4798_v62, %v4797_v50 }
 0x4bd   : > { %12644 = vmatprep.subr.bf16.mxu0 %v13046_v8  ;;  %12650 = vmatprep.subr.bf16.mxu1 %v13046_v8  ;;  %v4504_v31 = vsel %vm1292_vm7, %v4503_v25, %v4502_v61  ;;  %v4651_v39 = vsel %vm1283_vm4, %v4650_v54, %v4649_v53  ;;  %v4801_v40 = vsel %vm1280_vm3, %v4800_v13, %v4799_v28  ;;  %v4802_v36 = vrot.slane %v13720_v60, 4 }
 0x4be   : > { %v4506_v52 = vsel %vm1295_vm8, %v4505_v48, %v4504_v31  ;;  %v4653_v50 = vsel %vm1286_vm5, %v4652_v55, %v4651_v39  ;;  %v4804_v62 = vrot.slane %v13728_v37, 3  ;;  %v4806_v1 = vrot.slane %v13738_v57, 2  ;;  %v3157_v37 = vld [vmem:[#allocation4 + $0x1c0] sm:$0xff] }
 0x4bf   : > { %11995 = vmatmul.mubr.msk.f32.vlgmr.msra.gmra.mrb[34].mxu0 %vm1297_vm9, %v4050_v17  ;;  %12006 = vmatmul.mubr.msk.f32.vlgmr.msra.gmra.mrb[34].mxu1 %vm1297_vm9, %v4202_v18  ;;  %v12648_v2 = vpack.c.bf16 %v3152_v49, %v3151_v58  ;;  %v4655_v3 = vsel %vm1289_vm6, %v4654_v63, %v4653_v50  ;;  %v4803_v0 = vsel %vm1283_vm4, %v4802_v36, %v4801_v40  ;;  %v4808_v13 = vrot.slane %v13749_v9, 1  ;;  %v13891_v17 = vld [vmem:[%s15176_s4] sm:$0xff] }
 0x4c0   : > { %12646 = vmatpush3.bf16.msra.mxu0 %v12645_v41  ;;  %12652 = vmatpush3.bf16.msra.mxu1 %v12651_v51  ;;  %v12654_v60 = vpack.c.bf16 %v3156_v30, %v3155_v29  ;;  %v4656_v57 = vsel %vm1292_vm7, %v13749_v9, %v4655_v3  ;;  %v4805_v4 = vsel %vm1286_vm5, %v4804_v62, %v4803_v0  ;;  %v3159_v9 = vld [vmem:[#allocation4 + $0x1d0] sm:$0xff] }
 0x4c1   : > { %12647 = vmatprep.subr.bf16.mxu0 %v13046_v8  ;;  %12653 = vmatprep.subr.bf16.mxu1 %v13046_v8  ;;  %v4658_v32 = vsel %vm1295_vm8, %v4657_v11, %v4656_v57  ;;  %v4807_v33 = vsel %vm1289_vm6, %v4806_v1, %v4805_v4  ;;  %v12657_v41 = vpack.c.bf16 %v3158_v5, %v3157_v37 }
 0x4c2   : > { %12016 = vmatprep.mubr.msk.f32.mxu0 %vm13047_vm0, %v15205_v16  ;;  %12027 = vmatprep.mubr.msk.f32.mxu1 %vm13047_vm0, %v15205_v16  ;;  %v4809_v12 = vsel %vm1292_vm7, %v4808_v13, %v4807_v33  ;;  %v12663_v51 = vpack.c.bf16 %v3162_v7, %v3161_v6  ;;  %v12660_v15 = vpack.c.bf16 %v3160_v56, %v3159_v9 }
 0x4c3   : > { %v4810_v35 = vsel %vm1295_vm8, %v13759_v46, %v4809_v12  ;;  %v12666_v46 = vpack.c.bf16 %v3164_v27, %v3163_v14 }
 0x4c4   : > { %12649 = vmatpush3.bf16.msra.mxu0 %v12648_v2  ;;  %12655 = vmatpush3.bf16.msra.mxu1 %v12654_v60 }
 0x4c5   : > { %12656 = vmatprep.subr.bf16.mxu0 %v13046_v8  ;;  %12662 = vmatprep.subr.bf16.mxu1 %v13046_v8 }
 0x4c7   : > { %12017 = vmatmul.mubr.msk.f32.vlgmr.msra.gmra.mrb[36].mxu0 %vm1297_vm9, %v4354_v34  ;;  %12028 = vmatmul.mubr.msk.f32.vlgmr.msra.gmra.mrb[36].mxu1 %vm1297_vm9, %v4506_v52 }
 0x4c8   : > { %12658 = vmatpush3.bf16.msra.mxu0 %v12657_v41  ;;  %12664 = vmatpush3.bf16.msra.mxu1 %v12663_v51 }
 0x4c9   : > { %12659 = vmatprep.subr.bf16.mxu0 %v13046_v8  ;;  %12665 = vmatprep.subr.bf16.mxu1 %v13046_v8 }
 0x4ca   : > { %12038 = vmatprep.mubr.msk.f32.mxu0 %vm13047_vm0, %v15205_v16  ;;  %12049 = vmatprep.mubr.msk.f32.mxu1 %vm13047_vm0, %v15205_v16 }
 0x4cc   : > { %12661 = vmatpush3.bf16.msra.mxu0 %v12660_v15  ;;  %12667 = vmatpush3.bf16.msra.mxu1 %v12666_v46 }
 0x4cf   : > { %12039 = vmatmul.mubr.msk.f32.vlgmr.msra.gmra.mrb[38].mxu0 %vm1297_vm9, %v4658_v32  ;;  %12050 = vmatmul.mubr.msk.f32.vlgmr.msra.gmra.mrb[38].mxu1 %vm1297_vm9, %v4810_v35 }
 0x4d0   : > { %12054 = vmatprep.mubr.msk.f32.mxu0 %vm2509_vm10, %v13891_v17  ;;  %12059 = vmatprep.mubr.msk.f32.mxu1 %vm2509_vm10, %v13891_v17 }
 0x58a   : > { %v3815_v18 = vpop.f32.mrb[32].mxu0  ;;  %v3967_v19 = vpop.f32.mrb[32].mxu1 }
 0x58b   : > { %v3820_v20 = vcombine.high %v3815_v18, %v3815_v18  ;;  %v3827_v43 = vrot.slane %v3815_v18, %v13468_v26  ;;  %v3972_v44 = vcombine.high %v3967_v19, %v3967_v19  ;;  %v3979_v42 = vrot.slane %v3967_v19, %v13468_v26  ;;  %v11974_v47 = vpop.f32.mrb[33].mxu0  ;;  %v11985_v23 = vpop.f32.mrb[33].mxu1 }
 0x58d   : > { %v3834_v24 = vrot.slane %v3820_v20, %v13468_v26  ;;  %v3835_v45 = vcombine.high %v3827_v43, %v3827_v43  ;;  %v3843_v25 = vrot.slane %v3827_v43, %v13468_v26  ;;  %v3986_v34 = vrot.slane %v3972_v44, %v13468_v26 }
 0x58e   : > { %v3987_v38 = vcombine.high %v3979_v42, %v3979_v42  ;;  %v3995_v48 = vrot.slane %v3979_v42, %v13468_v26 }
 0x58f   : > { %v3836_v59 = vcombine.high %v3834_v24, %v3834_v24  ;;  %v3850_v10 = vrot.slane %v3834_v24, %v13468_v26  ;;  %v3857_v53 = vrot.slane %v3835_v45, %v13468_v26  ;;  %v3865_v54 = vcombine.high %v3843_v25, %v3843_v25  ;;  %3877 = vst.msk [vmem:[#allocation2] sm:$0x1] %vm1428_vm11, %v3843_v25 }
 0x590   : > { %v3988_v55 = vcombine.high %v3986_v34, %v3986_v34  ;;  %v4002_v58 = vrot.slane %v3986_v34, %v13468_v26  ;;  %v4009_v49 = vrot.slane %v3987_v38, %v13468_v26  ;;  %v4017_v61 = vcombine.high %v3995_v48, %v3995_v48  ;;  %4029 = vst.msk [vmem:[#allocation2 + $0x1] sm:$0x1] %vm1428_vm11, %v3995_v48 }
 0x591   : > { %v3864_v63 = vrot.slane %v3836_v59, %v13468_v26  ;;  %v3866_v11 = vcombine.high %v3850_v10, %v3850_v10  ;;  %v3867_v28 = vcombine.high %v3857_v53, %v3857_v53  ;;  %3878 = vst.msk [vmem:[#allocation2 + $0x8] sm:$0x1] %vm1428_vm11, %v3857_v53  ;;  %3879 = vst.msk [vmem:[#allocation2 + $0x10] sm:$0x1] %vm1428_vm11, %v3865_v54 }
 0x592   : > { %3881 = vst.msk [vmem:[#allocation2 + $0x20] sm:$0x1] %vm1428_vm11, %v3850_v10  ;;  %v4016_v29 = vrot.slane %v3988_v55, %v13468_v26  ;;  %v4018_v30 = vcombine.high %v4002_v58, %v4002_v58  ;;  %v4019_v31 = vcombine.high %v4009_v49, %v4009_v49  ;;  %4030 = vst.msk [vmem:[#allocation2 + $0x9] sm:$0x1] %vm1428_vm11, %v4009_v49  ;;  %v4119_v39 = vpop.f32.mrb[34].mxu0  ;;  %v4271_v40 = vpop.f32.mrb[34].mxu1 }
 0x593   : > { %4031 = vst.msk [vmem:[#allocation2 + $0x11] sm:$0x1] %vm1428_vm11, %v4017_v61  ;;  %4033 = vst.msk [vmem:[#allocation2 + $0x21] sm:$0x1] %vm1428_vm11, %v4002_v58  ;;  %v3868_v36 = vcombine.high %v3864_v63, %v3864_v63  ;;  %v4124_v52 = vcombine.high %v4119_v39, %v4119_v39  ;;  %v4131_v50 = vrot.slane %v4119_v39, %v13468_v26  ;;  %v11996_v1 = vpop.f32.mrb[35].mxu0  ;;  %v12007_v2 = vpop.f32.mrb[35].mxu1 }
 0x594   : > { %3880 = vst.msk [vmem:[#allocation2 + $0x18] sm:$0x1] %vm1428_vm11, %v3867_v28  ;;  %3882 = vst.msk [vmem:[#allocation2 + $0x28] sm:$0x1] %vm1428_vm11, %v3864_v63  ;;  %v4276_v62 = vcombine.high %v4271_v40, %v4271_v40  ;;  %v4020_v3 = vcombine.high %v4016_v29, %v4016_v29  ;;  %v4283_v0 = vrot.slane %v4271_v40, %v13468_v26 }
 0x595   : > { %3883 = vst.msk [vmem:[#allocation2 + $0x30] sm:$0x1] %vm1428_vm11, %v3866_v11  ;;  %4032 = vst.msk [vmem:[#allocation2 + $0x19] sm:$0x1] %vm1428_vm11, %v4019_v31  ;;  %v4138_v13 = vrot.slane %v4124_v52, %v13468_v26  ;;  %v4139_v60 = vcombine.high %v4131_v50, %v4131_v50  ;;  %v4147_v37 = vrot.slane %v4131_v50, %v13468_v26 }
 0x596   : > { %4034 = vst.msk [vmem:[#allocation2 + $0x29] sm:$0x1] %vm1428_vm11, %v4016_v29  ;;  %4035 = vst.msk [vmem:[#allocation2 + $0x31] sm:$0x1] %vm1428_vm11, %v4018_v30  ;;  %v4290_v57 = vrot.slane %v4276_v62, %v13468_v26  ;;  %v4291_v4 = vcombine.high %v4283_v0, %v4283_v0  ;;  %v4299_v5 = vrot.slane %v4283_v0, %v13468_v26 }
 0x597   : > { %3884 = vst.msk [vmem:[#allocation2 + $0x38] sm:$0x1] %vm1428_vm11, %v3868_v36  ;;  %4036 = vst.msk [vmem:[#allocation2 + $0x39] sm:$0x1] %vm1428_vm11, %v4020_v3  ;;  %v4140_v6 = vcombine.high %v4138_v13, %v4138_v13  ;;  %v4154_v7 = vrot.slane %v4138_v13, %v13468_v26  ;;  %v4161_v32 = vrot.slane %v4139_v60, %v13468_v26 }
 0x598   : > { %v4169_v33 = vcombine.high %v4147_v37, %v4147_v37  ;;  %4181 = vst.msk [vmem:[#allocation2 + $0x2] sm:$0x1] %vm1428_vm11, %v4147_v37  ;;  %v4292_v12 = vcombine.high %v4290_v57, %v4290_v57  ;;  %v4306_v35 = vrot.slane %v4290_v57, %v13468_v26  ;;  %v4313_v41 = vrot.slane %v4291_v4, %v13468_v26 }
 0x599   : > { %v4321_v51 = vcombine.high %v4299_v5, %v4299_v5  ;;  %4333 = vst.msk [vmem:[#allocation2 + $0x3] sm:$0x1] %vm1428_vm11, %v4299_v5  ;;  %v4168_v9 = vrot.slane %v4140_v6, %v13468_v26  ;;  %v4170_v56 = vcombine.high %v4154_v7, %v4154_v7  ;;  %v4171_v14 = vcombine.high %v4161_v32, %v4161_v32 }
 0x59a   : > { %4182 = vst.msk [vmem:[#allocation2 + $0xa] sm:$0x1] %vm1428_vm11, %v4161_v32  ;;  %4183 = vst.msk [vmem:[#allocation2 + $0x12] sm:$0x1] %vm1428_vm11, %v4169_v33  ;;  %v4320_v27 = vrot.slane %v4292_v12, %v13468_v26  ;;  %v4322_v15 = vcombine.high %v4306_v35, %v4306_v35  ;;  %v4323_v46 = vcombine.high %v4313_v41, %v4313_v41  ;;  %v4423_v18 = vpop.f32.mrb[36].mxu0  ;;  %v4575_v19 = vpop.f32.mrb[36].mxu1 }
 0x59b   : > { %4185 = vst.msk [vmem:[#allocation2 + $0x22] sm:$0x1] %vm1428_vm11, %v4154_v7  ;;  %4334 = vst.msk [vmem:[#allocation2 + $0xb] sm:$0x1] %vm1428_vm11, %v4313_v41  ;;  %v4172_v20 = vcombine.high %v4168_v9, %v4168_v9  ;;  %v4428_v43 = vcombine.high %v4423_v18, %v4423_v18  ;;  %v4435_v44 = vrot.slane %v4423_v18, %v13468_v26  ;;  %v12018_v47 = vpop.f32.mrb[37].mxu0  ;;  %v12029_v23 = vpop.f32.mrb[37].mxu1 }
 0x59c   : > { %4335 = vst.msk [vmem:[#allocation2 + $0x13] sm:$0x1] %vm1428_vm11, %v4321_v51  ;;  %4337 = vst.msk [vmem:[#allocation2 + $0x23] sm:$0x1] %vm1428_vm11, %v4306_v35  ;;  %v4580_v42 = vcombine.high %v4575_v19, %v4575_v19  ;;  %v4324_v24 = vcombine.high %v4320_v27, %v4320_v27  ;;  %v4587_v45 = vrot.slane %v4575_v19, %v13468_v26  ;;  %v12938_v23 = vld [vmem:[%s15176_s4 + $0x8] sm:$0xff] }
 0x59d   : > { %4184 = vst.msk [vmem:[#allocation2 + $0x1a] sm:$0x1] %vm1428_vm11, %v4171_v14  ;;  %4186 = vst.msk [vmem:[#allocation2 + $0x2a] sm:$0x1] %vm1428_vm11, %v4168_v9  ;;  %v4442_v25 = vrot.slane %v4428_v43, %v13468_v26  ;;  %v4443_v34 = vcombine.high %v4435_v44, %v4435_v44  ;;  %v4451_v38 = vrot.slane %v4435_v44, %v13468_v26 }
 0x59e   : > { %4187 = vst.msk [vmem:[#allocation2 + $0x32] sm:$0x1] %vm1428_vm11, %v4170_v56  ;;  %4336 = vst.msk [vmem:[#allocation2 + $0x1b] sm:$0x1] %vm1428_vm11, %v4323_v46  ;;  %v4594_v48 = vrot.slane %v4580_v42, %v13468_v26  ;;  %v4595_v59 = vcombine.high %v4587_v45, %v4587_v45  ;;  %v4603_v10 = vrot.slane %v4587_v45, %v13468_v26 }
 0x59f   : > { %4338 = vst.msk [vmem:[#allocation2 + $0x2b] sm:$0x1] %vm1428_vm11, %v4320_v27  ;;  %4339 = vst.msk [vmem:[#allocation2 + $0x33] sm:$0x1] %vm1428_vm11, %v4322_v15  ;;  %v4444_v53 = vcombine.high %v4442_v25, %v4442_v25  ;;  %v4458_v54 = vrot.slane %v4442_v25, %v13468_v26  ;;  %v4465_v55 = vrot.slane %v4443_v34, %v13468_v26 }
 0x5a0   : > { %4188 = vst.msk [vmem:[#allocation2 + $0x3a] sm:$0x1] %vm1428_vm11, %v4172_v20  ;;  %4340 = vst.msk [vmem:[#allocation2 + $0x3b] sm:$0x1] %vm1428_vm11, %v4324_v24  ;;  %v4473_v58 = vcombine.high %v4451_v38, %v4451_v38  ;;  %v4596_v49 = vcombine.high %v4594_v48, %v4594_v48  ;;  %v4610_v61 = vrot.slane %v4594_v48, %v13468_v26 }
 0x5a1   : > { %4485 = vst.msk [vmem:[#allocation2 + $0x4] sm:$0x1] %vm1428_vm11, %v4451_v38  ;;  %v4617_v63 = vrot.slane %v4595_v59, %v13468_v26  ;;  %v4625_v11 = vcombine.high %v4603_v10, %v4603_v10  ;;  %4637 = vst.msk [vmem:[#allocation2 + $0x5] sm:$0x1] %vm1428_vm11, %v4603_v10  ;;  %v4472_v28 = vrot.slane %v4444_v53, %v13468_v26 }
 0x5a2   : > { %v4474_v29 = vcombine.high %v4458_v54, %v4458_v54  ;;  %v4475_v30 = vcombine.high %v4465_v55, %v4465_v55  ;;  %4486 = vst.msk [vmem:[#allocation2 + $0xc] sm:$0x1] %vm1428_vm11, %v4465_v55  ;;  %4487 = vst.msk [vmem:[#allocation2 + $0x14] sm:$0x1] %vm1428_vm11, %v4473_v58  ;;  %v4624_v31 = vrot.slane %v4596_v49, %v13468_v26  ;;  %v4727_v36 = vpop.f32.mrb[38].mxu0  ;;  %v4879_v52 = vpop.f32.mrb[38].mxu1 }
 0x5a3   : > { %4489 = vst.msk [vmem:[#allocation2 + $0x24] sm:$0x1] %vm1428_vm11, %v4458_v54  ;;  %v4626_v39 = vcombine.high %v4610_v61, %v4610_v61  ;;  %v4627_v40 = vcombine.high %v4617_v63, %v4617_v63  ;;  %4638 = vst.msk [vmem:[#allocation2 + $0xd] sm:$0x1] %vm1428_vm11, %v4617_v63  ;;  %v4476_v50 = vcombine.high %v4472_v28, %v4472_v28  ;;  %v12040_v3 = vpop.f32.mrb[39].mxu0  ;;  %v12051_v0 = vpop.f32.mrb[39].mxu1 }
 0x5a4   : > { %4639 = vst.msk [vmem:[#allocation2 + $0x15] sm:$0x1] %vm1428_vm11, %v4625_v11  ;;  %4641 = vst.msk [vmem:[#allocation2 + $0x25] sm:$0x1] %vm1428_vm11, %v4610_v61  ;;  %v4732_v62 = vcombine.high %v4727_v36, %v4727_v36  ;;  %v4739_v1 = vrot.slane %v4727_v36, %v13468_v26  ;;  %v4884_v2 = vcombine.high %v4879_v52, %v4879_v52 }
 0x5a5   : > { %4488 = vst.msk [vmem:[#allocation2 + $0x1c] sm:$0x1] %vm1428_vm11, %v4475_v30  ;;  %4490 = vst.msk [vmem:[#allocation2 + $0x2c] sm:$0x1] %vm1428_vm11, %v4472_v28  ;;  %v4628_v13 = vcombine.high %v4624_v31, %v4624_v31  ;;  %v4891_v60 = vrot.slane %v4879_v52, %v13468_v26 }
 0x5a6   : > { %4491 = vst.msk [vmem:[#allocation2 + $0x34] sm:$0x1] %vm1428_vm11, %v4474_v29  ;;  %4640 = vst.msk [vmem:[#allocation2 + $0x1d] sm:$0x1] %vm1428_vm11, %v4627_v40  ;;  %v4746_v37 = vrot.slane %v4732_v62, %v13468_v26  ;;  %v4747_v57 = vcombine.high %v4739_v1, %v4739_v1  ;;  %v4755_v4 = vrot.slane %v4739_v1, %v13468_v26 }
 0x5a7   : > { %4642 = vst.msk [vmem:[#allocation2 + $0x2d] sm:$0x1] %vm1428_vm11, %v4624_v31  ;;  %4643 = vst.msk [vmem:[#allocation2 + $0x35] sm:$0x1] %vm1428_vm11, %v4626_v39  ;;  %v4898_v5 = vrot.slane %v4884_v2, %v13468_v26  ;;  %v4899_v6 = vcombine.high %v4891_v60, %v4891_v60  ;;  %v4907_v7 = vrot.slane %v4891_v60, %v13468_v26 }
 0x5a8   : > { %4492 = vst.msk [vmem:[#allocation2 + $0x3c] sm:$0x1] %vm1428_vm11, %v4476_v50  ;;  %4644 = vst.msk [vmem:[#allocation2 + $0x3d] sm:$0x1] %vm1428_vm11, %v4628_v13  ;;  %v4748_v32 = vcombine.high %v4746_v37, %v4746_v37  ;;  %v4762_v33 = vrot.slane %v4746_v37, %v13468_v26  ;;  %v4769_v12 = vrot.slane %v4747_v57, %v13468_v26  ;;  %v12939_v50 = vld [vmem:[%s15175_s3] sm:$0xff] }
 0x5a9   : > { %v4777_v35 = vcombine.high %v4755_v4, %v4755_v4  ;;  %4789 = vst.msk [vmem:[#allocation2 + $0x6] sm:$0x1] %vm1428_vm11, %v4755_v4  ;;  %v4900_v41 = vcombine.high %v4898_v5, %v4898_v5  ;;  %v4914_v51 = vrot.slane %v4898_v5, %v13468_v26  ;;  %v4921_v9 = vrot.slane %v4899_v6, %v13468_v26 }
 0x5aa   : > { %v4929_v56 = vcombine.high %v4907_v7, %v4907_v7  ;;  %4941 = vst.msk [vmem:[#allocation2 + $0x7] sm:$0x1] %vm1428_vm11, %v4907_v7  ;;  %v4776_v14 = vrot.slane %v4748_v32, %v13468_v26  ;;  %v4778_v27 = vcombine.high %v4762_v33, %v4762_v33  ;;  %v4779_v15 = vcombine.high %v4769_v12, %v4769_v12 }
 0x5ab   : > { %4790 = vst.msk [vmem:[#allocation2 + $0xe] sm:$0x1] %vm1428_vm11, %v4769_v12  ;;  %4791 = vst.msk [vmem:[#allocation2 + $0x16] sm:$0x1] %vm1428_vm11, %v4777_v35  ;;  %v4928_v46 = vrot.slane %v4900_v41, %v13468_v26  ;;  %v4930_v18 = vcombine.high %v4914_v51, %v4914_v51  ;;  %v4931_v19 = vcombine.high %v4921_v9, %v4921_v9 }
 0x5ac   : > { %4793 = vst.msk [vmem:[#allocation2 + $0x26] sm:$0x1] %vm1428_vm11, %v4762_v33  ;;  %4942 = vst.msk [vmem:[#allocation2 + $0xf] sm:$0x1] %vm1428_vm11, %v4921_v9  ;;  %v4780_v20 = vcombine.high %v4776_v14, %v4776_v14 }
 0x5ad   : > { %4943 = vst.msk [vmem:[#allocation2 + $0x17] sm:$0x1] %vm1428_vm11, %v4929_v56  ;;  %4945 = vst.msk [vmem:[#allocation2 + $0x27] sm:$0x1] %vm1428_vm11, %v4914_v51  ;;  %v4932_v43 = vcombine.high %v4928_v46, %v4928_v46  ;;  %v5574_v56 = vld [vmem:[#allocation4 + $0x200] sm:$0xff] }
 0x5ae   : > { %4792 = vst.msk [vmem:[#allocation2 + $0x1e] sm:$0x1] %vm1428_vm11, %v4779_v15  ;;  %4794 = vst.msk [vmem:[#allocation2 + $0x2e] sm:$0x1] %vm1428_vm11, %v4776_v14  ;;  %v5575_v14 = vld [vmem:[#allocation4 + $0x208] sm:$0xff] }
 0x5af   : > { %4795 = vst.msk [vmem:[#allocation2 + $0x36] sm:$0x1] %vm1428_vm11, %v4778_v27  ;;  %4944 = vst.msk [vmem:[#allocation2 + $0x1f] sm:$0x1] %vm1428_vm11, %v4931_v19  ;;  %v5578_v27 = vld [vmem:[#allocation4 + $0x220] sm:$0xff]  ;;  %v12693_v15 = vpack.c.bf16 %v5575_v14, %v5574_v56  ;;  %v5576_v19 = vld [vmem:[#allocation4 + $0x210] sm:$0xff] }
 0x5b0   : > { %4946 = vst.msk [vmem:[#allocation2 + $0x2f] sm:$0x1] %vm1428_vm11, %v4928_v46  ;;  %4947 = vst.msk [vmem:[#allocation2 + $0x37] sm:$0x1] %vm1428_vm11, %v4930_v18  ;;  %v5579_v46 = vld [vmem:[#allocation4 + $0x228] sm:$0xff] }
 0x5b1   : > { %4796 = vst.msk [vmem:[#allocation2 + $0x3e] sm:$0x1] %vm1428_vm11, %v4780_v20  ;;  %4948 = vst.msk [vmem:[#allocation2 + $0x3f] sm:$0x1] %vm1428_vm11, %v4932_v43  ;;  %v4949_v44 = vld [vmem:[#allocation2] sm:$0xff]  ;;  %v12699_v18 = vpack.c.bf16 %v5579_v46, %v5578_v27  ;;  %v5580_v43 = vld [vmem:[#allocation4 + $0x230] sm:$0xff] }
 0x5b2   : > { %12052 = vmatprep.subr.mxu0 %v4949_v44  ;;  %v5577_v20 = vld [vmem:[#allocation4 + $0x218] sm:$0xff] }
 0x5b3   : > { %v4950_v42 = vld [vmem:[#allocation2 + $0x8] sm:$0xff]  ;;  %12053 = vmatpush3.msra.mxu0 %v4949_v44  ;;  %v12696_v44 = vpack.c.bf16 %v5577_v20, %v5576_v19 }
 0x5b4   : > { %v4951_v47 = vld [vmem:[#allocation2 + $0x10] sm:$0xff]  ;;  %12055 = vmatmul.mubr.msk.f32.vlgmr.msra.gmra.mrb[40].mxu0 %vm2509_vm10, %v12938_v23  ;;  %12057 = vmatprep.subr.mxu1 %v4950_v42  ;;  %v4953_v45 = vld [vmem:[#allocation2 + $0x20] sm:$0xff] }
 0x5b5   : > { %12062 = vmatprep.subr.mxu0 %v4951_v47  ;;  %12058 = vmatpush3.msra.mxu1 %v4950_v42  ;;  %v5581_v42 = vld [vmem:[#allocation4 + $0x238] sm:$0xff] }
 0x5b6   : > { %v4952_v24 = vld [vmem:[#allocation2 + $0x18] sm:$0xff]  ;;  %12063 = vmatpush3.msra.mxu0 %v4951_v47  ;;  %12060 = vmatmul.mubr.msk.f32.vlgmr.msra.gmra.mrb[40].mxu1 %vm2509_vm10, %v12938_v23  ;;  %v12702_v47 = vpack.c.bf16 %v5581_v42, %v5580_v43 }
 0x5b7   : > { %12067 = vmatprep.subr.mxu1 %v4952_v24  ;;  %12072 = vmatprep.subr.mxu0 %v4953_v45  ;;  %v4954_v25 = vld [vmem:[#allocation2 + $0x28] sm:$0xff]  ;;  %v4955_v34 = vld [vmem:[#allocation2 + $0x30] sm:$0xff] }
 0x5b8   : > { %12064 = vmatprep.mubr.msk.f32.mxu0 %vm2509_vm10, %v13891_v17  ;;  %12068 = vmatpush3.msra.mxu1 %v4952_v24  ;;  %v4956_v38 = vld [vmem:[#allocation2 + $0x38] sm:$0xff]  ;;  %v14079_v24 = vld [vmem:[#allocation4 + $0x248] sm:$0xff] }
 0x5b9   : > { %12065 = vmatmul.mubr.msk.f32.vlgmr.msra.gmra.mrb[42].mxu0 %vm2509_vm10, %v12938_v23  ;;  %12077 = vmatprep.subr.mxu1 %v4954_v25 }
 0x5ba   : > { %12073 = vmatpush3.msra.mxu0 %v4953_v45  ;;  %12069 = vmatprep.mubr.msk.f32.mxu1 %vm2509_vm10, %v13891_v17  ;;  %v14081_v45 = vld [vmem:[#allocation4 + $0x260] sm:$0xff] }
 0x5bb   : > { %12082 = vmatprep.subr.mxu0 %v4955_v34  ;;  %12070 = vmatmul.mubr.msk.f32.vlgmr.msra.gmra.mrb[42].mxu1 %vm2509_vm10, %v12938_v23 }
 0x5bc   : > { %12078 = vmatpush3.msra.mxu1 %v4954_v25  ;;  %12074 = vmatprep.mubr.msk.f32.mxu0 %vm2509_vm10, %v13891_v17  ;;  %v14083_v25 = vld [vmem:[#allocation4 + $0x268] sm:$0xff] }
 0x5bd   : > { %12087 = vmatprep.subr.mxu1 %v4956_v38  ;;  %12075 = vmatmul.mubr.msk.f32.vlgmr.msra.gmra.mrb[44].mxu0 %vm2509_vm10, %v12938_v23 }
 0x5be   : > { %12083 = vmatpush3.msra.mxu0 %v4955_v34  ;;  %12079 = vmatprep.mubr.msk.f32.mxu1 %vm2509_vm10, %v13891_v17  ;;  %v14085_v34 = vld [vmem:[#allocation4 + $0x250] sm:$0xff] }
 0x5bf   : > { %12080 = vmatmul.mubr.msk.f32.vlgmr.msra.gmra.mrb[44].mxu1 %vm2509_vm10, %v12938_v23  ;;  %12084 = vmatprep.mubr.msk.f32.mxu0 %vm2509_vm10, %v13891_v17 }
 0x5c0   : > { %12088 = vmatpush3.msra.mxu1 %v4956_v38  ;;  %12089 = vmatprep.mubr.msk.f32.mxu1 %vm2509_vm10, %v13891_v17  ;;  %v14087_v38 = vld [vmem:[#allocation4 + $0x258] sm:$0xff] }
 0x5c1   : > { %12085 = vmatmul.mubr.msk.f32.vlgmr.msra.gmra.mrb[46].mxu0 %vm2509_vm10, %v12938_v23  ;;  %12668 = vmatprep.subr.bf16.mxu0 %v13046_v8 }
 0x5c2   : > { %12671 = vmatprep.subr.bf16.mxu1 %v13046_v8  ;;  %12096 = vmatprep.mubr.msk.f32.mxu0 %vm13047_vm0, %v15205_v16 }
 0x5c3   : > { %12090 = vmatmul.mubr.msk.f32.vlgmr.msra.gmra.mrb[46].mxu1 %vm2509_vm10, %v12938_v23  ;;  %v14077_v23 = vld [vmem:[#allocation4 + $0x240] sm:$0xff] }
 0x5c4   : > { %12103 = vmatprep.mubr.msk.f32.mxu1 %vm13047_vm0, %v15205_v16 }
 0x687   : > { %v12056_v48 = vpop.f32.mrb[40].mxu0 }
 0x688   : > { %v5558_v59 = vmax.f32 %v12056_v48, 0.0  ;;  %v5023_v10 = vpop.f32.mrb[41].mxu0  ;;  %v14089_v48 = vld [vmem:[#allocation4 + $0x270] sm:$0xff] }
 0x689   : > { %v5557_v53 = vmax.f32 %v5023_v10, 0.0  ;;  %v12061_v54 = vpop.f32.mrb[40].mxu1  ;;  %v14093_v10 = vld [vmem:[#allocation4 + $0x280] sm:$0xff] }
 0x68a   : > { %v5560_v17 = vmax.f32 %v12061_v54, 0.0  ;;  %v5098_v55 = vpop.f32.mrb[41].mxu1  ;;  %v12705_v54 = vpack.c.bf16 %v14079_v24, %v14077_v23 }
 0x68b   : > { %v12669_v58 = vpack.c.bf16 %v5558_v59, %v5557_v53  ;;  %v5559_v49 = vmax.f32 %v5098_v55, 0.0  ;;  %v14091_v59 = vld [vmem:[#allocation4 + $0x278] sm:$0xff]  ;;  %v14095_v53 = vld [vmem:[#allocation4 + $0x288] sm:$0xff] }
 0x68c   : > { %v12066_v61 = vpop.f32.mrb[42].mxu0  ;;  %v14101_v55 = vld [vmem:[#allocation4 + $0x2a8] sm:$0xff] }
 0x68d   : > { %v12672_v63 = vpack.c.bf16 %v5560_v17, %v5559_v49  ;;  %v5562_v11 = vmax.f32 %v12066_v61, 0.0  ;;  %v5173_v28 = vpop.f32.mrb[43].mxu0  ;;  %12670 = vmatpush3.bf16.msra.mxu0 %v12669_v58  ;;  %v14099_v17 = vld [vmem:[#allocation4 + $0x2a0] sm:$0xff]  ;;  %v12711_v49 = vpack.c.bf16 %v14083_v25, %v14081_v45  ;;  %v12708_v61 = vpack.c.bf16 %v14087_v38, %v14085_v34  ;;  %v5596_v38 = vld [vmem:[#allocation4 + $0x2b0] sm:$0xff] }
 0x68e   : > { %v5561_v29 = vmax.f32 %v5173_v28, 0.0  ;;  %v12071_v30 = vpop.f32.mrb[42].mxu1  ;;  %12674 = vmatprep.subr.bf16.mxu0 %v13046_v8 }
 0x68f   : > { %v5564_v31 = vmax.f32 %v12071_v30, 0.0  ;;  %v5248_v39 = vpop.f32.mrb[43].mxu1  ;;  %12673 = vmatpush3.bf16.msra.mxu1 %v12672_v63  ;;  %v12714_v63 = vpack.c.bf16 %v14091_v59, %v14089_v48  ;;  %v5597_v48 = vld [vmem:[#allocation4 + $0x2b8] sm:$0xff] }
 0x690   : > { %v12675_v40 = vpack.c.bf16 %v5562_v11, %v5561_v29  ;;  %v5563_v36 = vmax.f32 %v5248_v39, 0.0  ;;  %v12076_v52 = vpop.f32.mrb[44].mxu0  ;;  %12097 = vmatmul.mubr.msk.f32.vlgmr.msra.gmra.mrb[48].mxu0 %vm704_vm1, %v12939_v50  ;;  %12677 = vmatprep.subr.bf16.mxu1 %v13046_v8  ;;  %v12717_v11 = vpack.c.bf16 %v14095_v53, %v14093_v10 }
 0x691   : > { %v5566_v62 = vmax.f32 %v12076_v52, 0.0  ;;  %v5323_v1 = vpop.f32.mrb[45].mxu0  ;;  %12110 = vmatprep.mubr.msk.f32.mxu0 %vm13047_vm0, %v15205_v16 }
 0x692   : > { %v12678_v2 = vpack.c.bf16 %v5564_v31, %v5563_v36  ;;  %v5565_v3 = vmax.f32 %v5323_v1, 0.0  ;;  %v12081_v0 = vpop.f32.mrb[44].mxu1  ;;  %12676 = vmatpush3.bf16.msra.mxu0 %v12675_v40  ;;  %12104 = vmatmul.mubr.msk.f32.vlgmr.msra.gmra.mrb[48].mxu1 %vm704_vm1, %v12939_v50 }
 0x693   : > { %v5568_v13 = vmax.f32 %v12081_v0, 0.0  ;;  %v5398_v60 = vpop.f32.mrb[45].mxu1  ;;  %12680 = vmatprep.subr.bf16.mxu0 %v13046_v8  ;;  %12117 = vmatprep.mubr.msk.f32.mxu1 %vm13047_vm0, %v15205_v16 }
 0x694   : > { %v12681_v37 = vpack.c.bf16 %v5566_v62, %v5565_v3  ;;  %v5567_v57 = vmax.f32 %v5398_v60, 0.0  ;;  %v12086_v4 = vpop.f32.mrb[46].mxu0  ;;  %12679 = vmatpush3.bf16.msra.mxu1 %v12678_v2  ;;  %v12723_v62 = vpack.c.bf16 %v14101_v55, %v14099_v17 }
 0x695   : > { %v5570_v5 = vmax.f32 %v12086_v4, 0.0  ;;  %v5473_v6 = vpop.f32.mrb[47].mxu0  ;;  %12111 = vmatmul.mubr.msk.f32.vlgmr.msra.gmra.mrb[50].mxu0 %vm704_vm1, %v12939_v50  ;;  %12683 = vmatprep.subr.bf16.mxu1 %v13046_v8 }
 0x696   : > { %v12684_v7 = vpack.c.bf16 %v5568_v13, %v5567_v57  ;;  %v5569_v32 = vmax.f32 %v5473_v6, 0.0  ;;  %v12091_v33 = vpop.f32.mrb[46].mxu1  ;;  %12682 = vmatpush3.bf16.msra.mxu0 %v12681_v37  ;;  %12124 = vmatprep.mubr.msk.f32.mxu0 %vm13047_vm0, %v15205_v16 }
 0x697   : > { %v5572_v12 = vmax.f32 %v12091_v33, 0.0  ;;  %v5548_v35 = vpop.f32.mrb[47].mxu1  ;;  %12118 = vmatmul.mubr.msk.f32.vlgmr.msra.gmra.mrb[50].mxu1 %vm704_vm1, %v12939_v50  ;;  %12686 = vmatprep.subr.bf16.mxu0 %v13046_v8 }
 0x698   : > { %v12687_v41 = vpack.c.bf16 %v5570_v5, %v5569_v32  ;;  %v5571_v51 = vmax.f32 %v5548_v35, 0.0  ;;  %12685 = vmatpush3.bf16.msra.mxu1 %v12684_v7  ;;  %12131 = vmatprep.mubr.msk.f32.mxu1 %vm13047_vm0, %v15205_v16 }
 0x699   : > { %12125 = vmatmul.mubr.msk.f32.vlgmr.msra.gmra.mrb[52].mxu0 %vm704_vm1, %v12939_v50  ;;  %12689 = vmatprep.subr.bf16.mxu1 %v13046_v8 }
 0x69a   : > { %v12690_v9 = vpack.c.bf16 %v5572_v12, %v5571_v51  ;;  %12688 = vmatpush3.bf16.msra.mxu0 %v12687_v41  ;;  %12138 = vmatprep.mubr.msk.f32.mxu0 %vm13047_vm0, %v15205_v16 }
 0x69b   : > { %12132 = vmatmul.mubr.msk.f32.vlgmr.msra.gmra.mrb[52].mxu1 %vm704_vm1, %v12939_v50  ;;  %12692 = vmatprep.subr.bf16.mxu0 %v13046_v8 }
 0x69c   : > { %12691 = vmatpush3.bf16.msra.mxu1 %v12690_v9  ;;  %12145 = vmatprep.mubr.msk.f32.mxu1 %vm13047_vm0, %v15205_v16 }
 0x69d   : > { %12139 = vmatmul.mubr.msk.f32.vlgmr.msra.gmra.mrb[54].mxu0 %vm704_vm1, %v12939_v50  ;;  %12698 = vmatprep.subr.bf16.mxu1 %v13046_v8 }
 0x69e   : > { %12156 = vmatprep.mubr.msk.f32.mxu0 %vm13047_vm0, %v15205_v16  ;;  %12694 = vmatpush3.bf16.msra.mxu0 %v12693_v15 }
 0x69f   : > { %12146 = vmatmul.mubr.msk.f32.vlgmr.msra.gmra.mrb[54].mxu1 %vm704_vm1, %v12939_v50  ;;  %12695 = vmatprep.subr.bf16.mxu0 %v13046_v8 }
 0x6a0   : > { %12167 = vmatprep.mubr.msk.f32.mxu1 %vm13047_vm0, %v15205_v16  ;;  %12700 = vmatpush3.bf16.msra.mxu1 %v12699_v18 }
 0x6a1   : > { %12701 = vmatprep.subr.bf16.mxu1 %v13046_v8 }
 0x6a2   : > { %12697 = vmatpush3.bf16.msra.mxu0 %v12696_v44 }
 0x6a3   : > { %12704 = vmatprep.subr.bf16.mxu0 %v13046_v8 }
 0x6a4   : > { %12703 = vmatpush3.bf16.msra.mxu1 %v12702_v47 }
 0x6a5   : > { %12710 = vmatprep.subr.bf16.mxu1 %v13046_v8 }
 0x763   : > { %v14103_v58 = vpop.f32.mrb[48].mxu0 }
 0x764   : > { %v6326_v28 = vrot.slane %v14103_v58, 1  ;;  %v6478_v29 = vrot.slane %v14103_v58, 2  ;;  %v6630_v30 = vrot.slane %v14103_v58, 3  ;;  %v6782_v31 = vrot.slane %v14103_v58, 4  ;;  %v12098_v39 = vpop.f32.mrb[49].mxu0 }
 0x765   : > { %v6934_v40 = vrot.slane %v14103_v58, 5  ;;  %v7086_v36 = vrot.slane %v14103_v58, 6  ;;  %v7238_v52 = vrot.slane %v14103_v58, 7  ;;  %v14120_v50 = vpop.f32.mrb[48].mxu1 }
 0x766   : > { %v6174_v1 = vrot.slane %v14120_v50, 7  ;;  %v6479_v2 = vrot.slane %v14120_v50, 1  ;;  %v6631_v3 = vrot.slane %v14120_v50, 2  ;;  %v6783_v0 = vrot.slane %v14120_v50, 3  ;;  %v12105_v13 = vpop.f32.mrb[49].mxu1 }
 0x767   : > { %v6935_v60 = vrot.slane %v14120_v50, 4  ;;  %v7087_v37 = vrot.slane %v14120_v50, 5  ;;  %v7239_v57 = vrot.slane %v14120_v50, 6  ;;  %v6327_v4 = vsel %vm1277_vm2, %v14120_v50, %v6326_v28 }
 0x768   : > { %v14133_v5 = vpop.f32.mrb[50].mxu0  ;;  %v6175_v6 = vsel %vm1277_vm2, %v6174_v1, %v14103_v58  ;;  %v6480_v7 = vsel %vm1277_vm2, %v6479_v2, %v6478_v29  ;;  %v6632_v32 = vsel %vm1277_vm2, %v6631_v3, %v6630_v30  ;;  %v6784_v33 = vsel %vm1277_vm2, %v6783_v0, %v6782_v31 }
 0x769   : > { %v6176_v12 = vrot.slane %v14133_v5, 6  ;;  %v6328_v35 = vrot.slane %v14133_v5, 7  ;;  %v6633_v41 = vrot.slane %v14133_v5, 1  ;;  %v6785_v51 = vrot.slane %v14133_v5, 2  ;;  %v12112_v9 = vpop.f32.mrb[51].mxu0 }
 0x76a   : > { %v6937_v56 = vrot.slane %v14133_v5, 3  ;;  %v7089_v14 = vrot.slane %v14133_v5, 4  ;;  %v7241_v27 = vrot.slane %v14133_v5, 5  ;;  %v14147_v15 = vpop.f32.mrb[50].mxu1  ;;  %v6481_v46 = vsel %vm1280_vm3, %v14133_v5, %v6480_v7 }
 0x76b   : > { %v12119_v18 = vpop.f32.mrb[51].mxu1  ;;  %v6177_v19 = vsel %vm1280_vm3, %v6176_v12, %v6175_v6  ;;  %v6178_v20 = vrot.slane %v14147_v15, 5  ;;  %v6329_v43 = vsel %vm1280_vm3, %v6328_v35, %v6327_v4  ;;  %v6330_v44 = vrot.slane %v14147_v15, 6 }
 0x76c   : > { %v14155_v42 = vpop.f32.mrb[52].mxu0  ;;  %v6482_v47 = vrot.slane %v14147_v15, 7  ;;  %v6634_v28 = vsel %vm1280_vm3, %v6633_v41, %v6632_v32  ;;  %v6786_v29 = vsel %vm1280_vm3, %v6785_v51, %v6784_v33  ;;  %v6787_v30 = vrot.slane %v14147_v15, 1 }
 0x76d   : > { %v12126_v31 = vpop.f32.mrb[53].mxu0  ;;  %v6179_v39 = vsel %vm1283_vm4, %v6178_v20, %v6177_v19  ;;  %v6180_v1 = vrot.slane %v14155_v42, 4  ;;  %v6331_v2 = vsel %vm1283_vm4, %v6330_v44, %v6329_v43  ;;  %v6332_v3 = vrot.slane %v14155_v42, 5 }
 0x76e   : > { %v14165_v0 = vpop.f32.mrb[52].mxu1  ;;  %v6483_v13 = vsel %vm1283_vm4, %v6482_v47, %v6481_v46  ;;  %v6484_v4 = vrot.slane %v14155_v42, 6  ;;  %v6635_v6 = vsel %vm1283_vm4, %v14147_v15, %v6634_v28  ;;  %v6636_v7 = vrot.slane %v14155_v42, 7 }
 0x76f   : > { %v12133_v32 = vpop.f32.mrb[53].mxu1  ;;  %v6181_v33 = vsel %vm1286_vm5, %v6180_v1, %v6179_v39  ;;  %v6182_v12 = vrot.slane %v14165_v0, 3  ;;  %v6333_v35 = vsel %vm1286_vm5, %v6332_v3, %v6331_v2  ;;  %v6334_v41 = vrot.slane %v14165_v0, 4 }
 0x770   : > { %v14176_v51 = vpop.f32.mrb[54].mxu0  ;;  %v6485_v9 = vsel %vm1286_vm5, %v6484_v4, %v6483_v13  ;;  %v6486_v46 = vrot.slane %v14165_v0, 5  ;;  %v6637_v18 = vsel %vm1286_vm5, %v6636_v7, %v6635_v6  ;;  %v6638_v19 = vrot.slane %v14165_v0, 6 }
 0x771   : > { %v12140_v20 = vpop.f32.mrb[55].mxu0  ;;  %v6183_v43 = vsel %vm1289_vm6, %v6182_v12, %v6181_v33  ;;  %v6184_v44 = vrot.slane %v14176_v51, 2  ;;  %v6335_v47 = vsel %vm1289_vm6, %v6334_v41, %v6333_v35  ;;  %v6336_v28 = vrot.slane %v14176_v51, 3 }
 0x772   : > { %v14186_v31 = vpop.f32.mrb[54].mxu1  ;;  %v6487_v39 = vsel %vm1289_vm6, %v6486_v46, %v6485_v9  ;;  %v6488_v1 = vrot.slane %v14176_v51, 4  ;;  %v6639_v2 = vsel %vm1289_vm6, %v6638_v19, %v6637_v18  ;;  %v6640_v3 = vrot.slane %v14176_v51, 5 }
 0x773   : > { %v12147_v13 = vpop.f32.mrb[55].mxu1  ;;  %v6185_v4 = vsel %vm1292_vm7, %v6184_v44, %v6183_v43  ;;  %v6186_v6 = vrot.slane %v14186_v31, 1  ;;  %v6337_v7 = vsel %vm1292_vm7, %v6336_v28, %v6335_v47  ;;  %v6338_v32 = vrot.slane %v14186_v31, 2 }
 0x774   : > { %v6489_v33 = vsel %vm1292_vm7, %v6488_v1, %v6487_v39  ;;  %v6490_v12 = vrot.slane %v14186_v31, 3  ;;  %v6641_v35 = vsel %vm1292_vm7, %v6640_v3, %v6639_v2  ;;  %v6642_v41 = vrot.slane %v14186_v31, 4  ;;  %v5592_v13 = vld [vmem:[#allocation4 + $0x290] sm:$0xff] }
 0x775   : > { %v6187_v9 = vsel %vm1295_vm8, %v6186_v6, %v6185_v4  ;;  %v6339_v46 = vsel %vm1295_vm8, %v6338_v32, %v6337_v7  ;;  %v6788_v18 = vsel %vm1283_vm4, %v6787_v30, %v6786_v29  ;;  %v6790_v19 = vrot.slane %v14165_v0, 7 }
 0x776   : > { %12157 = vmatmul.mubr.msk.f32.vlgmr.msra.gmra.mrb[56].mxu0 %vm1297_vm9, %v6187_v9  ;;  %12168 = vmatmul.mubr.msk.f32.vlgmr.msra.gmra.mrb[56].mxu1 %vm1297_vm9, %v6339_v46  ;;  %v6491_v20 = vsel %vm1295_vm8, %v6490_v12, %v6489_v33  ;;  %v6643_v43 = vsel %vm1295_vm8, %v6642_v41, %v6641_v35  ;;  %v6789_v44 = vsel %vm1286_vm5, %v14155_v42, %v6788_v18  ;;  %v6792_v47 = vrot.slane %v14176_v51, 6  ;;  %v5599_v12 = vld [vmem:[#allocation4 + $0x2c8] sm:$0xff]  ;;  %v5602_v35 = vld [vmem:[#allocation4 + $0x2e0] sm:$0xff]  ;;  %v5601_v9 = vld [vmem:[#allocation4 + $0x2d8] sm:$0xff] }
 0x777   : > { %12706 = vmatpush3.bf16.msra.mxu0 %v12705_v54  ;;  %12712 = vmatpush3.bf16.msra.mxu1 %v12711_v49  ;;  %v6791_v29 = vsel %vm1289_vm6, %v6790_v19, %v6789_v44  ;;  %v6794_v30 = vrot.slane %v14186_v31, 5  ;;  %v6936_v28 = vsel %vm1277_vm2, %v6935_v60, %v6934_v40  ;;  %v6939_v39 = vrot.slane %v14147_v15, 2  ;;  %v5603_v41 = vld [vmem:[#allocation4 + $0x2e8] sm:$0xff]  ;;  %v5604_v46 = vld [vmem:[#allocation4 + $0x2f0] sm:$0xff]  ;;  %v5605_v18 = vld [vmem:[#allocation4 + $0x2f8] sm:$0xff] }
 0x778   : > { %12707 = vmatprep.subr.bf16.mxu0 %v13046_v8  ;;  %12713 = vmatprep.subr.bf16.mxu1 %v13046_v8  ;;  %v6793_v23 = vsel %vm1292_vm7, %v6792_v47, %v6791_v29  ;;  %v6938_v24 = vsel %vm1280_vm3, %v6937_v56, %v6936_v28  ;;  %v6941_v45 = vrot.slane %v14155_v42, 1  ;;  %v6944_v25 = vrot.slane %v14176_v51, 7 }
 0x779   : > { %12178 = vmatprep.mubr.msk.f32.mxu0 %vm13047_vm0, %v15205_v16  ;;  %12189 = vmatprep.mubr.msk.f32.mxu1 %vm13047_vm0, %v15205_v16  ;;  %v6795_v54 = vsel %vm1295_vm8, %v6794_v30, %v6793_v23  ;;  %v6940_v49 = vsel %vm1283_vm4, %v6939_v39, %v6938_v24  ;;  %v6946_v40 = vrot.slane %v14186_v31, 6  ;;  %v7088_v60 = vsel %vm1277_vm2, %v7087_v37, %v7086_v36  ;;  %v5593_v36 = vld [vmem:[#allocation4 + $0x298] sm:$0xff] }
 0x77a   : > { %v6942_v56 = vsel %vm1286_vm5, %v6941_v45, %v6940_v49  ;;  %v7090_v1 = vsel %vm1280_vm3, %v7089_v14, %v7088_v60  ;;  %v7091_v2 = vrot.slane %v14147_v15, 3  ;;  %v7093_v3 = vrot.slane %v14155_v42, 2 }
 0x77b   : > { %12709 = vmatpush3.bf16.msra.mxu0 %v12708_v61  ;;  %12715 = vmatpush3.bf16.msra.mxu1 %v12714_v63  ;;  %v6943_v37 = vsel %vm1289_vm6, %v14165_v0, %v6942_v56  ;;  %v7095_v4 = vrot.slane %v14165_v0, 1  ;;  %v7098_v14 = vrot.slane %v14186_v31, 7  ;;  %v7240_v34 = vsel %vm1277_vm2, %v7239_v57, %v7238_v52 }
 0x77c   : > { %12716 = vmatprep.subr.bf16.mxu0 %v13046_v8  ;;  %12722 = vmatprep.subr.bf16.mxu1 %v13046_v8  ;;  %v6945_v59 = vsel %vm1292_vm7, %v6944_v25, %v6943_v37  ;;  %v7092_v61 = vsel %vm1283_vm4, %v7091_v2, %v7090_v1  ;;  %v7242_v63 = vsel %vm1280_vm3, %v7241_v27, %v7240_v34  ;;  %v7243_v58 = vrot.slane %v14147_v15, 4 }
 0x77d   : > { %v6947_v50 = vsel %vm1295_vm8, %v6946_v40, %v6945_v59  ;;  %v7094_v52 = vsel %vm1286_vm5, %v7093_v3, %v7092_v61  ;;  %v7245_v57 = vrot.slane %v14155_v42, 3  ;;  %v7247_v6 = vrot.slane %v14165_v0, 2  ;;  %v5598_v42 = vld [vmem:[#allocation4 + $0x2c0] sm:$0xff] }
 0x77e   : > { %12179 = vmatmul.mubr.msk.f32.vlgmr.msra.gmra.mrb[58].mxu0 %vm1297_vm9, %v6491_v20  ;;  %12190 = vmatmul.mubr.msk.f32.vlgmr.msra.gmra.mrb[58].mxu1 %vm1297_vm9, %v6643_v43  ;;  %v12720_v7 = vpack.c.bf16 %v5593_v36, %v5592_v13  ;;  %v7096_v32 = vsel %vm1289_vm6, %v7095_v4, %v7094_v52  ;;  %v7244_v5 = vsel %vm1283_vm4, %v7243_v58, %v7242_v63  ;;  %v7249_v27 = vrot.slane %v14176_v51, 1  ;;  %v14318_v20 = vld [vmem:[%s15176_s4] sm:$0xff] }
 0x77f   : > { %12718 = vmatpush3.bf16.msra.mxu0 %v12717_v11  ;;  %12724 = vmatpush3.bf16.msra.mxu1 %v12723_v62  ;;  %v12726_v15 = vpack.c.bf16 %v5597_v48, %v5596_v38  ;;  %v7097_v0 = vsel %vm1292_vm7, %v14176_v51, %v7096_v32  ;;  %v7246_v33 = vsel %vm1286_vm5, %v7245_v57, %v7244_v5  ;;  %v5600_v51 = vld [vmem:[#allocation4 + $0x2d0] sm:$0xff] }
 0x780   : > { %12719 = vmatprep.subr.bf16.mxu0 %v13046_v8  ;;  %12725 = vmatprep.subr.bf16.mxu1 %v13046_v8  ;;  %v7099_v10 = vsel %vm1295_vm8, %v7098_v14, %v7097_v0  ;;  %v7248_v53 = vsel %vm1289_vm6, %v7247_v6, %v7246_v33  ;;  %v12729_v11 = vpack.c.bf16 %v5599_v12, %v5598_v42 }
 0x781   : > { %12200 = vmatprep.mubr.msk.f32.mxu0 %vm13047_vm0, %v15205_v16  ;;  %12211 = vmatprep.mubr.msk.f32.mxu1 %vm13047_vm0, %v15205_v16  ;;  %v7250_v17 = vsel %vm1292_vm7, %v7249_v27, %v7248_v53  ;;  %v12735_v62 = vpack.c.bf16 %v5603_v41, %v5602_v35  ;;  %v12732_v19 = vpack.c.bf16 %v5601_v9, %v5600_v51 }
 0x782   : > { %v7251_v55 = vsel %vm1295_vm8, %v14186_v31, %v7250_v17  ;;  %v12738_v31 = vpack.c.bf16 %v5605_v18, %v5604_v46 }
 0x783   : > { %12721 = vmatpush3.bf16.msra.mxu0 %v12720_v7  ;;  %12727 = vmatpush3.bf16.msra.mxu1 %v12726_v15 }
 0x784   : > { %12728 = vmatprep.subr.bf16.mxu0 %v13046_v8  ;;  %12734 = vmatprep.subr.bf16.mxu1 %v13046_v8 }
 0x786   : > { %12201 = vmatmul.mubr.msk.f32.vlgmr.msra.gmra.mrb[60].mxu0 %vm1297_vm9, %v6795_v54  ;;  %12212 = vmatmul.mubr.msk.f32.vlgmr.msra.gmra.mrb[60].mxu1 %vm1297_vm9, %v6947_v50 }
 0x787   : > { %12730 = vmatpush3.bf16.msra.mxu0 %v12729_v11  ;;  %12736 = vmatpush3.bf16.msra.mxu1 %v12735_v62 }
 0x788   : > { %12731 = vmatprep.subr.bf16.mxu0 %v13046_v8  ;;  %12737 = vmatprep.subr.bf16.mxu1 %v13046_v8 }
 0x789   : > { %12222 = vmatprep.mubr.msk.f32.mxu0 %vm13047_vm0, %v15205_v16  ;;  %12233 = vmatprep.mubr.msk.f32.mxu1 %vm13047_vm0, %v15205_v16 }
 0x78b   : > { %12733 = vmatpush3.bf16.msra.mxu0 %v12732_v19  ;;  %12739 = vmatpush3.bf16.msra.mxu1 %v12738_v31 }
 0x78e   : > { %12223 = vmatmul.mubr.msk.f32.vlgmr.msra.gmra.mrb[62].mxu0 %vm1297_vm9, %v7099_v10  ;;  %12234 = vmatmul.mubr.msk.f32.vlgmr.msra.gmra.mrb[62].mxu1 %vm1297_vm9, %v7251_v55 }
 0x78f   : > { %12238 = vmatprep.mubr.msk.f32.mxu0 %vm2509_vm10, %v14318_v20  ;;  %12243 = vmatprep.mubr.msk.f32.mxu1 %vm2509_vm10, %v14318_v20 }
 0x849   : > { %v6256_v43 = vpop.f32.mrb[56].mxu0  ;;  %v6408_v44 = vpop.f32.mrb[56].mxu1 }
 0x84a   : > { %v6261_v47 = vcombine.high %v6256_v43, %v6256_v43  ;;  %v6268_v29 = vrot.slane %v6256_v43, %v13468_v26  ;;  %v6413_v30 = vcombine.high %v6408_v44, %v6408_v44  ;;  %v6420_v28 = vrot.slane %v6408_v44, %v13468_v26  ;;  %v12158_v39 = vpop.f32.mrb[57].mxu0  ;;  %v12169_v23 = vpop.f32.mrb[57].mxu1 }
 0x84c   : > { %v6275_v24 = vrot.slane %v6261_v47, %v13468_v26  ;;  %v6276_v45 = vcombine.high %v6268_v29, %v6268_v29  ;;  %v6284_v25 = vrot.slane %v6268_v29, %v13468_v26  ;;  %v6427_v54 = vrot.slane %v6413_v30, %v13468_v26 }
 0x84d   : > { %v6428_v49 = vcombine.high %v6420_v28, %v6420_v28  ;;  %v6436_v40 = vrot.slane %v6420_v28, %v13468_v26 }
 0x84e   : > { %v6277_v60 = vcombine.high %v6275_v24, %v6275_v24  ;;  %v6291_v56 = vrot.slane %v6275_v24, %v13468_v26  ;;  %v6298_v1 = vrot.slane %v6276_v45, %v13468_v26  ;;  %v6306_v2 = vcombine.high %v6284_v25, %v6284_v25  ;;  %6318 = vst.msk [vmem:[#allocation2] sm:$0x1] %vm1428_vm11, %v6284_v25 }
 0x84f   : > { %v6429_v3 = vcombine.high %v6427_v54, %v6427_v54  ;;  %v6443_v13 = vrot.slane %v6427_v54, %v13468_v26  ;;  %v6450_v36 = vrot.slane %v6428_v49, %v13468_v26  ;;  %v6458_v37 = vcombine.high %v6436_v40, %v6436_v40  ;;  %6470 = vst.msk [vmem:[#allocation2 + $0x1] sm:$0x1] %vm1428_vm11, %v6436_v40 }
 0x850   : > { %v6305_v4 = vrot.slane %v6277_v60, %v13468_v26  ;;  %v6307_v14 = vcombine.high %v6291_v56, %v6291_v56  ;;  %v6308_v34 = vcombine.high %v6298_v1, %v6298_v1  ;;  %6319 = vst.msk [vmem:[#allocation2 + $0x8] sm:$0x1] %vm1428_vm11, %v6298_v1  ;;  %6320 = vst.msk [vmem:[#allocation2 + $0x10] sm:$0x1] %vm1428_vm11, %v6306_v2 }
 0x851   : > { %6322 = vst.msk [vmem:[#allocation2 + $0x20] sm:$0x1] %vm1428_vm11, %v6291_v56  ;;  %v6457_v38 = vrot.slane %v6429_v3, %v13468_v26  ;;  %v6459_v48 = vcombine.high %v6443_v13, %v6443_v13  ;;  %v6460_v59 = vcombine.high %v6450_v36, %v6450_v36  ;;  %6471 = vst.msk [vmem:[#allocation2 + $0x9] sm:$0x1] %vm1428_vm11, %v6450_v36  ;;  %v6560_v61 = vpop.f32.mrb[58].mxu0  ;;  %v6712_v63 = vpop.f32.mrb[58].mxu1 }
 0x852   : > { %6472 = vst.msk [vmem:[#allocation2 + $0x11] sm:$0x1] %vm1428_vm11, %v6458_v37  ;;  %6474 = vst.msk [vmem:[#allocation2 + $0x21] sm:$0x1] %vm1428_vm11, %v6443_v13  ;;  %v6309_v58 = vcombine.high %v6305_v4, %v6305_v4  ;;  %v6565_v50 = vcombine.high %v6560_v61, %v6560_v61  ;;  %v6572_v52 = vrot.slane %v6560_v61, %v13468_v26  ;;  %v12180_v6 = vpop.f32.mrb[59].mxu0  ;;  %v12191_v7 = vpop.f32.mrb[59].mxu1 }
 0x853   : > { %6321 = vst.msk [vmem:[#allocation2 + $0x18] sm:$0x1] %vm1428_vm11, %v6308_v34  ;;  %6323 = vst.msk [vmem:[#allocation2 + $0x28] sm:$0x1] %vm1428_vm11, %v6305_v4  ;;  %v6717_v57 = vcombine.high %v6712_v63, %v6712_v63  ;;  %v6461_v32 = vcombine.high %v6457_v38, %v6457_v38  ;;  %v6724_v5 = vrot.slane %v6712_v63, %v13468_v26 }
 0x854   : > { %6324 = vst.msk [vmem:[#allocation2 + $0x30] sm:$0x1] %vm1428_vm11, %v6307_v14  ;;  %6473 = vst.msk [vmem:[#allocation2 + $0x19] sm:$0x1] %vm1428_vm11, %v6460_v59  ;;  %v6579_v27 = vrot.slane %v6565_v50, %v13468_v26  ;;  %v6580_v15 = vcombine.high %v6572_v52, %v6572_v52  ;;  %v6588_v42 = vrot.slane %v6572_v52, %v13468_v26 }
 0x855   : > { %6475 = vst.msk [vmem:[#allocation2 + $0x29] sm:$0x1] %vm1428_vm11, %v6457_v38  ;;  %6476 = vst.msk [vmem:[#allocation2 + $0x31] sm:$0x1] %vm1428_vm11, %v6459_v48  ;;  %v6731_v0 = vrot.slane %v6717_v57, %v13468_v26  ;;  %v6732_v33 = vcombine.high %v6724_v5, %v6724_v5  ;;  %v6740_v12 = vrot.slane %v6724_v5, %v13468_v26 }
 0x856   : > { %6325 = vst.msk [vmem:[#allocation2 + $0x38] sm:$0x1] %vm1428_vm11, %v6309_v58  ;;  %6477 = vst.msk [vmem:[#allocation2 + $0x39] sm:$0x1] %vm1428_vm11, %v6461_v32  ;;  %v6581_v35 = vcombine.high %v6579_v27, %v6579_v27  ;;  %v6595_v41 = vrot.slane %v6579_v27, %v13468_v26  ;;  %v6602_v10 = vrot.slane %v6580_v15, %v13468_v26 }
 0x857   : > { %v6610_v53 = vcombine.high %v6588_v42, %v6588_v42  ;;  %6622 = vst.msk [vmem:[#allocation2 + $0x2] sm:$0x1] %vm1428_vm11, %v6588_v42  ;;  %v6733_v17 = vcombine.high %v6731_v0, %v6731_v0  ;;  %v6747_v55 = vrot.slane %v6731_v0, %v13468_v26  ;;  %v6754_v11 = vrot.slane %v6732_v33, %v13468_v26 }
 0x858   : > { %v6762_v62 = vcombine.high %v6740_v12, %v6740_v12  ;;  %6774 = vst.msk [vmem:[#allocation2 + $0x3] sm:$0x1] %vm1428_vm11, %v6740_v12  ;;  %v6609_v51 = vrot.slane %v6581_v35, %v13468_v26  ;;  %v6611_v9 = vcombine.high %v6595_v41, %v6595_v41  ;;  %v6612_v46 = vcombine.high %v6602_v10, %v6602_v10 }
 0x859   : > { %6623 = vst.msk [vmem:[#allocation2 + $0xa] sm:$0x1] %vm1428_vm11, %v6602_v10  ;;  %6624 = vst.msk [vmem:[#allocation2 + $0x12] sm:$0x1] %vm1428_vm11, %v6610_v53  ;;  %v6761_v18 = vrot.slane %v6733_v17, %v13468_v26  ;;  %v6763_v19 = vcombine.high %v6747_v55, %v6747_v55  ;;  %v6764_v31 = vcombine.high %v6754_v11, %v6754_v11  ;;  %v6864_v43 = vpop.f32.mrb[60].mxu0  ;;  %v7016_v44 = vpop.f32.mrb[60].mxu1 }
 0x85a   : > { %6626 = vst.msk [vmem:[#allocation2 + $0x22] sm:$0x1] %vm1428_vm11, %v6595_v41  ;;  %6775 = vst.msk [vmem:[#allocation2 + $0xb] sm:$0x1] %vm1428_vm11, %v6754_v11  ;;  %v6613_v47 = vcombine.high %v6609_v51, %v6609_v51  ;;  %v6869_v29 = vcombine.high %v6864_v43, %v6864_v43  ;;  %v6876_v30 = vrot.slane %v6864_v43, %v13468_v26  ;;  %v12202_v39 = vpop.f32.mrb[61].mxu0  ;;  %v12213_v23 = vpop.f32.mrb[61].mxu1 }
 0x85b   : > { %6776 = vst.msk [vmem:[#allocation2 + $0x13] sm:$0x1] %vm1428_vm11, %v6762_v62  ;;  %6778 = vst.msk [vmem:[#allocation2 + $0x23] sm:$0x1] %vm1428_vm11, %v6747_v55  ;;  %v7021_v28 = vcombine.high %v7016_v44, %v7016_v44  ;;  %v6765_v24 = vcombine.high %v6761_v18, %v6761_v18  ;;  %v7028_v45 = vrot.slane %v7016_v44, %v13468_v26  ;;  %v12941_v23 = vld [vmem:[%s15176_s4 + $0x8] sm:$0xff] }
 0x85c   : > { %6625 = vst.msk [vmem:[#allocation2 + $0x1a] sm:$0x1] %vm1428_vm11, %v6612_v46  ;;  %6627 = vst.msk [vmem:[#allocation2 + $0x2a] sm:$0x1] %vm1428_vm11, %v6609_v51  ;;  %v6883_v25 = vrot.slane %v6869_v29, %v13468_v26  ;;  %v6884_v54 = vcombine.high %v6876_v30, %v6876_v30  ;;  %v6892_v49 = vrot.slane %v6876_v30, %v13468_v26 }
 0x85d   : > { %6628 = vst.msk [vmem:[#allocation2 + $0x32] sm:$0x1] %vm1428_vm11, %v6611_v9  ;;  %6777 = vst.msk [vmem:[#allocation2 + $0x1b] sm:$0x1] %vm1428_vm11, %v6764_v31  ;;  %v7035_v40 = vrot.slane %v7021_v28, %v13468_v26  ;;  %v7036_v60 = vcombine.high %v7028_v45, %v7028_v45  ;;  %v7044_v56 = vrot.slane %v7028_v45, %v13468_v26 }
 0x85e   : > { %6779 = vst.msk [vmem:[#allocation2 + $0x2b] sm:$0x1] %vm1428_vm11, %v6761_v18  ;;  %6780 = vst.msk [vmem:[#allocation2 + $0x33] sm:$0x1] %vm1428_vm11, %v6763_v19  ;;  %v6885_v1 = vcombine.high %v6883_v25, %v6883_v25  ;;  %v6899_v2 = vrot.slane %v6883_v25, %v13468_v26  ;;  %v6906_v3 = vrot.slane %v6884_v54, %v13468_v26 }
 0x85f   : > { %6629 = vst.msk [vmem:[#allocation2 + $0x3a] sm:$0x1] %vm1428_vm11, %v6613_v47  ;;  %6781 = vst.msk [vmem:[#allocation2 + $0x3b] sm:$0x1] %vm1428_vm11, %v6765_v24  ;;  %v6914_v13 = vcombine.high %v6892_v49, %v6892_v49  ;;  %v7037_v36 = vcombine.high %v7035_v40, %v7035_v40  ;;  %v7051_v37 = vrot.slane %v7035_v40, %v13468_v26 }
 0x860   : > { %6926 = vst.msk [vmem:[#allocation2 + $0x4] sm:$0x1] %vm1428_vm11, %v6892_v49  ;;  %v7058_v4 = vrot.slane %v7036_v60, %v13468_v26  ;;  %v7066_v14 = vcombine.high %v7044_v56, %v7044_v56  ;;  %7078 = vst.msk [vmem:[#allocation2 + $0x5] sm:$0x1] %vm1428_vm11, %v7044_v56  ;;  %v6913_v34 = vrot.slane %v6885_v1, %v13468_v26 }
 0x861   : > { %v6915_v38 = vcombine.high %v6899_v2, %v6899_v2  ;;  %v6916_v48 = vcombine.high %v6906_v3, %v6906_v3  ;;  %6927 = vst.msk [vmem:[#allocation2 + $0xc] sm:$0x1] %vm1428_vm11, %v6906_v3  ;;  %6928 = vst.msk [vmem:[#allocation2 + $0x14] sm:$0x1] %vm1428_vm11, %v6914_v13  ;;  %v7065_v59 = vrot.slane %v7037_v36, %v13468_v26  ;;  %v7168_v58 = vpop.f32.mrb[62].mxu0  ;;  %v7320_v50 = vpop.f32.mrb[62].mxu1 }
 0x862   : > { %6930 = vst.msk [vmem:[#allocation2 + $0x24] sm:$0x1] %vm1428_vm11, %v6899_v2  ;;  %v7067_v61 = vcombine.high %v7051_v37, %v7051_v37  ;;  %v7068_v63 = vcombine.high %v7058_v4, %v7058_v4  ;;  %7079 = vst.msk [vmem:[#allocation2 + $0xd] sm:$0x1] %vm1428_vm11, %v7058_v4  ;;  %v6917_v52 = vcombine.high %v6913_v34, %v6913_v34  ;;  %v12224_v32 = vpop.f32.mrb[63].mxu0  ;;  %v12235_v5 = vpop.f32.mrb[63].mxu1 }
 0x863   : > { %7080 = vst.msk [vmem:[#allocation2 + $0x15] sm:$0x1] %vm1428_vm11, %v7066_v14  ;;  %7082 = vst.msk [vmem:[#allocation2 + $0x25] sm:$0x1] %vm1428_vm11, %v7051_v37  ;;  %v7173_v57 = vcombine.high %v7168_v58, %v7168_v58  ;;  %v7180_v6 = vrot.slane %v7168_v58, %v13468_v26  ;;  %v7325_v7 = vcombine.high %v7320_v50, %v7320_v50 }
 0x864   : > { %6929 = vst.msk [vmem:[#allocation2 + $0x1c] sm:$0x1] %vm1428_vm11, %v6916_v48  ;;  %6931 = vst.msk [vmem:[#allocation2 + $0x2c] sm:$0x1] %vm1428_vm11, %v6913_v34  ;;  %v7069_v27 = vcombine.high %v7065_v59, %v7065_v59  ;;  %v7332_v15 = vrot.slane %v7320_v50, %v13468_v26 }
 0x865   : > { %6932 = vst.msk [vmem:[#allocation2 + $0x34] sm:$0x1] %vm1428_vm11, %v6915_v38  ;;  %7081 = vst.msk [vmem:[#allocation2 + $0x1d] sm:$0x1] %vm1428_vm11, %v7068_v63  ;;  %v7187_v42 = vrot.slane %v7173_v57, %v13468_v26  ;;  %v7188_v0 = vcombine.high %v7180_v6, %v7180_v6  ;;  %v7196_v33 = vrot.slane %v7180_v6, %v13468_v26 }
 0x866   : > { %7083 = vst.msk [vmem:[#allocation2 + $0x2d] sm:$0x1] %vm1428_vm11, %v7065_v59  ;;  %7084 = vst.msk [vmem:[#allocation2 + $0x35] sm:$0x1] %vm1428_vm11, %v7067_v61  ;;  %v7339_v12 = vrot.slane %v7325_v7, %v13468_v26  ;;  %v7340_v35 = vcombine.high %v7332_v15, %v7332_v15  ;;  %v7348_v41 = vrot.slane %v7332_v15, %v13468_v26 }
 0x867   : > { %6933 = vst.msk [vmem:[#allocation2 + $0x3c] sm:$0x1] %vm1428_vm11, %v6917_v52  ;;  %7085 = vst.msk [vmem:[#allocation2 + $0x3d] sm:$0x1] %vm1428_vm11, %v7069_v27  ;;  %v7189_v10 = vcombine.high %v7187_v42, %v7187_v42  ;;  %v7203_v53 = vrot.slane %v7187_v42, %v13468_v26  ;;  %v7210_v17 = vrot.slane %v7188_v0, %v13468_v26  ;;  %v12942_v52 = vld [vmem:[%s15175_s3] sm:$0xff] }
 0x868   : > { %v7218_v55 = vcombine.high %v7196_v33, %v7196_v33  ;;  %7230 = vst.msk [vmem:[#allocation2 + $0x6] sm:$0x1] %vm1428_vm11, %v7196_v33  ;;  %v7341_v11 = vcombine.high %v7339_v12, %v7339_v12  ;;  %v7355_v62 = vrot.slane %v7339_v12, %v13468_v26  ;;  %v7362_v51 = vrot.slane %v7340_v35, %v13468_v26 }
 0x869   : > { %v7370_v9 = vcombine.high %v7348_v41, %v7348_v41  ;;  %7382 = vst.msk [vmem:[#allocation2 + $0x7] sm:$0x1] %vm1428_vm11, %v7348_v41  ;;  %v7217_v46 = vrot.slane %v7189_v10, %v13468_v26  ;;  %v7219_v18 = vcombine.high %v7203_v53, %v7203_v53  ;;  %v7220_v19 = vcombine.high %v7210_v17, %v7210_v17 }
 0x86a   : > { %7231 = vst.msk [vmem:[#allocation2 + $0xe] sm:$0x1] %vm1428_vm11, %v7210_v17  ;;  %7232 = vst.msk [vmem:[#allocation2 + $0x16] sm:$0x1] %vm1428_vm11, %v7218_v55  ;;  %v7369_v31 = vrot.slane %v7341_v11, %v13468_v26  ;;  %v7371_v43 = vcombine.high %v7355_v62, %v7355_v62  ;;  %v7372_v44 = vcombine.high %v7362_v51, %v7362_v51 }
 0x86b   : > { %7234 = vst.msk [vmem:[#allocation2 + $0x26] sm:$0x1] %vm1428_vm11, %v7203_v53  ;;  %7383 = vst.msk [vmem:[#allocation2 + $0xf] sm:$0x1] %vm1428_vm11, %v7362_v51  ;;  %v7221_v47 = vcombine.high %v7217_v46, %v7217_v46 }
 0x86c   : > { %7384 = vst.msk [vmem:[#allocation2 + $0x17] sm:$0x1] %vm1428_vm11, %v7370_v9  ;;  %7386 = vst.msk [vmem:[#allocation2 + $0x27] sm:$0x1] %vm1428_vm11, %v7355_v62  ;;  %v7373_v29 = vcombine.high %v7369_v31, %v7369_v31  ;;  %v8015_v9 = vld [vmem:[#allocation4 + $0x300] sm:$0xff] }
 0x86d   : > { %7233 = vst.msk [vmem:[#allocation2 + $0x1e] sm:$0x1] %vm1428_vm11, %v7220_v19  ;;  %7235 = vst.msk [vmem:[#allocation2 + $0x2e] sm:$0x1] %vm1428_vm11, %v7217_v46  ;;  %v8016_v46 = vld [vmem:[#allocation4 + $0x308] sm:$0xff] }
 0x86e   : > { %7236 = vst.msk [vmem:[#allocation2 + $0x36] sm:$0x1] %vm1428_vm11, %v7219_v18  ;;  %7385 = vst.msk [vmem:[#allocation2 + $0x1f] sm:$0x1] %vm1428_vm11, %v7372_v44  ;;  %v8019_v18 = vld [vmem:[#allocation4 + $0x320] sm:$0xff]  ;;  %v12765_v19 = vpack.c.bf16 %v8016_v46, %v8015_v9  ;;  %v8017_v44 = vld [vmem:[#allocation4 + $0x310] sm:$0xff] }
 0x86f   : > { %7387 = vst.msk [vmem:[#allocation2 + $0x2f] sm:$0x1] %vm1428_vm11, %v7369_v31  ;;  %7388 = vst.msk [vmem:[#allocation2 + $0x37] sm:$0x1] %vm1428_vm11, %v7371_v43  ;;  %v8020_v31 = vld [vmem:[#allocation4 + $0x328] sm:$0xff] }
 0x870   : > { %7237 = vst.msk [vmem:[#allocation2 + $0x3e] sm:$0x1] %vm1428_vm11, %v7221_v47  ;;  %7389 = vst.msk [vmem:[#allocation2 + $0x3f] sm:$0x1] %vm1428_vm11, %v7373_v29  ;;  %v7390_v30 = vld [vmem:[#allocation2] sm:$0xff]  ;;  %v12771_v43 = vpack.c.bf16 %v8020_v31, %v8019_v18  ;;  %v8021_v29 = vld [vmem:[#allocation4 + $0x330] sm:$0xff] }
 0x871   : > { %12236 = vmatprep.subr.mxu0 %v7390_v30  ;;  %v8018_v47 = vld [vmem:[#allocation4 + $0x318] sm:$0xff] }
 0x872   : > { %12237 = vmatpush3.msra.mxu0 %v7390_v30  ;;  %v7391_v28 = vld [vmem:[#allocation2 + $0x8] sm:$0xff]  ;;  %v12768_v30 = vpack.c.bf16 %v8018_v47, %v8017_v44 }
 0x873   : > { %v7392_v39 = vld [vmem:[#allocation2 + $0x10] sm:$0xff]  ;;  %12239 = vmatmul.mubr.msk.f32.vlgmr.msra.gmra.mrb[64].mxu0 %vm2509_vm10, %v12941_v23  ;;  %12241 = vmatprep.subr.mxu1 %v7391_v28  ;;  %v7394_v45 = vld [vmem:[#allocation2 + $0x20] sm:$0xff] }
 0x874   : > { %12246 = vmatprep.subr.mxu0 %v7392_v39  ;;  %12242 = vmatpush3.msra.mxu1 %v7391_v28  ;;  %v8022_v28 = vld [vmem:[#allocation4 + $0x338] sm:$0xff] }
 0x875   : > { %v7393_v24 = vld [vmem:[#allocation2 + $0x18] sm:$0xff]  ;;  %12247 = vmatpush3.msra.mxu0 %v7392_v39  ;;  %12244 = vmatmul.mubr.msk.f32.vlgmr.msra.gmra.mrb[64].mxu1 %vm2509_vm10, %v12941_v23  ;;  %v12774_v39 = vpack.c.bf16 %v8022_v28, %v8021_v29 }
 0x876   : > { %12251 = vmatprep.subr.mxu1 %v7393_v24  ;;  %12256 = vmatprep.subr.mxu0 %v7394_v45  ;;  %v7395_v25 = vld [vmem:[#allocation2 + $0x28] sm:$0xff]  ;;  %v7396_v54 = vld [vmem:[#allocation2 + $0x30] sm:$0xff] }
 0x877   : > { %12248 = vmatprep.mubr.msk.f32.mxu0 %vm2509_vm10, %v14318_v20  ;;  %12252 = vmatpush3.msra.mxu1 %v7393_v24  ;;  %v7397_v49 = vld [vmem:[#allocation2 + $0x38] sm:$0xff]  ;;  %v14586_v24 = vld [vmem:[#allocation4 + $0x348] sm:$0xff] }
 0x878   : > { %12249 = vmatmul.mubr.msk.f32.vlgmr.msra.gmra.mrb[66].mxu0 %vm2509_vm10, %v12941_v23  ;;  %12261 = vmatprep.subr.mxu1 %v7395_v25 }
 0x879   : > { %12257 = vmatpush3.msra.mxu0 %v7394_v45  ;;  %12253 = vmatprep.mubr.msk.f32.mxu1 %vm2509_vm10, %v14318_v20  ;;  %v14588_v45 = vld [vmem:[#allocation4 + $0x360] sm:$0xff] }
 0x87a   : > { %12266 = vmatprep.subr.mxu0 %v7396_v54  ;;  %12254 = vmatmul.mubr.msk.f32.vlgmr.msra.gmra.mrb[66].mxu1 %vm2509_vm10, %v12941_v23 }
 0x87b   : > { %12262 = vmatpush3.msra.mxu1 %v7395_v25  ;;  %12258 = vmatprep.mubr.msk.f32.mxu0 %vm2509_vm10, %v14318_v20  ;;  %v14590_v25 = vld [vmem:[#allocation4 + $0x368] sm:$0xff] }
 0x87c   : > { %12271 = vmatprep.subr.mxu1 %v7397_v49  ;;  %12259 = vmatmul.mubr.msk.f32.vlgmr.msra.gmra.mrb[68].mxu0 %vm2509_vm10, %v12941_v23 }
 0x87d   : > { %12267 = vmatpush3.msra.mxu0 %v7396_v54  ;;  %12263 = vmatprep.mubr.msk.f32.mxu1 %vm2509_vm10, %v14318_v20  ;;  %v14592_v54 = vld [vmem:[#allocation4 + $0x350] sm:$0xff] }
 0x87e   : > { %12264 = vmatmul.mubr.msk.f32.vlgmr.msra.gmra.mrb[68].mxu1 %vm2509_vm10, %v12941_v23  ;;  %12268 = vmatprep.mubr.msk.f32.mxu0 %vm2509_vm10, %v14318_v20 }
 0x87f   : > { %12272 = vmatpush3.msra.mxu1 %v7397_v49  ;;  %12273 = vmatprep.mubr.msk.f32.mxu1 %vm2509_vm10, %v14318_v20  ;;  %v14594_v49 = vld [vmem:[#allocation4 + $0x358] sm:$0xff] }
 0x880   : > { %12269 = vmatmul.mubr.msk.f32.vlgmr.msra.gmra.mrb[70].mxu0 %vm2509_vm10, %v12941_v23  ;;  %12740 = vmatprep.subr.bf16.mxu0 %v13046_v8 }
 0x881   : > { %12743 = vmatprep.subr.bf16.mxu1 %v13046_v8  ;;  %12280 = vmatprep.mubr.msk.f32.mxu0 %vm13047_vm0, %v15205_v16 }
 0x882   : > { %12274 = vmatmul.mubr.msk.f32.vlgmr.msra.gmra.mrb[70].mxu1 %vm2509_vm10, %v12941_v23  ;;  %v14584_v23 = vld [vmem:[#allocation4 + $0x340] sm:$0xff] }
 0x883   : > { %12287 = vmatprep.mubr.msk.f32.mxu1 %vm13047_vm0, %v15205_v16 }
 0x946   : > { %v14465_v40 = vpop.f32.mrb[64].mxu0 }
 0x947   : > { %v15203_v60 = vmax.f32 %v14465_v40, 0.0  ;;  %v14468_v56 = vpop.f32.mrb[65].mxu0 }
 0x948   : > { %v15204_v20 = vmax.f32 %v14468_v56, 0.0  ;;  %v14471_v1 = vpop.f32.mrb[64].mxu1 }
 0x949   : > { %v15201_v2 = vmax.f32 %v14471_v1, 0.0  ;;  %v14474_v3 = vpop.f32.mrb[65].mxu1 }
 0x94a   : > { %v12741_v13 = vpack.c.bf16 %v15203_v60, %v15204_v20  ;;  %v15202_v36 = vmax.f32 %v14474_v3, 0.0 }
 0x94b   : > { %v14481_v37 = vpop.f32.mrb[66].mxu0 }
 0x94c   : > { %v12744_v4 = vpack.c.bf16 %v15201_v2, %v15202_v36  ;;  %v15199_v14 = vmax.f32 %v14481_v37, 0.0  ;;  %v14488_v34 = vpop.f32.mrb[67].mxu0  ;;  %12742 = vmatpush3.bf16.msra.mxu0 %v12741_v13  ;;  %v14596_v13 = vld [vmem:[#allocation4 + $0x370] sm:$0xff] }
 0x94d   : > { %v15200_v38 = vmax.f32 %v14488_v34, 0.0  ;;  %v14491_v48 = vpop.f32.mrb[66].mxu1  ;;  %12746 = vmatprep.subr.bf16.mxu0 %v13046_v8 }
 0x94e   : > { %v15197_v59 = vmax.f32 %v14491_v48, 0.0  ;;  %v14495_v61 = vpop.f32.mrb[67].mxu1  ;;  %12745 = vmatpush3.bf16.msra.mxu1 %v12744_v4  ;;  %v14598_v4 = vld [vmem:[#allocation4 + $0x378] sm:$0xff] }
 0x94f   : > { %v12747_v63 = vpack.c.bf16 %v15199_v14, %v15200_v38  ;;  %v15198_v58 = vmax.f32 %v14495_v61, 0.0  ;;  %v14502_v50 = vpop.f32.mrb[68].mxu0  ;;  %12281 = vmatmul.mubr.msk.f32.vlgmr.msra.gmra.mrb[72].mxu0 %vm704_vm1, %v12942_v52  ;;  %12749 = vmatprep.subr.bf16.mxu1 %v13046_v8 }
 0x950   : > { %v15195_v57 = vmax.f32 %v14502_v50, 0.0  ;;  %v14510_v6 = vpop.f32.mrb[69].mxu0  ;;  %12294 = vmatprep.mubr.msk.f32.mxu0 %vm13047_vm0, %v15205_v16 }
 0x951   : > { %v12750_v7 = vpack.c.bf16 %v15197_v59, %v15198_v58  ;;  %v15196_v32 = vmax.f32 %v14510_v6, 0.0  ;;  %v14519_v5 = vpop.f32.mrb[68].mxu1  ;;  %12748 = vmatpush3.bf16.msra.mxu0 %v12747_v63  ;;  %12288 = vmatmul.mubr.msk.f32.vlgmr.msra.gmra.mrb[72].mxu1 %vm704_vm1, %v12942_v52  ;;  %v14600_v63 = vld [vmem:[#allocation4 + $0x380] sm:$0xff] }
 0x952   : > { %v15193_v27 = vmax.f32 %v14519_v5, 0.0  ;;  %v14523_v15 = vpop.f32.mrb[69].mxu1  ;;  %12752 = vmatprep.subr.bf16.mxu0 %v13046_v8  ;;  %12301 = vmatprep.mubr.msk.f32.mxu1 %vm13047_vm0, %v15205_v16 }
 0x953   : > { %v12753_v42 = vpack.c.bf16 %v15195_v57, %v15196_v32  ;;  %v15194_v0 = vmax.f32 %v14523_v15, 0.0  ;;  %v14533_v33 = vpop.f32.mrb[70].mxu0  ;;  %12751 = vmatpush3.bf16.msra.mxu1 %v12750_v7  ;;  %v12777_v7 = vpack.c.bf16 %v14586_v24, %v14584_v23 }
 0x954   : > { %v15191_v12 = vmax.f32 %v14533_v33, 0.0  ;;  %v14536_v35 = vpop.f32.mrb[71].mxu0  ;;  %12295 = vmatmul.mubr.msk.f32.vlgmr.msra.gmra.mrb[74].mxu0 %vm704_vm1, %v12942_v52  ;;  %12755 = vmatprep.subr.bf16.mxu1 %v13046_v8 }
 0x955   : > { %v12756_v41 = vpack.c.bf16 %v15193_v27, %v15194_v0  ;;  %v15192_v10 = vmax.f32 %v14536_v35, 0.0  ;;  %v14545_v53 = vpop.f32.mrb[70].mxu1  ;;  %12754 = vmatpush3.bf16.msra.mxu0 %v12753_v42  ;;  %12308 = vmatprep.mubr.msk.f32.mxu0 %vm13047_vm0, %v15205_v16  ;;  %v14606_v42 = vld [vmem:[#allocation4 + $0x3a0] sm:$0xff] }
 0x956   : > { %v15189_v17 = vmax.f32 %v14545_v53, 0.0  ;;  %v14550_v55 = vpop.f32.mrb[71].mxu1  ;;  %12302 = vmatmul.mubr.msk.f32.vlgmr.msra.gmra.mrb[74].mxu1 %vm704_vm1, %v12942_v52  ;;  %12758 = vmatprep.subr.bf16.mxu0 %v13046_v8 }
 0x957   : > { %v12759_v11 = vpack.c.bf16 %v15191_v12, %v15192_v10  ;;  %v15190_v62 = vmax.f32 %v14550_v55, 0.0  ;;  %12757 = vmatpush3.bf16.msra.mxu1 %v12756_v41  ;;  %12315 = vmatprep.mubr.msk.f32.mxu1 %vm13047_vm0, %v15205_v16  ;;  %v14608_v41 = vld [vmem:[#allocation4 + $0x3a8] sm:$0xff] }
 0x958   : > { %12309 = vmatmul.mubr.msk.f32.vlgmr.msra.gmra.mrb[76].mxu0 %vm704_vm1, %v12942_v52  ;;  %12761 = vmatprep.subr.bf16.mxu1 %v13046_v8 }
 0x959   : > { %v12762_v51 = vpack.c.bf16 %v15189_v17, %v15190_v62  ;;  %12760 = vmatpush3.bf16.msra.mxu0 %v12759_v11  ;;  %12322 = vmatprep.mubr.msk.f32.mxu0 %vm13047_vm0, %v15205_v16 }
 0x95a   : > { %12316 = vmatmul.mubr.msk.f32.vlgmr.msra.gmra.mrb[76].mxu1 %vm704_vm1, %v12942_v52  ;;  %12764 = vmatprep.subr.bf16.mxu0 %v13046_v8 }
 0x95b   : > { %12763 = vmatpush3.bf16.msra.mxu1 %v12762_v51  ;;  %12329 = vmatprep.mubr.msk.f32.mxu1 %vm13047_vm0, %v15205_v16  ;;  %v12783_v51 = vpack.c.bf16 %v14590_v25, %v14588_v45 }
 0x95c   : > { %12323 = vmatmul.mubr.msk.f32.vlgmr.msra.gmra.mrb[78].mxu0 %vm704_vm1, %v12942_v52  ;;  %12770 = vmatprep.subr.bf16.mxu1 %v13046_v8 }
 0x95d   : > { %12340 = vmatprep.mubr.msk.f32.mxu0 %vm13047_vm0, %v15205_v16  ;;  %12766 = vmatpush3.bf16.msra.mxu0 %v12765_v19 }
 0x95e   : > { %12330 = vmatmul.mubr.msk.f32.vlgmr.msra.gmra.mrb[78].mxu1 %vm704_vm1, %v12942_v52  ;;  %12767 = vmatprep.subr.bf16.mxu0 %v13046_v8  ;;  %v14602_v52 = vld [vmem:[#allocation4 + $0x388] sm:$0xff] }
 0x95f   : > { %12351 = vmatprep.mubr.msk.f32.mxu1 %vm13047_vm0, %v15205_v16  ;;  %12772 = vmatpush3.bf16.msra.mxu1 %v12771_v43 }
 0x960   : > { %12773 = vmatprep.subr.bf16.mxu1 %v13046_v8 }
 0x961   : > { %12769 = vmatpush3.bf16.msra.mxu0 %v12768_v30 }
 0x962   : > { %12776 = vmatprep.subr.bf16.mxu0 %v13046_v8 }
 0x963   : > { %12775 = vmatpush3.bf16.msra.mxu1 %v12774_v39 }
 0x964   : > { %12782 = vmatprep.subr.bf16.mxu1 %v13046_v8 }
 0xa22   : > { %v14610_v11 = vpop.f32.mrb[72].mxu0 }
 0xa23   : > { %v8767_v19 = vrot.slane %v14610_v11, 1  ;;  %v8919_v31 = vrot.slane %v14610_v11, 2  ;;  %v9071_v43 = vrot.slane %v14610_v11, 3  ;;  %v9223_v44 = vrot.slane %v14610_v11, 4  ;;  %v12282_v47 = vpop.f32.mrb[73].mxu0 }
 0xa24   : > { %v9375_v29 = vrot.slane %v14610_v11, 5  ;;  %v14627_v39 = vpop.f32.mrb[72].mxu1 }
 0xa25   : > { %v8615_v17 = vrot.slane %v14627_v39, 7  ;;  %v8920_v62 = vrot.slane %v14627_v39, 1  ;;  %v9072_v12 = vrot.slane %v14627_v39, 2  ;;  %v9224_v10 = vrot.slane %v14627_v39, 3  ;;  %v12289_v47 = vpop.f32.mrb[73].mxu1 }
 0xa26   : > { %v9376_v27 = vrot.slane %v14627_v39, 4  ;;  %v8768_v32 = vsel %vm1277_vm2, %v14627_v39, %v8767_v19 }
 0xa27   : > { %v14640_v59 = vpop.f32.mrb[74].mxu0  ;;  %v8616_v58 = vsel %vm1277_vm2, %v8615_v17, %v14610_v11  ;;  %v8921_v14 = vsel %vm1277_vm2, %v8920_v62, %v8919_v31  ;;  %v9073_v38 = vsel %vm1277_vm2, %v9072_v12, %v9071_v43  ;;  %v9225_v47 = vsel %vm1277_vm2, %v9224_v10, %v9223_v44 }
 0xa28   : > { %v8617_v2 = vrot.slane %v14640_v59, 6  ;;  %v8769_v36 = vrot.slane %v14640_v59, 7  ;;  %v9074_v60 = vrot.slane %v14640_v59, 1  ;;  %v9226_v20 = vrot.slane %v14640_v59, 2  ;;  %v12296_v19 = vpop.f32.mrb[75].mxu0 }
 0xa29   : > { %v14654_v62 = vpop.f32.mrb[74].mxu1  ;;  %v8922_v12 = vsel %vm1280_vm3, %v14640_v59, %v8921_v14  ;;  %v15215_v24 = vrot.slane %v14640_v59, 3 }
 0xa2a   : > { %v12303_v10 = vpop.f32.mrb[75].mxu1  ;;  %v8618_v31 = vsel %vm1280_vm3, %v8617_v2, %v8616_v58  ;;  %v8619_v43 = vrot.slane %v14654_v62, 5  ;;  %v8770_v44 = vsel %vm1280_vm3, %v8769_v36, %v8768_v32  ;;  %v8771_v19 = vrot.slane %v14654_v62, 6 }
 0xa2b   : > { %v14662_v57 = vpop.f32.mrb[76].mxu0  ;;  %v8923_v28 = vrot.slane %v14654_v62, 7  ;;  %v9075_v17 = vsel %vm1280_vm3, %v9074_v60, %v9073_v38  ;;  %v9227_v46 = vsel %vm1280_vm3, %v9226_v20, %v9225_v47  ;;  %v9228_v9 = vrot.slane %v14654_v62, 1 }
 0xa2c   : > { %v12310_v14 = vpop.f32.mrb[77].mxu0  ;;  %v8620_v10 = vsel %vm1283_vm4, %v8619_v43, %v8618_v31  ;;  %v8621_v2 = vrot.slane %v14662_v57, 4  ;;  %v8772_v58 = vsel %vm1283_vm4, %v8771_v19, %v8770_v44  ;;  %v8773_v36 = vrot.slane %v14662_v57, 5 }
 0xa2d   : > { %v14672_v32 = vpop.f32.mrb[76].mxu1  ;;  %v8924_v18 = vsel %vm1283_vm4, %v8923_v28, %v8922_v12  ;;  %v8925_v0 = vrot.slane %v14662_v57, 6  ;;  %v9076_v60 = vsel %vm1283_vm4, %v14654_v62, %v9075_v17  ;;  %v9077_v20 = vrot.slane %v14662_v57, 7 }
 0xa2e   : > { %v12317_v38 = vpop.f32.mrb[77].mxu1  ;;  %v8622_v47 = vsel %vm1286_vm5, %v8621_v2, %v8620_v10  ;;  %v8623_v31 = vrot.slane %v14672_v32, 3  ;;  %v8774_v43 = vsel %vm1286_vm5, %v8773_v36, %v8772_v58  ;;  %v8775_v44 = vrot.slane %v14672_v32, 4 }
 0xa2f   : > { %v14683_v19 = vpop.f32.mrb[78].mxu0  ;;  %v8926_v28 = vsel %vm1286_vm5, %v8925_v0, %v8924_v18  ;;  %v8927_v12 = vrot.slane %v14672_v32, 5  ;;  %v9078_v14 = vsel %vm1286_vm5, %v9077_v20, %v9076_v60  ;;  %v9079_v17 = vrot.slane %v14672_v32, 6 }
 0xa30   : > { %v12324_v30 = vpop.f32.mrb[79].mxu0  ;;  %v8624_v38 = vsel %vm1289_vm6, %v8623_v31, %v8622_v47  ;;  %v8625_v10 = vrot.slane %v14683_v19, 2  ;;  %v8776_v2 = vsel %vm1289_vm6, %v8775_v44, %v8774_v43  ;;  %v8777_v58 = vrot.slane %v14683_v19, 3 }
 0xa31   : > { %v14693_v36 = vpop.f32.mrb[78].mxu1  ;;  %v8928_v16 = vsel %vm1289_vm6, %v8927_v12, %v8926_v28  ;;  %v8929_v0 = vrot.slane %v14683_v19, 4  ;;  %v9080_v18 = vsel %vm1289_vm6, %v9079_v17, %v9078_v14  ;;  %v9081_v60 = vrot.slane %v14683_v19, 5 }
 0xa32   : > { %v12331_v20 = vpop.f32.mrb[79].mxu1  ;;  %v8626_v30 = vsel %vm1292_vm7, %v8625_v10, %v8624_v38  ;;  %v8627_v47 = vrot.slane %v14693_v36, 1  ;;  %v8778_v31 = vsel %vm1292_vm7, %v8777_v58, %v8776_v2  ;;  %v8779_v43 = vrot.slane %v14693_v36, 2 }
 0xa33   : > { %v8930_v44 = vsel %vm1292_vm7, %v8929_v0, %v8928_v16  ;;  %v8931_v21 = vrot.slane %v14693_v36, 3  ;;  %v9082_v28 = vsel %vm1292_vm7, %v9081_v60, %v9080_v18  ;;  %v9083_v12 = vrot.slane %v14693_v36, 4 }
 0xa34   : > { %v8628_v14 = vsel %vm1295_vm8, %v8627_v47, %v8626_v30  ;;  %v8780_v17 = vsel %vm1295_vm8, %v8779_v43, %v8778_v31  ;;  %v9229_v38 = vsel %vm1283_vm4, %v9228_v9, %v9227_v46  ;;  %v9231_v10 = vrot.slane %v14672_v32, 7 }
 0xa35   : > { %12341 = vmatmul.mubr.msk.f32.vlgmr.msra.gmra.mrb[80].mxu0 %vm1297_vm9, %v8628_v14  ;;  %12352 = vmatmul.mubr.msk.f32.vlgmr.msra.gmra.mrb[80].mxu1 %vm1297_vm9, %v8780_v17  ;;  %v8932_v16 = vsel %vm1295_vm8, %v8931_v21, %v8930_v44  ;;  %v9084_v2 = vsel %vm1295_vm8, %v9083_v12, %v9082_v28  ;;  %v9230_v58 = vsel %vm1286_vm5, %v14662_v57, %v9229_v38  ;;  %v9233_v0 = vrot.slane %v14683_v19, 6  ;;  %v8033_v38 = vld [vmem:[#allocation4 + $0x390] sm:$0xff] }
 0xa36   : > { %12778 = vmatpush3.bf16.msra.mxu0 %v12777_v7  ;;  %12784 = vmatpush3.bf16.msra.mxu1 %v12783_v51  ;;  %v9232_v9 = vsel %vm1289_vm6, %v9231_v10, %v9230_v58  ;;  %v9235_v46 = vrot.slane %v14693_v36, 5  ;;  %v9377_v21 = vsel %vm1277_vm2, %v9376_v27, %v9375_v29  ;;  %v9380_v18 = vrot.slane %v14654_v62, 2  ;;  %v8034_v10 = vld [vmem:[#allocation4 + $0x398] sm:$0xff] }
 0xa37   : > { %12779 = vmatprep.subr.bf16.mxu0 %v13046_v8  ;;  %12785 = vmatprep.subr.bf16.mxu1 %v13046_v8  ;;  %v9234_v23 = vsel %vm1292_vm7, %v9233_v0, %v9232_v9  ;;  %v9379_v45 = vsel %vm1280_vm3, %v15215_v24, %v9377_v21  ;;  %v9382_v25 = vrot.slane %v14662_v57, 1  ;;  %v9385_v7 = vrot.slane %v14683_v19, 7 }
 0xa38   : > { %v15216_v51 = vmov 0.0   ;;  %v9236_v27 = vsel %vm1295_vm8, %v9235_v46, %v9234_v23  ;;  %v9381_v29 = vsel %vm1283_vm4, %v9380_v18, %v9379_v45  ;;  %v9387_v60 = vrot.slane %v14693_v36, 6 }
 0xa39   : > { %12362 = vmatprep.mubr.msk.f32.mxu0 %vm13047_vm0, %v15216_v51  ;;  %12373 = vmatprep.mubr.msk.f32.mxu1 %vm13047_vm0, %v15216_v51  ;;  %v15217_v20 = vrot.slane %v14610_v11, 6  ;;  %v15218_v30 = vrot.slane %v14627_v39, 5  ;;  %v9383_v31 = vsel %vm1286_vm5, %v9382_v25, %v9381_v29  ;;  %v15219_v43 = vrot.slane %v14640_v59, 4 }
 0xa3a   : > { %v9532_v28 = vrot.slane %v14654_v62, 3  ;;  %v9534_v12 = vrot.slane %v14662_v57, 2  ;;  %v15220_v14 = vpack.c.bf16 %v14594_v49, %v14592_v54  ;;  %v15221_v17 = vpack.c.bf16 %v14598_v4, %v14596_v13  ;;  %v8037_v49 = vld [vmem:[#allocation4 + $0x3b0] sm:$0xff]  ;;  %v8038_v13 = vld [vmem:[#allocation4 + $0x3b8] sm:$0xff] }
 0xa3b   : > { %v9529_v47 = vsel %vm1277_vm2, %v15218_v30, %v15217_v20  ;;  %v9384_v58 = vsel %vm1289_vm6, %v14672_v32, %v9383_v31  ;;  %v9536_v0 = vrot.slane %v14672_v32, 1  ;;  %v9539_v9 = vrot.slane %v14693_v36, 7  ;;  %v8043_v31 = vld [vmem:[#allocation4 + $0x3e0] sm:$0xff] }
 0xa3c   : > { %v9531_v44 = vsel %vm1280_vm3, %v15219_v43, %v9529_v47  ;;  %12781 = vmatpush3.bf16.msra.mxu0 %v15220_v14  ;;  %12787 = vmatpush3.bf16.msra.mxu1 %v15221_v17  ;;  %v15222_v46 = vrot.slane %v14610_v11, 7  ;;  %v15223_v21 = vrot.slane %v14627_v39, 6  ;;  %v9386_v4 = vsel %vm1292_vm7, %v9385_v7, %v9384_v58  ;;  %v8040_v47 = vld [vmem:[#allocation4 + $0x3c8] sm:$0xff]  ;;  %v8045_v14 = vld [vmem:[#allocation4 + $0x3f0] sm:$0xff]  ;;  %v8046_v17 = vld [vmem:[#allocation4 + $0x3f8] sm:$0xff] }
 0xa3d   : > { %12788 = vmatprep.subr.bf16.mxu0 %v13046_v8  ;;  %12794 = vmatprep.subr.bf16.mxu1 %v13046_v8  ;;  %v9533_v18 = vsel %vm1283_vm4, %v9532_v28, %v9531_v44  ;;  %v15224_v23 = vrot.slane %v14640_v59, 5  ;;  %v9684_v11 = vrot.slane %v14654_v62, 4  ;;  %v9388_v39 = vsel %vm1295_vm8, %v9387_v60, %v9386_v4  ;;  %v8039_v60 = vld [vmem:[#allocation4 + $0x3c0] sm:$0xff]  ;;  %v8044_v43 = vld [vmem:[#allocation4 + $0x3e8] sm:$0xff]  ;;  %v8041_v28 = vld [vmem:[#allocation4 + $0x3d0] sm:$0xff] }
 0xa3e   : > { %v9681_v54 = vsel %vm1277_vm2, %v15223_v21, %v15222_v46  ;;  %v9535_v45 = vsel %vm1286_vm5, %v9534_v12, %v9533_v18  ;;  %v9686_v25 = vrot.slane %v14662_v57, 3  ;;  %v9688_v29 = vrot.slane %v14672_v32, 2  ;;  %v8042_v12 = vld [vmem:[#allocation4 + $0x3d8] sm:$0xff] }
 0xa3f   : > { %v9683_v24 = vsel %vm1280_vm3, %v15224_v23, %v9681_v54  ;;  %12363 = vmatmul.mubr.msk.f32.vlgmr.msra.gmra.mrb[82].mxu0 %vm1297_vm9, %v8932_v16  ;;  %12374 = vmatmul.mubr.msk.f32.vlgmr.msra.gmra.mrb[82].mxu1 %vm1297_vm9, %v9084_v2  ;;  %v12792_v7 = vpack.c.bf16 %v8034_v10, %v8033_v38  ;;  %v9537_v20 = vsel %vm1289_vm6, %v9536_v0, %v9535_v45  ;;  %v9690_v30 = vrot.slane %v14683_v19, 1 }
 0xa40   : > { %v9685_v59 = vsel %vm1283_vm4, %v9684_v11, %v9683_v24  ;;  %v15225_v62 = vpack.c.bf16 %v14602_v52, %v14600_v63  ;;  %v15226_v57 = vpack.c.bf16 %v14608_v41, %v14606_v42  ;;  %v12798_v32 = vpack.c.bf16 %v8038_v13, %v8037_v49  ;;  %12384 = vmatprep.mubr.msk.f32.mxu0 %vm13047_vm0, %v15216_v51 }
 0xa41   : > { %v9538_v16 = vsel %vm1292_vm7, %v14683_v19, %v9537_v20  ;;  %v9687_v2 = vsel %vm1286_vm5, %v9686_v25, %v9685_v59  ;;  %12395 = vmatprep.mubr.msk.f32.mxu1 %vm13047_vm0, %v15216_v51  ;;  %v12801_v19 = vpack.c.bf16 %v8040_v47, %v8039_v60  ;;  %v12807_v44 = vpack.c.bf16 %v8044_v43, %v8043_v31 }
 0xa42   : > { %12790 = vmatpush3.bf16.msra.mxu0 %v15225_v62  ;;  %12796 = vmatpush3.bf16.msra.mxu1 %v15226_v57  ;;  %v9540_v63 = vsel %vm1295_vm8, %v9539_v9, %v9538_v16  ;;  %v9689_v52 = vsel %vm1289_vm6, %v9688_v29, %v9687_v2  ;;  %v12804_v38 = vpack.c.bf16 %v8042_v12, %v8041_v28 }
 0xa43   : > { %12791 = vmatprep.subr.bf16.mxu0 %v13046_v8  ;;  %12797 = vmatprep.subr.bf16.mxu1 %v13046_v8  ;;  %v9691_v42 = vsel %vm1292_vm7, %v9690_v30, %v9689_v52 }
 0xa44   : > { %v9692_v41 = vsel %vm1295_vm8, %v14693_v36, %v9691_v42  ;;  %v12810_v36 = vpack.c.bf16 %v8046_v17, %v8045_v14 }
 0xa46   : > { %12793 = vmatpush3.bf16.msra.mxu0 %v12792_v7  ;;  %12799 = vmatpush3.bf16.msra.mxu1 %v12798_v32 }
 0xa47   : > { %12800 = vmatprep.subr.bf16.mxu0 %v13046_v8  ;;  %12806 = vmatprep.subr.bf16.mxu1 %v13046_v8 }
 0xa49   : > { %12385 = vmatmul.mubr.msk.f32.vlgmr.msra.gmra.mrb[84].mxu0 %vm1297_vm9, %v9236_v27  ;;  %12396 = vmatmul.mubr.msk.f32.vlgmr.msra.gmra.mrb[84].mxu1 %vm1297_vm9, %v9388_v39  ;;  %v14825_v27 = vld [vmem:[%s15176_s4] sm:$0xff] }
 0xa4a   : > { %12802 = vmatpush3.bf16.msra.mxu0 %v12801_v19  ;;  %12808 = vmatpush3.bf16.msra.mxu1 %v12807_v44 }
 0xa4b   : > { %12803 = vmatprep.subr.bf16.mxu0 %v13046_v8  ;;  %12809 = vmatprep.subr.bf16.mxu1 %v13046_v8 }
 0xa4c   : > { %12406 = vmatprep.mubr.msk.f32.mxu0 %vm13047_vm0, %v15216_v51  ;;  %12417 = vmatprep.mubr.msk.f32.mxu1 %vm13047_vm0, %v15216_v51 }
 0xa4e   : > { %12805 = vmatpush3.bf16.msra.mxu0 %v12804_v38  ;;  %12811 = vmatpush3.bf16.msra.mxu1 %v12810_v36 }
 0xa51   : > { %12407 = vmatmul.mubr.msk.f32.vlgmr.msra.gmra.mrb[86].mxu0 %vm1297_vm9, %v9540_v63  ;;  %12418 = vmatmul.mubr.msk.f32.vlgmr.msra.gmra.mrb[86].mxu1 %vm1297_vm9, %v9692_v41 }
 0xa52   : > { %12422 = vmatprep.mubr.msk.f32.mxu0 %vm2509_vm10, %v14825_v27  ;;  %12427 = vmatprep.mubr.msk.f32.mxu1 %vm2509_vm10, %v14825_v27 }
 0xb08   : > { %v8697_v8 = vpop.f32.mrb[80].mxu0  ;;  %v8849_v10 = vpop.f32.mrb[80].mxu1 }
 0xb09   : > { %v8702_v51 = vcombine.high %v8697_v8, %v8697_v8  ;;  %v8709_v58 = vrot.slane %v8697_v8, %v13468_v26  ;;  %v8854_v0 = vcombine.high %v8849_v10, %v8849_v10  ;;  %v8861_v9 = vrot.slane %v8849_v10, %v13468_v26  ;;  %v12342_v46 = vpop.f32.mrb[81].mxu0  ;;  %v12353_v21 = vpop.f32.mrb[81].mxu1 }
 0xb0b   : > { %v8716_v54 = vrot.slane %v8702_v51, %v13468_v26  ;;  %v8717_v49 = vcombine.high %v8709_v58, %v8709_v58  ;;  %v8725_v13 = vrot.slane %v8709_v58, %v13468_v26  ;;  %v8868_v4 = vrot.slane %v8854_v0, %v13468_v26 }
 0xb0c   : > { %v8869_v18 = vcombine.high %v8861_v9, %v8861_v9  ;;  %v8877_v23 = vrot.slane %v8861_v9, %v13468_v26 }
 0xb0d   : > { %v8718_v24 = vcombine.high %v8716_v54, %v8716_v54  ;;  %v8732_v11 = vrot.slane %v8716_v54, %v13468_v26  ;;  %v8739_v39 = vrot.slane %v8717_v49, %v13468_v26  ;;  %v8747_v45 = vcombine.high %v8725_v13, %v8725_v13  ;;  %8759 = vst.msk [vmem:[#allocation2] sm:$0x1] %vm1428_vm11, %v8725_v13 }
 0xb0e   : > { %v8870_v25 = vcombine.high %v8868_v4, %v8868_v4  ;;  %v8884_v29 = vrot.slane %v8868_v4, %v13468_v26  ;;  %v8891_v7 = vrot.slane %v8869_v18, %v13468_v26  ;;  %v8899_v20 = vcombine.high %v8877_v23, %v8877_v23  ;;  %8911 = vst.msk [vmem:[#allocation2 + $0x1] sm:$0x1] %vm1428_vm11, %v8877_v23 }
 0xb0f   : > { %v8746_v59 = vrot.slane %v8718_v24, %v13468_v26  ;;  %v8748_v30 = vcombine.high %v8732_v11, %v8732_v11  ;;  %v8749_v62 = vcombine.high %v8739_v39, %v8739_v39  ;;  %8760 = vst.msk [vmem:[#allocation2 + $0x8] sm:$0x1] %vm1428_vm11, %v8739_v39  ;;  %8761 = vst.msk [vmem:[#allocation2 + $0x10] sm:$0x1] %vm1428_vm11, %v8747_v45 }
 0xb10   : > { %8763 = vst.msk [vmem:[#allocation2 + $0x20] sm:$0x1] %vm1428_vm11, %v8732_v11  ;;  %v8898_v57 = vrot.slane %v8870_v25, %v13468_v26  ;;  %v8900_v32 = vcombine.high %v8884_v29, %v8884_v29  ;;  %v8901_v60 = vcombine.high %v8891_v7, %v8891_v7  ;;  %8912 = vst.msk [vmem:[#allocation2 + $0x9] sm:$0x1] %vm1428_vm11, %v8891_v7 }
 0xb11   : > { %8913 = vst.msk [vmem:[#allocation2 + $0x11] sm:$0x1] %vm1428_vm11, %v8899_v20  ;;  %8915 = vst.msk [vmem:[#allocation2 + $0x21] sm:$0x1] %vm1428_vm11, %v8884_v29  ;;  %v8750_v47 = vcombine.high %v8746_v59, %v8746_v59 }
 0xb12   : > { %v9001_v16 = vpop.f32.mrb[82].mxu0  ;;  %v9153_v2 = vpop.f32.mrb[82].mxu1  ;;  %8762 = vst.msk [vmem:[#allocation2 + $0x18] sm:$0x1] %vm1428_vm11, %v8749_v62  ;;  %8764 = vst.msk [vmem:[#allocation2 + $0x28] sm:$0x1] %vm1428_vm11, %v8746_v59  ;;  %v8902_v41 = vcombine.high %v8898_v57, %v8898_v57 }
 0xb13   : > { %8765 = vst.msk [vmem:[#allocation2 + $0x30] sm:$0x1] %vm1428_vm11, %v8748_v30  ;;  %v9006_v31 = vcombine.high %v9001_v16, %v9001_v16  ;;  %v9013_v43 = vrot.slane %v9001_v16, %v13468_v26  ;;  %v9158_v63 = vcombine.high %v9153_v2, %v9153_v2  ;;  %v12364_v52 = vpop.f32.mrb[83].mxu0  ;;  %v12375_v42 = vpop.f32.mrb[83].mxu1  ;;  %8914 = vst.msk [vmem:[#allocation2 + $0x19] sm:$0x1] %vm1428_vm11, %v8901_v60 }
 0xb14   : > { %8916 = vst.msk [vmem:[#allocation2 + $0x29] sm:$0x1] %vm1428_vm11, %v8898_v57  ;;  %8917 = vst.msk [vmem:[#allocation2 + $0x31] sm:$0x1] %vm1428_vm11, %v8900_v32  ;;  %v9165_v19 = vrot.slane %v9153_v2, %v13468_v26 }
 0xb15   : > { %8766 = vst.msk [vmem:[#allocation2 + $0x38] sm:$0x1] %vm1428_vm11, %v8750_v47  ;;  %v9020_v44 = vrot.slane %v9006_v31, %v13468_v26  ;;  %v9021_v28 = vcombine.high %v9013_v43, %v9013_v43  ;;  %v9029_v12 = vrot.slane %v9013_v43, %v13468_v26  ;;  %v9172_v14 = vrot.slane %v9158_v63, %v13468_v26 }
 0xb16   : > { %8918 = vst.msk [vmem:[#allocation2 + $0x39] sm:$0x1] %vm1428_vm11, %v8902_v41  ;;  %v9173_v17 = vcombine.high %v9165_v19, %v9165_v19  ;;  %v9181_v38 = vrot.slane %v9165_v19, %v13468_v26 }
 0xb17   : > { %v9022_v36 = vcombine.high %v9020_v44, %v9020_v44  ;;  %v9036_v8 = vrot.slane %v9020_v44, %v13468_v26  ;;  %v9043_v10 = vrot.slane %v9021_v28, %v13468_v26  ;;  %v9051_v51 = vcombine.high %v9029_v12, %v9029_v12  ;;  %9063 = vst.msk [vmem:[#allocation2 + $0x2] sm:$0x1] %vm1428_vm11, %v9029_v12 }
 0xb18   : > { %v9174_v58 = vcombine.high %v9172_v14, %v9172_v14  ;;  %v9188_v0 = vrot.slane %v9172_v14, %v13468_v26  ;;  %v9195_v9 = vrot.slane %v9173_v17, %v13468_v26  ;;  %v9203_v46 = vcombine.high %v9181_v38, %v9181_v38  ;;  %9215 = vst.msk [vmem:[#allocation2 + $0x3] sm:$0x1] %vm1428_vm11, %v9181_v38 }
 0xb19   : > { %v9050_v21 = vrot.slane %v9022_v36, %v13468_v26  ;;  %v9052_v54 = vcombine.high %v9036_v8, %v9036_v8  ;;  %v9053_v49 = vcombine.high %v9043_v10, %v9043_v10  ;;  %9064 = vst.msk [vmem:[#allocation2 + $0xa] sm:$0x1] %vm1428_vm11, %v9043_v10  ;;  %9065 = vst.msk [vmem:[#allocation2 + $0x12] sm:$0x1] %vm1428_vm11, %v9051_v51 }
 0xb1a   : > { %9067 = vst.msk [vmem:[#allocation2 + $0x22] sm:$0x1] %vm1428_vm11, %v9036_v8  ;;  %v9202_v13 = vrot.slane %v9174_v58, %v13468_v26  ;;  %v9204_v4 = vcombine.high %v9188_v0, %v9188_v0  ;;  %v9205_v18 = vcombine.high %v9195_v9, %v9195_v9  ;;  %9216 = vst.msk [vmem:[#allocation2 + $0xb] sm:$0x1] %vm1428_vm11, %v9195_v9 }
 0xb1b   : > { %9217 = vst.msk [vmem:[#allocation2 + $0x13] sm:$0x1] %vm1428_vm11, %v9203_v46  ;;  %9219 = vst.msk [vmem:[#allocation2 + $0x23] sm:$0x1] %vm1428_vm11, %v9188_v0  ;;  %v9054_v11 = vcombine.high %v9050_v21, %v9050_v21 }
 0xb1c   : > { %v9305_v23 = vpop.f32.mrb[84].mxu0  ;;  %v9457_v24 = vpop.f32.mrb[84].mxu1  ;;  %9066 = vst.msk [vmem:[#allocation2 + $0x1a] sm:$0x1] %vm1428_vm11, %v9053_v49  ;;  %9068 = vst.msk [vmem:[#allocation2 + $0x2a] sm:$0x1] %vm1428_vm11, %v9050_v21  ;;  %v9206_v20 = vcombine.high %v9202_v13, %v9202_v13 }
 0xb1d   : > { %9069 = vst.msk [vmem:[#allocation2 + $0x32] sm:$0x1] %vm1428_vm11, %v9052_v54  ;;  %v9310_v39 = vcombine.high %v9305_v23, %v9305_v23  ;;  %v9317_v45 = vrot.slane %v9305_v23, %v13468_v26  ;;  %v9462_v25 = vcombine.high %v9457_v24, %v9457_v24  ;;  %v12386_v29 = vpop.f32.mrb[85].mxu0  ;;  %v12397_v7 = vpop.f32.mrb[85].mxu1  ;;  %9218 = vst.msk [vmem:[#allocation2 + $0x1b] sm:$0x1] %vm1428_vm11, %v9205_v18 }
 0xb1e   : > { %9220 = vst.msk [vmem:[#allocation2 + $0x2b] sm:$0x1] %vm1428_vm11, %v9202_v13  ;;  %9221 = vst.msk [vmem:[#allocation2 + $0x33] sm:$0x1] %vm1428_vm11, %v9204_v4  ;;  %v9469_v59 = vrot.slane %v9457_v24, %v13468_v26 }
 0xb1f   : > { %9070 = vst.msk [vmem:[#allocation2 + $0x3a] sm:$0x1] %vm1428_vm11, %v9054_v11  ;;  %v9324_v30 = vrot.slane %v9310_v39, %v13468_v26  ;;  %v9325_v62 = vcombine.high %v9317_v45, %v9317_v45  ;;  %v9333_v57 = vrot.slane %v9317_v45, %v13468_v26  ;;  %v9476_v32 = vrot.slane %v9462_v25, %v13468_v26 }
 0xb20   : > { %9222 = vst.msk [vmem:[#allocation2 + $0x3b] sm:$0x1] %vm1428_vm11, %v9206_v20  ;;  %v9477_v60 = vcombine.high %v9469_v59, %v9469_v59  ;;  %v9485_v16 = vrot.slane %v9469_v59, %v13468_v26 }
 0xb21   : > { %v9326_v2 = vcombine.high %v9324_v30, %v9324_v30  ;;  %v9340_v47 = vrot.slane %v9324_v30, %v13468_v26  ;;  %v9347_v31 = vrot.slane %v9325_v62, %v13468_v26  ;;  %v9355_v43 = vcombine.high %v9333_v57, %v9333_v57  ;;  %9367 = vst.msk [vmem:[#allocation2 + $0x4] sm:$0x1] %vm1428_vm11, %v9333_v57 }
 0xb22   : > { %v9478_v63 = vcombine.high %v9476_v32, %v9476_v32  ;;  %v9492_v52 = vrot.slane %v9476_v32, %v13468_v26  ;;  %v9499_v42 = vrot.slane %v9477_v60, %v13468_v26  ;;  %v9507_v41 = vcombine.high %v9485_v16, %v9485_v16  ;;  %9519 = vst.msk [vmem:[#allocation2 + $0x5] sm:$0x1] %vm1428_vm11, %v9485_v16 }
 0xb23   : > { %v9354_v19 = vrot.slane %v9326_v2, %v13468_v26  ;;  %v9356_v44 = vcombine.high %v9340_v47, %v9340_v47  ;;  %v9357_v28 = vcombine.high %v9347_v31, %v9347_v31  ;;  %9368 = vst.msk [vmem:[#allocation2 + $0xc] sm:$0x1] %vm1428_vm11, %v9347_v31  ;;  %9369 = vst.msk [vmem:[#allocation2 + $0x14] sm:$0x1] %vm1428_vm11, %v9355_v43  ;;  %v12944_v43 = vld [vmem:[%s15176_s4 + $0x8] sm:$0xff] }
 0xb24   : > { %9371 = vst.msk [vmem:[#allocation2 + $0x24] sm:$0x1] %vm1428_vm11, %v9340_v47  ;;  %v9506_v12 = vrot.slane %v9478_v63, %v13468_v26  ;;  %v9508_v14 = vcombine.high %v9492_v52, %v9492_v52  ;;  %v9509_v17 = vcombine.high %v9499_v42, %v9499_v42  ;;  %9520 = vst.msk [vmem:[#allocation2 + $0xd] sm:$0x1] %vm1428_vm11, %v9499_v42  ;;  %v9609_v38 = vpop.f32.mrb[86].mxu0  ;;  %v9761_v36 = vpop.f32.mrb[86].mxu1 }
 0xb25   : > { %9521 = vst.msk [vmem:[#allocation2 + $0x15] sm:$0x1] %vm1428_vm11, %v9507_v41  ;;  %9523 = vst.msk [vmem:[#allocation2 + $0x25] sm:$0x1] %vm1428_vm11, %v9492_v52  ;;  %v9358_v8 = vcombine.high %v9354_v19, %v9354_v19  ;;  %v9614_v10 = vcombine.high %v9609_v38, %v9609_v38  ;;  %v9621_v51 = vrot.slane %v9609_v38, %v13468_v26  ;;  %v12408_v0 = vpop.f32.mrb[87].mxu0  ;;  %v12419_v9 = vpop.f32.mrb[87].mxu1 }
 0xb26   : > { %9370 = vst.msk [vmem:[#allocation2 + $0x1c] sm:$0x1] %vm1428_vm11, %v9357_v28  ;;  %9372 = vst.msk [vmem:[#allocation2 + $0x2c] sm:$0x1] %vm1428_vm11, %v9354_v19  ;;  %v9766_v58 = vcombine.high %v9761_v36, %v9761_v36  ;;  %v9510_v46 = vcombine.high %v9506_v12, %v9506_v12  ;;  %v9773_v21 = vrot.slane %v9761_v36, %v13468_v26  ;;  %v11286_v19 = vld [vmem:[%s15178_s6 + $0x60] sm:$0xff]  ;;  %v11288_v38 = vld [vmem:[%s15178_s6 + $0x70] sm:$0xff] }
 0xb27   : > { %9373 = vst.msk [vmem:[#allocation2 + $0x34] sm:$0x1] %vm1428_vm11, %v9356_v44  ;;  %9522 = vst.msk [vmem:[#allocation2 + $0x1d] sm:$0x1] %vm1428_vm11, %v9509_v17  ;;  %v9628_v54 = vrot.slane %v9614_v10, %v13468_v26  ;;  %v9629_v49 = vcombine.high %v9621_v51, %v9621_v51  ;;  %v9637_v13 = vrot.slane %v9621_v51, %v13468_v26  ;;  %v11287_v44 = vld [vmem:[%s15178_s6 + $0x68] sm:$0xff]  ;;  %v10661_v28 = vld [vmem:[%s15180_s8] sm:$0xff] }
 0xb28   : > { %9524 = vst.msk [vmem:[#allocation2 + $0x2d] sm:$0x1] %vm1428_vm11, %v9506_v12  ;;  %9525 = vst.msk [vmem:[#allocation2 + $0x35] sm:$0x1] %vm1428_vm11, %v9508_v14  ;;  %v9780_v4 = vrot.slane %v9766_v58, %v13468_v26  ;;  %v9781_v18 = vcombine.high %v9773_v21, %v9773_v21  ;;  %v9789_v23 = vrot.slane %v9773_v21, %v13468_v26  ;;  %v10662_v12 = vld [vmem:[%s15180_s8 + $0x8] sm:$0xff]  ;;  %v11289_v36 = vld [vmem:[%s15178_s6 + $0x78] sm:$0xff] }
 0xb29   : > { %9374 = vst.msk [vmem:[#allocation2 + $0x3c] sm:$0x1] %vm1428_vm11, %v9358_v8  ;;  %9526 = vst.msk [vmem:[#allocation2 + $0x3d] sm:$0x1] %vm1428_vm11, %v9510_v46  ;;  %v9630_v24 = vcombine.high %v9628_v54, %v9628_v54  ;;  %v9644_v11 = vrot.slane %v9628_v54, %v13468_v26  ;;  %v9651_v39 = vrot.slane %v9629_v49, %v13468_v26  ;;  %v15227_v51 = vmax.f32 %v14468_v56, 0.0 }
 0xb2a   : > { %v9659_v45 = vcombine.high %v9637_v13, %v9637_v13  ;;  %9671 = vst.msk [vmem:[#allocation2 + $0x6] sm:$0x1] %vm1428_vm11, %v9637_v13  ;;  %v9782_v25 = vcombine.high %v9780_v4, %v9780_v4  ;;  %v9796_v29 = vrot.slane %v9780_v4, %v13468_v26  ;;  %v9803_v7 = vrot.slane %v9781_v18, %v13468_v26 }
 0xb2b   : > { %v9811_v20 = vcombine.high %v9789_v23, %v9789_v23  ;;  %9823 = vst.msk [vmem:[#allocation2 + $0x7] sm:$0x1] %vm1428_vm11, %v9789_v23  ;;  %v9658_v59 = vrot.slane %v9630_v24, %v13468_v26  ;;  %v9660_v30 = vcombine.high %v9644_v11, %v9644_v11  ;;  %v9661_v62 = vcombine.high %v9651_v39, %v9651_v39  ;;  %v11291_v23 = vld [vmem:[%s15179_s7 + $0x3] ss:$0 sm:$0xff] }
 0xb2c   : > { %9672 = vst.msk [vmem:[#allocation2 + $0xe] sm:$0x1] %vm1428_vm11, %v9651_v39  ;;  %9673 = vst.msk [vmem:[#allocation2 + $0x16] sm:$0x1] %vm1428_vm11, %v9659_v45  ;;  %v9810_v57 = vrot.slane %v9782_v25, %v13468_v26  ;;  %v9812_v32 = vcombine.high %v9796_v29, %v9796_v29  ;;  %v9813_v60 = vcombine.high %v9803_v7, %v9803_v7  ;;  %v15228_v58 = vmax.f32 %v14465_v40, 0.0 }
 0xb2d   : > { %9675 = vst.msk [vmem:[#allocation2 + $0x26] sm:$0x1] %vm1428_vm11, %v9644_v11  ;;  %9824 = vst.msk [vmem:[#allocation2 + $0xf] sm:$0x1] %vm1428_vm11, %v9803_v7  ;;  %v9662_v16 = vcombine.high %v9658_v59, %v9658_v59  ;;  %v12812_v17 = vpack.c.bf16 %v11287_v44, %v11286_v19  ;;  %v12820_v8 = vpack.c.bf16 %v10662_v12, %v10661_v28  ;;  %v15230_v0 = vmax.f32 %v14471_v1, 0.0 }
 0xb2e   : > { %9825 = vst.msk [vmem:[#allocation2 + $0x17] sm:$0x1] %vm1428_vm11, %v9811_v20  ;;  %9827 = vst.msk [vmem:[#allocation2 + $0x27] sm:$0x1] %vm1428_vm11, %v9796_v29  ;;  %v9814_v2 = vcombine.high %v9810_v57, %v9810_v57  ;;  %v12816_v10 = vpack.c.bf16 %v11289_v36, %v11288_v38  ;;  %v15231_v9 = vmax.f32 %v14488_v34, 0.0  ;;  %v15232_v56 = vmax.f32 %v14481_v37, 0.0 }
 0xb2f   : > { %9674 = vst.msk [vmem:[#allocation2 + $0x1e] sm:$0x1] %vm1428_vm11, %v9661_v62  ;;  %9676 = vst.msk [vmem:[#allocation2 + $0x2e] sm:$0x1] %vm1428_vm11, %v9658_v59  ;;  %v15233_v40 = vmax.f32 %v14495_v61, 0.0  ;;  %v15235_v1 = vmax.f32 %v14510_v6, 0.0 }
 0xb30   : > { %9677 = vst.msk [vmem:[#allocation2 + $0x36] sm:$0x1] %vm1428_vm11, %v9660_v30  ;;  %9826 = vst.msk [vmem:[#allocation2 + $0x1f] sm:$0x1] %vm1428_vm11, %v9813_v60  ;;  %v15236_v34 = vmax.f32 %v14502_v50, 0.0  ;;  %v15237_v37 = vmax.f32 %v14523_v15, 0.0 }
 0xb31   : > { %9828 = vst.msk [vmem:[#allocation2 + $0x2f] sm:$0x1] %vm1428_vm11, %v9810_v57  ;;  %9829 = vst.msk [vmem:[#allocation2 + $0x37] sm:$0x1] %vm1428_vm11, %v9812_v32  ;;  %v15238_v61 = vmax.f32 %v14519_v5, 0.0  ;;  %v15240_v6 = vmax.f32 %v14533_v33, 0.0 }
 0xb32   : > { %9678 = vst.msk [vmem:[#allocation2 + $0x3e] sm:$0x1] %vm1428_vm11, %v9662_v16  ;;  %9830 = vst.msk [vmem:[#allocation2 + $0x3f] sm:$0x1] %vm1428_vm11, %v9814_v2  ;;  %v9831_v26 = vld [vmem:[#allocation2] sm:$0xff]  ;;  %v15241_v50 = vmax.f32 %v14550_v55, 0.0 }
 0xb33   : > { %12420 = vmatprep.subr.mxu0 %v9831_v26  ;;  %v15242_v15 = vmax.f32 %v14545_v53, 0.0  ;;  %v10663_v5 = vld [vmem:[%s15180_s8 + $0x10] sm:$0xff] }
 0xb34   : > { %12421 = vmatpush3.msra.mxu0 %v9831_v26  ;;  %v9832_v47 = vld [vmem:[#allocation2 + $0x8] sm:$0xff] }
 0xb35   : > { %v9833_v31 = vld [vmem:[#allocation2 + $0x10] sm:$0xff]  ;;  %12423 = vmatmul.mubr.msk.f32.vlgmr.msra.gmra.mrb[88].mxu0 %vm2509_vm10, %v12944_v43  ;;  %12425 = vmatprep.subr.mxu1 %v9832_v47  ;;  %v9835_v52 = vld [vmem:[#allocation2 + $0x20] sm:$0xff] }
 0xb36   : > { %12430 = vmatprep.subr.mxu0 %v9833_v31  ;;  %12426 = vmatpush3.msra.mxu1 %v9832_v47 }
 0xb37   : > { %v9834_v63 = vld [vmem:[#allocation2 + $0x18] sm:$0xff]  ;;  %12431 = vmatpush3.msra.mxu0 %v9833_v31  ;;  %12428 = vmatmul.mubr.msk.f32.vlgmr.msra.gmra.mrb[88].mxu1 %vm2509_vm10, %v12944_v43 }
 0xb38   : > { %12435 = vmatprep.subr.mxu1 %v9834_v63  ;;  %12440 = vmatprep.subr.mxu0 %v9835_v52  ;;  %v9836_v42 = vld [vmem:[#allocation2 + $0x28] sm:$0xff]  ;;  %v9837_v41 = vld [vmem:[#allocation2 + $0x30] sm:$0xff] }
 0xb39   : > { %12432 = vmatprep.mubr.msk.f32.mxu0 %vm2509_vm10, %v14825_v27  ;;  %12436 = vmatpush3.msra.mxu1 %v9834_v63  ;;  %v9838_v14 = vld [vmem:[#allocation2 + $0x38] sm:$0xff] }
 0xb3a   : > { %12433 = vmatmul.mubr.msk.f32.vlgmr.msra.gmra.mrb[90].mxu0 %vm2509_vm10, %v12944_v43  ;;  %12445 = vmatprep.subr.mxu1 %v9836_v42 }
 0xb3b   : > { %12441 = vmatpush3.msra.mxu0 %v9835_v52  ;;  %12437 = vmatprep.mubr.msk.f32.mxu1 %vm2509_vm10, %v14825_v27 }
 0xb3c   : > { %12450 = vmatprep.subr.mxu0 %v9837_v41  ;;  %12438 = vmatmul.mubr.msk.f32.vlgmr.msra.gmra.mrb[90].mxu1 %vm2509_vm10, %v12944_v43 }
 0xb3d   : > { %12446 = vmatpush3.msra.mxu1 %v9836_v42  ;;  %12442 = vmatprep.mubr.msk.f32.mxu0 %vm2509_vm10, %v14825_v27 }
 0xb3e   : > { %12455 = vmatprep.subr.mxu1 %v9838_v14  ;;  %12443 = vmatmul.mubr.msk.f32.vlgmr.msra.gmra.mrb[92].mxu0 %vm2509_vm10, %v12944_v43 }
 0xb3f   : > { %12451 = vmatpush3.msra.mxu0 %v9837_v41  ;;  %12447 = vmatprep.mubr.msk.f32.mxu1 %vm2509_vm10, %v14825_v27 }
 0xb40   : > { %12448 = vmatmul.mubr.msk.f32.vlgmr.msra.gmra.mrb[92].mxu1 %vm2509_vm10, %v12944_v43  ;;  %12452 = vmatprep.mubr.msk.f32.mxu0 %vm2509_vm10, %v14825_v27 }
 0xb41   : > { %12456 = vmatpush3.msra.mxu1 %v9838_v14  ;;  %12457 = vmatprep.mubr.msk.f32.mxu1 %vm2509_vm10, %v14825_v27  ;;  %v15229_v27 = vmax.f32 %v14474_v3, 0.0  ;;  %v15234_v3 = vmax.f32 %v14491_v48, 0.0  ;;  %v15239_v48 = vmax.f32 %v14536_v35, 0.0  ;;  %v10664_v35 = vld [vmem:[%s15180_s8 + $0x18] sm:$0xff] }
 0xb42   : > { %12813 = vmatprep.subr.bf16.mxu1 %v12812_v17  ;;  %12453 = vmatmul.mubr.msk.f32.vlgmr.msra.gmra.mrb[94].mxu0 %vm2509_vm10, %v12944_v43  ;;  %v12824_v46 = vpack.c.bf16 %v10664_v35, %v10663_v5 }
 0xb43   : > { %12821 = vmatprep.subr.bf16.mxu0 %v12820_v8 }
 0xb44   : > { %12458 = vmatmul.mubr.msk.f32.vlgmr.msra.gmra.mrb[94].mxu1 %vm2509_vm10, %v12944_v43  ;;  %12823 = vmatpush3.bf16.msra.mxu0 %v12820_v8 }
 0xb45   : > { %12815 = vmatpush3.bf16.msra.mxu1 %v12812_v17  ;;  %12468 = vmatprep.mubr.msk.f32.mxu1 %vm1297_vm9, %v15227_v51 }
 0xb46   : > { %12817 = vmatprep.subr.bf16.mxu1 %v12816_v10  ;;  %12825 = vmatprep.subr.bf16.mxu0 %v12824_v46 }
 0xb48   : > { %12827 = vmatpush3.bf16.msra.mxu0 %v12824_v46 }
 0xb49   : > { %12819 = vmatpush3.bf16.msra.mxu1 %v12816_v10 }
 0xb4c   : > { %12469 = vmatmul.mubr.msk.f32.vlgmr.msra.gmra.mrb[96].mxu1 %vm1297_vm9, %v15228_v58 }
 0xb4d   : > { %12471 = vmatprep.mubr.msk.f32.mxu1 %vm1297_vm9, %v15229_v27 }
 0xb50   : > { %12472 = vmatmul.mubr.msk.f32.gmra.mrb[88].mxu1 %vm1297_vm9, %v15230_v0 }
 0xb51   : > { %12474 = vmatprep.mubr.msk.f32.mxu1 %vm1297_vm9, %v15231_v9 }
 0xb54   : > { %12475 = vmatmul.mubr.msk.f32.gmra.mrb[98].mxu1 %vm1297_vm9, %v15232_v56  ;;  %v15060_v56 = vld [vmem:[%s15181_s9] ss:$0 sm:$0xff] }
 0xb55   : > { %12477 = vmatprep.mubr.msk.f32.mxu1 %vm1297_vm9, %v15233_v40 }
 0xb58   : > { %12478 = vmatmul.mubr.msk.f32.gmra.mrb[90].mxu1 %vm1297_vm9, %v15234_v3 }
 0xb59   : > { %12480 = vmatprep.mubr.msk.f32.mxu1 %vm1297_vm9, %v15235_v1 }
 0xb5c   : > { %12481 = vmatmul.mubr.msk.f32.gmra.mrb[100].mxu1 %vm1297_vm9, %v15236_v34 }
 0xb5d   : > { %12483 = vmatprep.mubr.msk.f32.mxu1 %vm1297_vm9, %v15237_v37  ;;  %v15067_v37 = vld [vmem:[%s15182_s10] ss:$0 sm:$0xff] }
 0xb60   : > { %12484 = vmatmul.mubr.msk.f32.gmra.mrb[92].mxu1 %vm1297_vm9, %v15238_v61 }
 0xb61   : > { %12486 = vmatprep.mubr.msk.f32.mxu1 %vm1297_vm9, %v15239_v48 }
 0xb64   : > { %12487 = vmatmul.mubr.msk.f32.gmra.mrb[102].mxu1 %vm1297_vm9, %v15240_v6 }
 0xb65   : > { %12489 = vmatprep.mubr.msk.f32.mxu1 %vm1297_vm9, %v15241_v50 }
 0xb68   : > { %12490 = vmatmul.mubr.msk.f32.gmra.mrb[94].mxu1 %vm1297_vm9, %v15242_v15 }
 0xc08   : > { %v12424_v33 = vpop.f32.mrb[88].mxu0 }
 0xc09   : > { %v9905_v21 = vpop.f32.mrb[89].mxu0 }
 0xc0d   : > { %v12434_v55 = vpop.f32.mrb[90].mxu0 }
 0xc0e   : > { %v10055_v54 = vpop.f32.mrb[91].mxu0  ;;  %v12834_v20 = vadd.f32 %v12434_v55, %v11291_v23 }
 0xc0f   : > { %v12836_v30 = vadd.f32 %v11291_v23, %v10055_v54 }
 0xc11   : > { %v12444_v49 = vpop.f32.mrb[92].mxu0 }
 0xc12   : > { %v10205_v13 = vpop.f32.mrb[93].mxu0  ;;  %v12840_v47 = vadd.f32 %v12444_v49, %v11291_v23 }
 0xc13   : > { %v12842_v43 = vadd.f32 %v11291_v23, %v10205_v13 }
 0xc15   : > { %v12454_v53 = vpop.f32.mrb[94].mxu0 }
 0xc16   : > { %v10355_v4 = vpop.f32.mrb[95].mxu0  ;;  %v12846_v12 = vadd.f32 %v12454_v53, %v11291_v23 }
 0xc17   : > { %v12848_v17 = vadd.f32 %v11291_v23, %v10355_v4 }
 0xc1f   : > { %v12470_v18 = vpop.f32.mrb[96].mxu1 }
 0xc20   : > { %v12828_v24 = vadd.f32 %v12470_v18, %v12424_v33  ;;  %v10566_v11 = vpop.f32.mrb[97].mxu1 }
 0xc21   : > { %v12830_v39 = vadd.f32 %v10566_v11, %v9905_v21 }
 0xc22   : > { %v12829_v29 = vadd.f32 %v12828_v24, %v11291_v23 }
 0xc23   : > { %v12831_v45 = vadd.f32 %v12830_v39, %v11291_v23  ;;  %v12473_v25 = vpop.f32.mrb[88].mxu1 }
 0xc24   : > { %v10576_v7 = vpop.f32.mrb[89].mxu1  ;;  %v10582_v57 = vadd.f32 %v12473_v25, %v11291_v23 }
 0xc25   : > { %v10577_v59 = vadd.f32 %v11291_v23, %v10576_v7  ;;  %12500 = vmatprep.mubr.msk.f32.mxu0 %vm1297_vm9, %v12831_v45 }
 0xc26   : > { %12501 = vmatmul.mubr.msk.f32.vlgmr.msra.gmra.mrb[96].mxu0 %vm1297_vm9, %v12829_v29 }
 0xc27   : > { %v12476_v62 = vpop.f32.mrb[98].mxu1  ;;  %12503 = vmatprep.mubr.msk.f32.mxu0 %vm1297_vm9, %v10577_v59 }
 0xc28   : > { %v12835_v32 = vadd.f32 %v12834_v20, %v12476_v62  ;;  %v10586_v60 = vpop.f32.mrb[99].mxu1 }
 0xc29   : > { %v12837_v16 = vadd.f32 %v12836_v30, %v10586_v60 }
 0xc2a   : > { %12504 = vmatmul.mubr.msk.f32.gmra.mrb[98].mxu0 %vm1297_vm9, %v10582_v57 }
 0xc2b   : > { %v12479_v2 = vpop.f32.mrb[90].mxu1  ;;  %12506 = vmatprep.mubr.msk.f32.mxu0 %vm1297_vm9, %v12837_v16 }
 0xc2c   : > { %v10596_v26 = vpop.f32.mrb[91].mxu1  ;;  %v10602_v52 = vadd.f32 %v12479_v2, %v11291_v23 }
 0xc2d   : > { %v10597_v31 = vadd.f32 %v11291_v23, %v10596_v26 }
 0xc2e   : > { %12507 = vmatmul.mubr.msk.f32.gmra.mrb[100].mxu0 %vm1297_vm9, %v12835_v32 }
 0xc2f   : > { %v12482_v63 = vpop.f32.mrb[100].mxu1  ;;  %12509 = vmatprep.mubr.msk.f32.mxu0 %vm1297_vm9, %v10597_v31 }
 0xc30   : > { %v12841_v42 = vadd.f32 %v12840_v47, %v12482_v63  ;;  %v10606_v41 = vpop.f32.mrb[101].mxu1 }
 0xc31   : > { %v12843_v19 = vadd.f32 %v12842_v43, %v10606_v41 }
 0xc32   : > { %12510 = vmatmul.mubr.msk.f32.gmra.mrb[102].mxu0 %vm1297_vm9, %v10602_v52 }
 0xc33   : > { %v12485_v44 = vpop.f32.mrb[92].mxu1  ;;  %12512 = vmatprep.mubr.msk.f32.mxu0 %vm1297_vm9, %v12843_v19 }
 0xc34   : > { %v10616_v28 = vpop.f32.mrb[93].mxu1  ;;  %v10622_v36 = vadd.f32 %v12485_v44, %v11291_v23 }
 0xc35   : > { %v10617_v14 = vadd.f32 %v11291_v23, %v10616_v28 }
 0xc36   : > { %12513 = vmatmul.mubr.msk.f32.gmra.mrb[104].mxu0 %vm1297_vm9, %v12841_v42 }
 0xc37   : > { %v12488_v38 = vpop.f32.mrb[102].mxu1  ;;  %12515 = vmatprep.mubr.msk.f32.mxu0 %vm1297_vm9, %v10617_v14 }
 0xc38   : > { %v12847_v8 = vadd.f32 %v12846_v12, %v12488_v38  ;;  %v10626_v10 = vpop.f32.mrb[103].mxu1 }
 0xc39   : > { %v12849_v51 = vadd.f32 %v12848_v17, %v10626_v10 }
 0xc3a   : > { %12516 = vmatmul.mubr.msk.f32.gmra.mrb[106].mxu0 %vm1297_vm9, %v10622_v36 }
 0xc3b   : > { %v12491_v58 = vpop.f32.mrb[94].mxu1  ;;  %12518 = vmatprep.mubr.msk.f32.mxu0 %vm1297_vm9, %v12849_v51 }
 0xc3c   : > { %v10636_v27 = vpop.f32.mrb[95].mxu1  ;;  %v10642_v9 = vadd.f32 %v12491_v58, %v11291_v23 }
 0xc3d   : > { %v10637_v0 = vadd.f32 %v11291_v23, %v10636_v27 }
 0xc3e   : > { %12519 = vmatmul.mubr.msk.f32.gmra.mrb[108].mxu0 %vm1297_vm9, %v12847_v8 }
 0xc3f   : > { %12521 = vmatprep.mubr.msk.f32.mxu0 %vm1297_vm9, %v10637_v0 }
 0xc42   : > { %12522 = vmatmul.mubr.msk.f32.gmra.mrb[110].mxu0 %vm1297_vm9, %v10642_v9 }
 0xcf9   : > { %v12502_v40 = vpop.f32.mrb[96].mxu0 }
 0xcfa   : > { %v10792_v3 = vadd.f32 %v12502_v40, %v15060_v56  ;;  %v10786_v1 = vpop.f32.mrb[97].mxu0 }
 0xcfb   : > { %v10787_v34 = vadd.f32 %v15060_v56, %v10786_v1 }
 0xcfc   : > { %v10866_v61 = vmax.f32 %v10792_v3, 0.0 }
 0xcfd   : > { %v10865_v48 = vmax.f32 %v10787_v34, 0.0  ;;  %v12505_v6 = vpop.f32.mrb[98].mxu0  ;;  %v11326_v34 = vld [vmem:[#allocation3] ss:$0 sm:$0xff] }
 0xcfe   : > { %v10802_v50 = vadd.f32 %v12505_v6, %v15060_v56  ;;  %v10796_v15 = vpop.f32.mrb[99].mxu0  ;;  %v10889_v5 = vmul.f32 %v15067_v37, %v10866_v61 }
 0xcff   : > { %v10797_v35 = vadd.f32 %v15060_v56, %v10796_v15  ;;  %v10888_v46 = vmul.f32 %v15067_v37, %v10865_v48 }
 0xd00   : > { %v10868_v33 = vmax.f32 %v10802_v50, 0.0  ;;  %10906 = vadd.xlane.f32.xlu0 %v10889_v5 }
 0xd01   : > { %v10867_v21 = vmax.f32 %v10797_v35, 0.0  ;;  %10904 = vadd.xlane.f32.xlu1 %v10888_v46  ;;  %v12508_v55 = vpop.f32.mrb[100].mxu0 }
 0xd02   : > { %v10812_v54 = vadd.f32 %v12508_v55, %v15060_v56  ;;  %v10806_v49 = vpop.f32.mrb[101].mxu0  ;;  %v10891_v13 = vmul.f32 %v15067_v37, %v10868_v33 }
 0xd03   : > { %v10807_v53 = vadd.f32 %v15060_v56, %v10806_v49  ;;  %v10890_v4 = vmul.f32 %v15067_v37, %v10867_v21 }
 0xd04   : > { %v10870_v18 = vmax.f32 %v10812_v54, 0.0  ;;  %v15243_v54 = vlaneseq }
 0xd05   : > { %v10869_v23 = vmax.f32 %v10807_v53, 0.0  ;;  %10910 = vadd.xlane.f32.xlu1 %v10891_v13  ;;  %v12511_v24 = vpop.f32.mrb[102].mxu0  ;;  %10908 = vadd.xlane.f32.xlu0 %v10890_v4 }
 0xd06   : > { %v10822_v11 = vadd.f32 %v12511_v24, %v15060_v56  ;;  %v10816_v39 = vpop.f32.mrb[103].mxu0  ;;  %v10893_v45 = vmul.f32 %v15067_v37, %v10870_v18  ;;  %v10979_v49 = vand.u32 127, %v15243_v54 }
 0xd07   : > { %v10817_v25 = vadd.f32 %v15060_v56, %v10816_v39  ;;  %v10892_v29 = vmul.f32 %v15067_v37, %v10869_v23 }
 0xd08   : > { %v10872_v7 = vmax.f32 %v10822_v11, 0.0  ;;  %v10984_v53 = vadd.s32 4294967288, %v10979_v49  ;;  %v10982_v23 = vsub.s32 %v10979_v49, %v13250_v22 }
 0xd09   : > { %v10871_v20 = vmax.f32 %v10817_v25, 0.0  ;;  %10914 = vadd.xlane.f32.xlu1 %v10893_v45  ;;  %v12514_v59 = vpop.f32.mrb[104].mxu0  ;;  %10912 = vadd.xlane.f32.xlu0 %v10892_v29 }
 0xd0a   : > { %v10832_v30 = vadd.f32 %v12514_v59, %v15060_v56  ;;  %v10826_v62 = vpop.f32.mrb[105].mxu0  ;;  %v10895_v57 = vmul.f32 %v15067_v37, %v10872_v7  ;;  %v10987_v24 = vsub.s32 %v10984_v53, %v13250_v22 }
 0xd0b   : > { %v10827_v32 = vadd.f32 %v15060_v56, %v10826_v62  ;;  %v10894_v60 = vmul.f32 %v15067_v37, %v10871_v20 }
 0xd0c   : > { %v10874_v16 = vmax.f32 %v10832_v30, 0.0 }
 0xd0d   : > { %v10873_v2 = vmax.f32 %v10827_v32, 0.0  ;;  %10918 = vadd.xlane.f32.xlu1 %v10895_v57  ;;  %v12517_v26 = vpop.f32.mrb[106].mxu0  ;;  %10916 = vadd.xlane.f32.xlu0 %v10894_v60 }
 0xd0e   : > { %v10842_v47 = vadd.f32 %v12517_v26, %v15060_v56  ;;  %v10836_v31 = vpop.f32.mrb[107].mxu0  ;;  %v10897_v43 = vmul.f32 %v15067_v37, %v10874_v16 }
 0xd0f   : > { %v10837_v63 = vadd.f32 %v15060_v56, %v10836_v31  ;;  %v10896_v52 = vmul.f32 %v15067_v37, %v10873_v2 }
 0xd10   : > { %v10876_v42 = vmax.f32 %v10842_v47, 0.0 }
 0xd11   : > { %v10875_v41 = vmax.f32 %v10837_v63, 0.0  ;;  %10922 = vadd.xlane.f32.xlu1 %v10897_v43  ;;  %v12520_v19 = vpop.f32.mrb[108].mxu0  ;;  %10920 = vadd.xlane.f32.xlu0 %v10896_v52 }
 0xd12   : > { %v10852_v44 = vadd.f32 %v12520_v19, %v15060_v56  ;;  %v10846_v28 = vpop.f32.mrb[109].mxu0  ;;  %v10899_v12 = vmul.f32 %v15067_v37, %v10876_v42 }
 0xd13   : > { %v10847_v14 = vadd.f32 %v15060_v56, %v10846_v28  ;;  %v10898_v17 = vmul.f32 %v15067_v37, %v10875_v41 }
 0xd14   : > { %v10878_v38 = vmax.f32 %v10852_v44, 0.0 }
 0xd15   : > { %v10877_v36 = vmax.f32 %v10847_v14, 0.0  ;;  %10926 = vadd.xlane.f32.xlu1 %v10899_v12  ;;  %v12523_v8 = vpop.f32.mrb[110].mxu0  ;;  %10924 = vadd.xlane.f32.xlu0 %v10898_v17 }
 0xd16   : > { %v10862_v10 = vadd.f32 %v12523_v8, %v15060_v56  ;;  %v10856_v51 = vpop.f32.mrb[111].mxu0  ;;  %v10901_v58 = vmul.f32 %v15067_v37, %v10878_v38 }
 0xd17   : > { %v10857_v27 = vadd.f32 %v15060_v56, %v10856_v51  ;;  %v10900_v0 = vmul.f32 %v15067_v37, %v10877_v36 }
 0xd18   : > { %v10880_v9 = vmax.f32 %v10862_v10, 0.0 }
 0xd19   : > { %v10879_v40 = vmax.f32 %v10857_v27, 0.0  ;;  %10930 = vadd.xlane.f32.xlu1 %v10901_v58  ;;  %10928 = vadd.xlane.f32.xlu0 %v10900_v0 }
 0xd1a   : > { %v10903_v3 = vmul.f32 %v15067_v37, %v10880_v9 }
 0xd1b   : > { %v10902_v1 = vmul.f32 %v15067_v37, %v10879_v40 }
 0xd1d   : > { %10934 = vadd.xlane.f32.xlu1 %v10903_v3  ;;  %10932 = vadd.xlane.f32.xlu0 %v10902_v1 }
 0xd33   : > { %10943 = vperm.xlu0 %12935, %v11326_v34  }
 0xd8d   : > { %v10907_v61 = vpop.xlane.xlu0 %10906 }
 0xd8e   : > { %v10905_v48 = vpop.xlane.xlu1 %10904 }
 0xd92   : > { %v10909_v6 = vpop.xlane.xlu0 %10908  ;;  %v10911_v50 = vpop.xlane.xlu1 %10910 }
 0xd96   : > { %v10913_v15 = vpop.xlane.xlu0 %10912  ;;  %v10915_v56 = vpop.xlane.xlu1 %10914 }
 0xd9a   : > { %v10917_v5 = vpop.xlane.xlu0 %10916  ;;  %v10919_v46 = vpop.xlane.xlu1 %10918 }
 0xd9e   : > { %v10921_v35 = vpop.xlane.xlu0 %10920  ;;  %v10923_v21 = vpop.xlane.xlu1 %10922 }
 0xda2   : > { %v10925_v33 = vpop.xlane.xlu0 %10924  ;;  %v10927_v37 = vpop.xlane.xlu1 %10926 }
 0xda6   : > { %v10929_v55 = vpop.xlane.xlu0 %10928  ;;  %v10931_v4 = vpop.xlane.xlu1 %10930 }
 0xdaa   : > { %v10933_v13 = vpop.xlane.xlu0 %10932  ;;  %v10935_v2 = vpop.xlane.xlu1 %10934 }
 0xdb2   : > { %v10944_v18 = vpop.permute.xlu0 %10943 }
 0xdb3   : > { %v10946_v11 = vadd.f32 %v10944_v18, %v10905_v48  ;;  %v10947_v39 = vadd.f32 %v10944_v18, %v10907_v61  ;;  %v10948_v45 = vadd.f32 %v10944_v18, %v10909_v6  ;;  %v10949_v25 = vadd.f32 %v10944_v18, %v10911_v50 }
 0xdb4   : > { %v10950_v29 = vadd.f32 %v10944_v18, %v10913_v15  ;;  %v10951_v7 = vadd.f32 %v10944_v18, %v10915_v56  ;;  %v10952_v20 = vadd.f32 %v10944_v18, %v10917_v5  ;;  %v10953_v59 = vadd.f32 %v10944_v18, %v10919_v46 }
 0xdb5   : > { %v10954_v30 = vadd.f32 %v10944_v18, %v10921_v35  ;;  %v10955_v62 = vadd.f32 %v10944_v18, %v10923_v21  ;;  %v10956_v57 = vadd.f32 %v10944_v18, %v10925_v33  ;;  %v10957_v32 = vadd.f32 %v10944_v18, %v10927_v37 }
 0xdb6   : > { %v10958_v60 = vadd.f32 %v10944_v18, %v10929_v55  ;;  %v10959_v16 = vadd.f32 %v10944_v18, %v10931_v4  ;;  %v10983_v26 = vrot.slane %v10946_v11, %v10982_v23  ;;  %v10988_v22 = vrot.slane %v10947_v39, %v10987_v24 }
 0xdb7   : > { %v10994_v47 = vrot.slane %v10948_v45, %v10982_v23  ;;  %v10998_v31 = vrot.slane %v10949_v25, %v10987_v24  ;;  %v10960_v43 = vadd.f32 %v10944_v18, %v10933_v13  ;;  %v10961_v63 = vadd.f32 %v10944_v18, %v10935_v2 }
 0xdb8   : > { %v11003_v52 = vrot.slane %v10950_v29, %v10982_v23  ;;  %v11007_v42 = vrot.slane %v10951_v7, %v10987_v24  ;;  %v10990_v41 = vsel %vm10989_vm12, %v10988_v22, %v10983_v26  ;;  %v11012_v44 = vrot.slane %v10952_v20, %v10982_v23 }
 0xdb9   : > { %v10999_v19 = vsel %vm10989_vm12, %v10998_v31, %v10994_v47  ;;  %v11016_v28 = vrot.slane %v10953_v59, %v10987_v24  ;;  %v11021_v14 = vrot.slane %v10954_v30, %v10982_v23  ;;  %v11025_v17 = vrot.slane %v10955_v62, %v10987_v24 }
 0xdba   : > { %v11008_v12 = vsel %vm10989_vm12, %v11007_v42, %v11003_v52  ;;  %v11030_v38 = vrot.slane %v10956_v57, %v10982_v23  ;;  %v11034_v36 = vrot.slane %v10957_v32, %v10987_v24  ;;  %v11039_v8 = vrot.slane %v10958_v60, %v10982_v23 }
 0xdbb   : > { %v11043_v10 = vrot.slane %v10959_v16, %v10987_v24  ;;  %v11054_v51 = vsel %vm1277_vm2, %v10999_v19, %v10990_v41  ;;  %v11017_v58 = vsel %vm10989_vm12, %v11016_v28, %v11012_v44  ;;  %v11048_v27 = vrot.slane %v10960_v43, %v10982_v23 }
 0xdbc   : > { %v11052_v0 = vrot.slane %v10961_v63, %v10987_v24  ;;  %v11055_v9 = vsel %vm1280_vm3, %v11008_v12, %v11054_v51  ;;  %v11026_v40 = vsel %vm10989_vm12, %v11025_v17, %v11021_v14  ;;  %v11035_v1 = vsel %vm10989_vm12, %v11034_v36, %v11030_v38 }
 0xdbd   : > { %v11056_v3 = vsel %vm1283_vm4, %v11017_v58, %v11055_v9  ;;  %v11044_v61 = vsel %vm10989_vm12, %v11043_v10, %v11039_v8 }
 0xdbe   : > { %v11057_v34 = vsel %vm1286_vm5, %v11026_v40, %v11056_v3  ;;  %v11053_v6 = vsel %vm10989_vm12, %v11052_v0, %v11048_v27 }
 0xdbf   : > { %v11058_v48 = vsel %vm1289_vm6, %v11035_v1, %v11057_v34 }
 0xdc0   : > { %v11059_v50 = vsel %vm1292_vm7, %v11044_v61, %v11058_v48 }
 0xdc1   : > { %v11060_v15 = vsel %vm1295_vm8, %v11053_v6, %v11059_v50 }
 0xdc2   : > { %11062 = vst.msk [vmem:[%s423_s16] sm:$0xff] %vm704_vm1, %v11060_v15 }
 0xdc3   : > { %12986 = shalt.err (!%p12983_p7)
}
 0xdc4   : > { %s12987_s13 = scalar_lea.hbm %s15126_s20, 128  ;;  %s12991_s30 = scalar_lea.hbm %s15184_s12, 256 }
 0xdc5   : > { %p12988_p8 = scmp.ne.s32.totalorder %s15126_s20, %s12987_s13  ;;  %p12992_p1 = scmp.lt.u32.totalorder %s15126_s20, %s15184_s12 }
 0xdc6   : > { %p12993_p0 = scmp.lt.u32.totalorder %s12991_s30, %s12987_s13  ;;  %p12995_p6 = scmp.lt.u32.totalorder %s12987_s13, %s15126_s20 }
 0xdc7   : > { %p12989_p11 = pnand %p12988_p8, %p15244_p9 }
 0xdc8   : > { %p12994_p5 = por %p12993_p0, %p12992_p1 }
 0xdc9   : > { %p12990_p13 = pneg %p12989_p11 }
 0xdca   : > { %p12996_p10 = por %p12995_p6, %p12994_p5 }
 0xdcc   : > { %p12997_p12 = pnand %p12996_p10, %p12990_p13 }
 0xdce   : > { %13000 = shalt.err (!%p12997_p12)
}
 0xdcf   : > { %12864 = dma.vmem_to_hbm [thread:$0]  (%p15244_p9), %s15128_s22, 128, %s15126_s20, %s11064_s11  }
 0xdd0 PF: > { %p12876_p2 = scmp.ge.s32.totalorder %s13039_s26, 2  ;;  %s11089_s21 = sand.u32 1, %s13027_s23  }
 0xdd1   : > { %p15245_p3 = scmp.ne.s32.totalorder %s15209_s15, 0  ;;  %s11090_s29 = scalar_lea.sflag [#allocation6], %s11089_s21 }
 0xdd3   : > { %p12871_p4 = pnand %p12876_p2, %p15245_p3 }
 0xdd5   : > { %13022 = dma.done.wait (!%p12871_p4), %s11090_s29, 128  }
 0xdd6   : > { %13024 = vsyncadd (!%p12871_p4), %s11090_s29, 4294967168  ;;  %s15246_s18 = sld [smem:[#allocation10_spill]]  ;;  %p25_p7 = scmp.ge.s32.totalorder %s13144_s28, 4  }
 0xdd7   : > { %s15247_s23 = smov %s13031_s24  ;;  %s15248_s24 = smov %s13035_s25 }
 0xdd8   : > { %s15250_s26 = smov %s13144_s28  ;;  %27 = sbr.rel (!%p25_p7) target bundleno = 7 (0x7), region = 113 }
 0xddc   : > { %s15249_s25 = smov %s15246_s18 }
 0xddf   :  { %11095 = vsyncpa [#allocation5], 1 }
 0xde0   :  { %11097 = vsyncpa [#allocation5 + $0x1], 1 }
 0xde1   :  { %11098 = vsyncpa [#allocation6], 1 }
 0xde2   :  { %11100 = vsyncpa [#allocation6 + $0x1], 1 }

</bundles_post_ra>
